<compile_context>
chip_gen: v7x
topology: tpu7x:2x2x1
jax: 0.10.0
libtpu: 0.0.40
codegen_flags: <defaults>
</compile_context>

<pallas_src>
import functools

import jax
import jax.numpy as jnp
from jax.experimental import pallas as pl
from jax.experimental.pallas import tpu as pltpu

EPS = 1e-5  # nn.InstanceNorm2d default (affine=False, biased variance)


def _decoder_kernel(has_skip, has_proto, *refs):
    # refs = (x_ref, w_ref, [skip_ref], [proto_ref], out_ref, xp_scr)
    idx = 0
    x_ref = refs[idx]; idx += 1
    w_ref = refs[idx]; idx += 1
    skip_ref = None
    proto_ref = None
    if has_skip:
        skip_ref = refs[idx]; idx += 1
    if has_proto:
        proto_ref = refs[idx]; idx += 1
    out_ref = refs[idx]; idx += 1
    xp_scr = refs[idx]

    H = x_ref.shape[1]
    W = x_ref.shape[2]
    Cin = x_ref.shape[3]
    Cout = w_ref.shape[1] // 4
    Ctot = out_ref.shape[4] // 2

    # ---- build the zero-padded input on-chip: zero ONLY the halo strips -----
    zrow = jnp.zeros((1, W + 2, Cin), xp_scr.dtype)
    zcol = jnp.zeros((H + 2, 1, Cin), xp_scr.dtype)
    xp_scr[0:1, :, :] = zrow
    xp_scr[H + 1:H + 2, :, :] = zrow
    xp_scr[:, 0:1, :] = zcol
    xp_scr[:, W + 1:W + 2, :] = zcol
    xp_scr[1:H + 1, 1:W + 1, :] = x_ref[0]

    # ---- single im2col matmul producing all 4 output parities at once -------
    views = [xp_scr[sy:sy + H, sx:sx + W, :]
             for sy in range(3) for sx in range(3)]            # 9 x (H, W, Cin)
    slab = jnp.concatenate(views, axis=-1).reshape(H * W, 9 * Cin)
    res = jnp.dot(slab, w_ref[...], preferred_element_type=jnp.float32)
    # res: (H*W, 4*Cout), lane dim ordered (q = 2*py + px, co)

    # ---- InstanceNorm2d (two-pass, biased variance) + ReLU, all in f32 ------
    cnt = float(4 * H * W)
    s1 = jnp.sum(res, axis=0, keepdims=True)                   # (1, 4*Cout)
    mean = (s1[:, 0:Cout] + s1[:, Cout:2 * Cout]
            + s1[:, 2 * Cout:3 * Cout] + s1[:, 3 * Cout:4 * Cout]) / cnt
    mean4 = jnp.concatenate([mean] * 4, axis=1)                # (1, 4*Cout)
    d = res - mean4
    s2 = jnp.sum(d * d, axis=0, keepdims=True)
    var = (s2[:, 0:Cout] + s2[:, Cout:2 * Cout]
           + s2[:, 2 * Cout:3 * Cout] + s2[:, 3 * Cout:4 * Cout]) / cnt
    inv = jax.lax.rsqrt(jnp.maximum(var, 0.0) + EPS)
    inv4 = jnp.concatenate([inv] * 4, axis=1)
    y = jnp.maximum(d * inv4, 0.0).astype(out_ref.dtype)       # (H*W, 4*Cout)

    # ---- scatter parity blocks + fused channel concat into the output -------
    # out block: (1, H, 2, W, 2*Ctot); element [0, iy, py, ix, px*Ctot + c]
    # is final NHWC pixel (2*iy+py, 2*ix+px), channel c.
    for py in (0, 1):
        for px in (0, 1):
            q = 2 * py + px
            blk = y[:, q * Cout:(q + 1) * Cout].reshape(H, W, Cout)
            out_ref[0, :, py, :, px * Ctot:px * Ctot + Cout] = blk

    if has_skip:
        Cs = skip_ref.shape[4] // 2
        for py in (0, 1):
            for px in (0, 1):
                out_ref[0, :, py, :,
                        px * Ctot + Cout:px * Ctot + Cout + Cs] = \
                    skip_ref[0, :, py, :, px * Cs:(px + 1) * Cs].astype(out_ref.dtype)

    if has_proto:
        Cp = proto_ref.shape[3]
        base = Ctot - Cp
        pm = proto_ref[0].astype(out_ref.dtype)                # (H, W, Cp)
        for py in (0, 1):                                      # nearest x2 upsample
            for px in (0, 1):
                out_ref[0, :, py, :,
                        px * Ctot + base:px * Ctot + base + Cp] = pm


def _vmem_limit_bytes():
    # ~75% of physical VMEM (v5e/v6e: 128 MiB -> 96 MiB, v7x: 64 MiB -> 48 MiB),
    # leaving headroom for double-buffering.
    cap = 64 * 1024 * 1024
    try:
        cap = int(pltpu.get_tpu_info().vmem_capacity_bytes)
    except Exception:
        pass
    return min(max(cap * 3 // 4, 32 * 1024 * 1024), 100 * 1024 * 1024)


def _fold_weight_im2col(weight):
    """torch ConvTranspose2d weight (Cin, Cout, 4, 4) -> (9*Cin, 4*Cout).

    Row index  = (sy*3 + sx)*Cin + ci   (3x3 input-neighborhood shift, channel)
    Col index  = (2*py + px)*Cout + co  (output parity, channel)
    Entry      = w[ci, co, 3-2*sy+py, 3-2*sx+px] when that tap is in [0,4), else 0.
    """
    Cin, Cout = weight.shape[0], weight.shape[1]
    w_hw = jnp.transpose(weight, (2, 3, 0, 1))                 # (ky, kx, Cin, Cout)
    s = jnp.arange(3)[:, None]
    p = jnp.arange(2)[None, :]
    k = 3 - 2 * s + p                                          # (3, 2)
    valid = (k >= 0) & (k <= 3)
    k_c = jnp.clip(k, 0, 3)
    w9 = w_hw[k_c[:, None, :, None], k_c[None, :, None, :]]    # (3,3,2,2,Cin,Cout)
    mask = (valid[:, None, :, None] & valid[None, :, None, :]).astype(w9.dtype)
    w9 = w9 * mask[..., None, None]
    w9 = jnp.transpose(w9, (0, 1, 4, 2, 3, 5))                 # (sy,sx,ci,py,px,co)
    return w9.reshape(9 * Cin, 4 * Cout)


def decoder_block_forward(x, weight, skip=None, protomap=None,
                          proto_scale_factor=2):
    """x: (N,H,W,Cin) NHWC; weight: (Cin,Cout,4,4) torch ConvTranspose2d layout;
    skip: (N,2H,2W,Cs) or None; protomap: (N,Hp,Wp,Cp) or None.
    Returns (N, 2H, 2W, Cout [+ Cs] [+ Cp])."""
    N, H, W, Cin = x.shape
    Cout = weight.shape[1]
    w9 = _fold_weight_im2col(weight)

    # Standard decoder usage (scale=2, protomap at the same resolution as x) is
    # fused in-kernel; other scales fall back to a wrapper-side upsample.
    proto_fused = (protomap is not None and int(proto_scale_factor) == 2
                   and protomap.shape[1] == H and protomap.shape[2] == W)
    skip_eff = skip
    if protomap is not None and not proto_fused:
        s = int(proto_scale_factor)
        Np, Hp, Wp, Cp = protomap.shape
        pm = jnp.broadcast_to(protomap[:, :, None, :, None, :],
                              (Np, Hp, s, Wp, s, Cp)).reshape(Np, Hp * s, Wp * s, Cp)
        skip_eff = pm if skip_eff is None else jnp.concatenate([skip_eff, pm], -1)

    Cs = 0 if skip_eff is None else skip_eff.shape[-1]
    Cp = protomap.shape[-1] if proto_fused else 0
    Ctot = Cout + Cs + Cp

    inputs = [x, w9]
    in_specs = [
        pl.BlockSpec((1, H, W, Cin), lambda n: (n, 0, 0, 0)),
        pl.BlockSpec((9 * Cin, 4 * Cout), lambda n: (0, 0)),
    ]
    if skip_eff is not None:
        # Free reshape: skip[n, 2iy+py, 2ix+px, c] -> skip2[n, iy, py, ix, px*Cs+c]
        skip2 = skip_eff.reshape(N, H, 2, W, 2 * Cs)
        inputs.append(skip2)
        in_specs.append(pl.BlockSpec((1, H, 2, W, 2 * Cs),
                                     lambda n: (n, 0, 0, 0, 0)))
    if proto_fused:
        inputs.append(protomap)
        in_specs.append(pl.BlockSpec((1, H, W, Cp), lambda n: (n, 0, 0, 0)))

    out5 = pl.pallas_call(
        functools.partial(_decoder_kernel, skip_eff is not None, proto_fused),
        out_shape=jax.ShapeDtypeStruct((N, H, 2, W, 2 * Ctot), x.dtype),
        grid=(N,),
        in_specs=in_specs,
        out_specs=pl.BlockSpec((1, H, 2, W, 2 * Ctot),
                               lambda n: (n, 0, 0, 0, 0)),
        scratch_shapes=[pltpu.VMEM((H + 2, W + 2, Cin), x.dtype)],
        compiler_params=pltpu.CompilerParams(
            dimension_semantics=("parallel",),
            vmem_limit_bytes=_vmem_limit_bytes()),
    )(*inputs)

    # Zero-copy un-interleave: (N, H, 2, W, 2*Ctot) -> (N, 2H, 2W, Ctot).
    # dropout=0.0 in this configuration -> no dropout layer is created.
    return out5.reshape(N, 2 * H, 2 * W, Ctot)


def _reference(x, weight, skip, protomap, scale):
    """Pure-JAX reference (transposed conv via dilated conv with flipped kernel)."""
    w = jnp.transpose(weight, (2, 3, 0, 1))
    wf = w[::-1, ::-1, :, :]
    y = jax.lax.conv_general_dilated(
        x, wf, window_strides=(1, 1), padding=((2, 2), (2, 2)),
        lhs_dilation=(2, 2), dimension_numbers=("NHWC", "HWIO", "NHWC"),
        precision=jax.lax.Precision.HIGHEST)
    mean = jnp.mean(y, axis=(1, 2), keepdims=True)
    var = jnp.mean((y - mean) ** 2, axis=(1, 2), keepdims=True)
    y = jnp.maximum((y - mean) * jax.lax.rsqrt(var + EPS), 0.0)
    out = jnp.concatenate([y, skip], axis=-1)
    pm = jnp.repeat(jnp.repeat(protomap, scale, axis=1), scale, axis=2)
    return jnp.concatenate([out, pm], axis=-1)


if __name__ == "__main__":
    key = jax.random.PRNGKey(0)
    k1, k2, k3, k4 = jax.random.split(key, 4)

    N, H, W = 2, 16, 16
    in_ch, skip_ch, proto_ch, out_ch = 4, 2, 2, 8
    Cin = in_ch + skip_ch + proto_ch   # deconv input channels

    x = jax.random.normal(k1, (N, H, W, Cin), jnp.float32)
    weight = jax.random.normal(k2, (Cin, out_ch, 4, 4), jnp.float32) * 0.1
    skip = jax.random.normal(k3, (N, 2 * H, 2 * W, skip_ch), jnp.float32)
    protomap = jax.random.normal(k4, (N, H, W, proto_ch), jnp.float32)

    fwd = jax.jit(decoder_block_forward, static_argnames=("proto_scale_factor",))
    out = fwd(x, weight, skip=skip, protomap=protomap, proto_scale_factor=2)
    out = jax.block_until_ready(out)

    assert out.shape == (N, 2 * H, 2 * W, out_ch + skip_ch + proto_ch), out.shape

    ref = jax.block_until_ready(_reference(x, weight, skip, protomap, 2))
    err = float(jnp.max(jnp.abs(out - ref)))
    # Kernel matmul runs at default (single-pass bf16) MXU precision while the
    # reference uses HIGHEST, so allow bf16-level tolerance.
    assert jnp.allclose(out, ref, atol=5e-2, rtol=5e-2), err

    print("KERNEL_OK")
</pallas_src>

<mosaic_0001>
module attributes {stable_mosaic.version = 11 : i64} {
  func.func @_decoder_kernel(%arg0: i32, %arg1: memref<1x16x16x8xf32, #tpu.memory_space<vmem>>, %arg2: memref<72x32xf32, #tpu.memory_space<vmem>>, %arg3: memref<1x16x2x16x4xf32, #tpu.memory_space<vmem>>, %arg4: memref<1x16x16x2xf32, #tpu.memory_space<vmem>>, %arg5: memref<1x16x2x16x24xf32, #tpu.memory_space<vmem>>, %arg6: memref<18x18x8xf32, #tpu.memory_space<vmem>>) attributes {dimension_semantics = [#tpu.dimension_semantics<parallel>], iteration_bounds = array<i64: 2>, scalar_prefetch = 0 : i64, scratch_operands = 1 : i64, tpu.core_type = #tpu.core_type<tc>, window_params = [{transform_indices = @transform_0, window_bounds = array<i64: 1, 16, 16, 8>}, {pipeline_mode = #tpu.pipeline_mode<synchronous>, transform_indices = @transform_1, window_bounds = array<i64: 72, 32>}, {transform_indices = @transform_2, window_bounds = array<i64: 1, 16, 2, 16, 4>}, {transform_indices = @transform_3, window_bounds = array<i64: 1, 16, 16, 2>}, {transform_indices = @transform_4, window_bounds = array<i64: 1, 16, 2, 16, 24>}]} {
    %cst = arith.constant 0.000000e+00 : f32
    %0 = vector.broadcast %cst : f32 to vector<1x18x8xf32>
    %cst_0 = arith.constant 0.000000e+00 : f32
    %1 = vector.broadcast %cst_0 : f32 to vector<18x1x8xf32>
    %c0 = arith.constant 0 : index
    %c0_1 = arith.constant 0 : index
    %c0_2 = arith.constant 0 : index
    %2 = vector.load %arg6[%c0, %c0_1, %c0_2] : memref<18x18x8xf32, #tpu.memory_space<vmem>>, vector<1x18x8xf32>
    tpu.vector_store %arg6[%c0, %c0_1, %c0_2], %0 {strides = array<i32>} : memref<18x18x8xf32, #tpu.memory_space<vmem>>, vector<1x18x8xf32>,
    %c17 = arith.constant 17 : index
    %c0_3 = arith.constant 0 : index
    %c0_4 = arith.constant 0 : index
    %3 = vector.load %arg6[%c17, %c0_3, %c0_4] : memref<18x18x8xf32, #tpu.memory_space<vmem>>, vector<1x18x8xf32>
    tpu.vector_store %arg6[%c17, %c0_3, %c0_4], %0 {strides = array<i32>} : memref<18x18x8xf32, #tpu.memory_space<vmem>>, vector<1x18x8xf32>,
    %c0_5 = arith.constant 0 : index
    %c0_6 = arith.constant 0 : index
    %c0_7 = arith.constant 0 : index
    %4 = vector.load %arg6[%c0_5, %c0_6, %c0_7] : memref<18x18x8xf32, #tpu.memory_space<vmem>>, vector<18x1x8xf32>
    tpu.vector_store %arg6[%c0_5, %c0_6, %c0_7], %1 {strides = array<i32>} : memref<18x18x8xf32, #tpu.memory_space<vmem>>, vector<18x1x8xf32>,
    %c0_8 = arith.constant 0 : index
    %c17_9 = arith.constant 17 : index
    %c0_10 = arith.constant 0 : index
    %5 = vector.load %arg6[%c0_8, %c17_9, %c0_10] : memref<18x18x8xf32, #tpu.memory_space<vmem>>, vector<18x1x8xf32>
    tpu.vector_store %arg6[%c0_8, %c17_9, %c0_10], %1 {strides = array<i32>} : memref<18x18x8xf32, #tpu.memory_space<vmem>>, vector<18x1x8xf32>,
    %c0_11 = arith.constant 0 : index
    %c0_12 = arith.constant 0 : index
    %c0_13 = arith.constant 0 : index
    %c0_14 = arith.constant 0 : index
    %6 = vector.load %arg1[%c0_11, %c0_12, %c0_13, %c0_14] : memref<1x16x16x8xf32, #tpu.memory_space<vmem>>, vector<1x16x16x8xf32>
    %7 = vector.shape_cast %6 : vector<1x16x16x8xf32> to vector<16x16x8xf32>
    %c1 = arith.constant 1 : index
    %c1_15 = arith.constant 1 : index
    %c0_16 = arith.constant 0 : index
    %8 = vector.load %arg6[%c1, %c1_15, %c0_16] : memref<18x18x8xf32, #tpu.memory_space<vmem>>, vector<16x16x8xf32>
    tpu.vector_store %arg6[%c1, %c1_15, %c0_16], %7 {strides = array<i32>} : memref<18x18x8xf32, #tpu.memory_space<vmem>>, vector<16x16x8xf32>,
    %c0_17 = arith.constant 0 : index
    %c0_18 = arith.constant 0 : index
    %c0_19 = arith.constant 0 : index
    %9 = vector.load %arg6[%c0_17, %c0_18, %c0_19] : memref<18x18x8xf32, #tpu.memory_space<vmem>>, vector<16x16x8xf32>
    %c0_20 = arith.constant 0 : index
    %c1_21 = arith.constant 1 : index
    %c0_22 = arith.constant 0 : index
    %10 = vector.load %arg6[%c0_20, %c1_21, %c0_22] : memref<18x18x8xf32, #tpu.memory_space<vmem>>, vector<16x16x8xf32>
    %c0_23 = arith.constant 0 : index
    %c2 = arith.constant 2 : index
    %c0_24 = arith.constant 0 : index
    %11 = vector.load %arg6[%c0_23, %c2, %c0_24] : memref<18x18x8xf32, #tpu.memory_space<vmem>>, vector<16x16x8xf32>
    %c1_25 = arith.constant 1 : index
    %c0_26 = arith.constant 0 : index
    %c0_27 = arith.constant 0 : index
    %12 = vector.load %arg6[%c1_25, %c0_26, %c0_27] : memref<18x18x8xf32, #tpu.memory_space<vmem>>, vector<16x16x8xf32>
    %c1_28 = arith.constant 1 : index
    %c1_29 = arith.constant 1 : index
    %c0_30 = arith.constant 0 : index
    %13 = vector.load %arg6[%c1_28, %c1_29, %c0_30] : memref<18x18x8xf32, #tpu.memory_space<vmem>>, vector<16x16x8xf32>
    %c1_31 = arith.constant 1 : index
    %c2_32 = arith.constant 2 : index
    %c0_33 = arith.constant 0 : index
    %14 = vector.load %arg6[%c1_31, %c2_32, %c0_33] : memref<18x18x8xf32, #tpu.memory_space<vmem>>, vector<16x16x8xf32>
    %c2_34 = arith.constant 2 : index
    %c0_35 = arith.constant 0 : index
    %c0_36 = arith.constant 0 : index
    %15 = vector.load %arg6[%c2_34, %c0_35, %c0_36] : memref<18x18x8xf32, #tpu.memory_space<vmem>>, vector<16x16x8xf32>
    %c2_37 = arith.constant 2 : index
    %c1_38 = arith.constant 1 : index
    %c0_39 = arith.constant 0 : index
    %16 = vector.load %arg6[%c2_37, %c1_38, %c0_39] : memref<18x18x8xf32, #tpu.memory_space<vmem>>, vector<16x16x8xf32>
    %c2_40 = arith.constant 2 : index
    %c2_41 = arith.constant 2 : index
    %c0_42 = arith.constant 0 : index
    %17 = vector.load %arg6[%c2_40, %c2_41, %c0_42] : memref<18x18x8xf32, #tpu.memory_space<vmem>>, vector<16x16x8xf32>
    %18 = tpu.concatenate %9, %10, %11, %12, %13, %14, %15, %16, %17 in 2 : vector<16x16x8xf32>, vector<16x16x8xf32>, vector<16x16x8xf32>, vector<16x16x8xf32>, vector<16x16x8xf32>, vector<16x16x8xf32>, vector<16x16x8xf32>, vector<16x16x8xf32>, vector<16x16x8xf32> -> vector<16x16x72xf32>
    %19 = vector.shape_cast %18 : vector<16x16x72xf32> to vector<256x72xf32>
    %c0_43 = arith.constant 0 : index
    %c0_44 = arith.constant 0 : index
    %20 = vector.load %arg2[%c0_43, %c0_44] : memref<72x32xf32, #tpu.memory_space<vmem>>, vector<72x32xf32>
    %cst_45 = arith.constant dense<0.000000e+00> : vector<256x32xf32>
    %21 = tpu.matmul %19, %20, %cst_45 {dimension_numbers = #tpu.dot_dimension_numbers<[1], [0], [0], [1], [0, 0, 1, 1], [], []>} : vector<256x72xf32>, vector<72x32xf32>, vector<256x32xf32> -> vector<256x32xf32>
    %cst_46 = arith.constant dense<0.000000e+00> : vector<32xf32>
    %22 = vector.multi_reduction <add>, %21, %cst_46 [0] : vector<256x32xf32> to vector<32xf32>
    %23 = vector.shape_cast %22 : vector<32xf32> to vector<1x32xf32>
    %24 = vector.extract_strided_slice %23 {offsets = [0, 0], sizes = [1, 8], strides = [1, 1]} : vector<1x32xf32> to vector<1x8xf32>
    %25 = vector.extract_strided_slice %23 {offsets = [0, 8], sizes = [1, 8], strides = [1, 1]} : vector<1x32xf32> to vector<1x8xf32>
    %26 = arith.addf %24, %25 : vector<1x8xf32>
    %27 = vector.extract_strided_slice %23 {offsets = [0, 16], sizes = [1, 8], strides = [1, 1]} : vector<1x32xf32> to vector<1x8xf32>
    %28 = arith.addf %26, %27 : vector<1x8xf32>
    %29 = vector.extract_strided_slice %23 {offsets = [0, 24], sizes = [1, 8], strides = [1, 1]} : vector<1x32xf32> to vector<1x8xf32>
    %30 = arith.addf %28, %29 : vector<1x8xf32>
    %cst_47 = arith.constant 1.024000e+03 : f32
    %31 = vector.broadcast %cst_47 : f32 to vector<1x8xf32>
    %32 = arith.divf %30, %31 : vector<1x8xf32>
    %33 = tpu.concatenate %32, %32, %32, %32 in 1 : vector<1x8xf32>, vector<1x8xf32>, vector<1x8xf32>, vector<1x8xf32> -> vector<1x32xf32>
    %34 = vector.broadcast %33 : vector<1x32xf32> to vector<256x32xf32>
    %35 = arith.subf %21, %34 : vector<256x32xf32>
    %36 = arith.mulf %35, %35 : vector<256x32xf32>
    %cst_48 = arith.constant dense<0.000000e+00> : vector<32xf32>
    %37 = vector.multi_reduction <add>, %36, %cst_48 [0] : vector<256x32xf32> to vector<32xf32>
    %38 = vector.shape_cast %37 : vector<32xf32> to vector<1x32xf32>
    %39 = vector.extract_strided_slice %38 {offsets = [0, 0], sizes = [1, 8], strides = [1, 1]} : vector<1x32xf32> to vector<1x8xf32>
    %40 = vector.extract_strided_slice %38 {offsets = [0, 8], sizes = [1, 8], strides = [1, 1]} : vector<1x32xf32> to vector<1x8xf32>
    %41 = arith.addf %39, %40 : vector<1x8xf32>
    %42 = vector.extract_strided_slice %38 {offsets = [0, 16], sizes = [1, 8], strides = [1, 1]} : vector<1x32xf32> to vector<1x8xf32>
    %43 = arith.addf %41, %42 : vector<1x8xf32>
    %44 = vector.extract_strided_slice %38 {offsets = [0, 24], sizes = [1, 8], strides = [1, 1]} : vector<1x32xf32> to vector<1x8xf32>
    %45 = arith.addf %43, %44 : vector<1x8xf32>
    %cst_49 = arith.constant 1.024000e+03 : f32
    %46 = vector.broadcast %cst_49 : f32 to vector<1x8xf32>
    %47 = arith.divf %45, %46 : vector<1x8xf32>
    %cst_50 = arith.constant 0.000000e+00 : f32
    %48 = vector.broadcast %cst_50 : f32 to vector<1x8xf32>
    %49 = arith.maximumf %47, %48 : vector<1x8xf32>
    %cst_51 = arith.constant 9.99999974E-6 : f32
    %50 = vector.broadcast %cst_51 : f32 to vector<1x8xf32>
    %51 = arith.addf %49, %50 : vector<1x8xf32>
    %52 = math.rsqrt %51 : vector<1x8xf32>
    %53 = tpu.concatenate %52, %52, %52, %52 in 1 : vector<1x8xf32>, vector<1x8xf32>, vector<1x8xf32>, vector<1x8xf32> -> vector<1x32xf32>
    %54 = vector.broadcast %53 : vector<1x32xf32> to vector<256x32xf32>
    %55 = arith.mulf %35, %54 : vector<256x32xf32>
    %cst_52 = arith.constant 0.000000e+00 : f32
    %56 = vector.broadcast %cst_52 : f32 to vector<256x32xf32>
    %57 = arith.maximumf %55, %56 : vector<256x32xf32>
    %58 = vector.extract_strided_slice %57 {offsets = [0, 0], sizes = [256, 8], strides = [1, 1]} : vector<256x32xf32> to vector<256x8xf32>
    %59 = vector.shape_cast %58 : vector<256x8xf32> to vector<16x16x8xf32>
    %c0_53 = arith.constant 0 : index
    %c0_54 = arith.constant 0 : index
    %c0_55 = arith.constant 0 : index
    %c0_56 = arith.constant 0 : index
    %c0_57 = arith.constant 0 : index
    %60 = vector.load %arg5[%c0_53, %c0_54, %c0_55, %c0_56, %c0_57] : memref<1x16x2x16x24xf32, #tpu.memory_space<vmem>>, vector<1x16x1x16x8xf32>
    %61 = vector.shape_cast %60 : vector<1x16x1x16x8xf32> to vector<16x16x8xf32>
    %62 = vector.shape_cast %59 : vector<16x16x8xf32> to vector<1x16x1x16x8xf32>
    tpu.vector_store %arg5[%c0_53, %c0_54, %c0_55, %c0_56, %c0_57], %62 {strides = array<i32>} : memref<1x16x2x16x24xf32, #tpu.memory_space<vmem>>, vector<1x16x1x16x8xf32>,
    %63 = vector.extract_strided_slice %57 {offsets = [0, 8], sizes = [256, 8], strides = [1, 1]} : vector<256x32xf32> to vector<256x8xf32>
    %64 = vector.shape_cast %63 : vector<256x8xf32> to vector<16x16x8xf32>
    %c0_58 = arith.constant 0 : index
    %c0_59 = arith.constant 0 : index
    %c0_60 = arith.constant 0 : index
    %c0_61 = arith.constant 0 : index
    %c12 = arith.constant 12 : index
    %65 = vector.load %arg5[%c0_58, %c0_59, %c0_60, %c0_61, %c12] : memref<1x16x2x16x24xf32, #tpu.memory_space<vmem>>, vector<1x16x1x16x8xf32>
    %66 = vector.shape_cast %65 : vector<1x16x1x16x8xf32> to vector<16x16x8xf32>
    %67 = vector.shape_cast %64 : vector<16x16x8xf32> to vector<1x16x1x16x8xf32>
    tpu.vector_store %arg5[%c0_58, %c0_59, %c0_60, %c0_61, %c12], %67 {strides = array<i32>} : memref<1x16x2x16x24xf32, #tpu.memory_space<vmem>>, vector<1x16x1x16x8xf32>,
    %68 = vector.extract_strided_slice %57 {offsets = [0, 16], sizes = [256, 8], strides = [1, 1]} : vector<256x32xf32> to vector<256x8xf32>
    %69 = vector.shape_cast %68 : vector<256x8xf32> to vector<16x16x8xf32>
    %c0_62 = arith.constant 0 : index
    %c0_63 = arith.constant 0 : index
    %c1_64 = arith.constant 1 : index
    %c0_65 = arith.constant 0 : index
    %c0_66 = arith.constant 0 : index
    %70 = vector.load %arg5[%c0_62, %c0_63, %c1_64, %c0_65, %c0_66] : memref<1x16x2x16x24xf32, #tpu.memory_space<vmem>>, vector<1x16x1x16x8xf32>
    %71 = vector.shape_cast %70 : vector<1x16x1x16x8xf32> to vector<16x16x8xf32>
    %72 = vector.shape_cast %69 : vector<16x16x8xf32> to vector<1x16x1x16x8xf32>
    tpu.vector_store %arg5[%c0_62, %c0_63, %c1_64, %c0_65, %c0_66], %72 {strides = array<i32>} : memref<1x16x2x16x24xf32, #tpu.memory_space<vmem>>, vector<1x16x1x16x8xf32>,
    %73 = vector.extract_strided_slice %57 {offsets = [0, 24], sizes = [256, 8], strides = [1, 1]} : vector<256x32xf32> to vector<256x8xf32>
    %74 = vector.shape_cast %73 : vector<256x8xf32> to vector<16x16x8xf32>
    %c0_67 = arith.constant 0 : index
    %c0_68 = arith.constant 0 : index
    %c1_69 = arith.constant 1 : index
    %c0_70 = arith.constant 0 : index
    %c12_71 = arith.constant 12 : index
    %75 = vector.load %arg5[%c0_67, %c0_68, %c1_69, %c0_70, %c12_71] : memref<1x16x2x16x24xf32, #tpu.memory_space<vmem>>, vector<1x16x1x16x8xf32>
    %76 = vector.shape_cast %75 : vector<1x16x1x16x8xf32> to vector<16x16x8xf32>
    %77 = vector.shape_cast %74 : vector<16x16x8xf32> to vector<1x16x1x16x8xf32>
    tpu.vector_store %arg5[%c0_67, %c0_68, %c1_69, %c0_70, %c12_71], %77 {strides = array<i32>} : memref<1x16x2x16x24xf32, #tpu.memory_space<vmem>>, vector<1x16x1x16x8xf32>,
    %c0_72 = arith.constant 0 : index
    %c0_73 = arith.constant 0 : index
    %c0_74 = arith.constant 0 : index
    %c0_75 = arith.constant 0 : index
    %c0_76 = arith.constant 0 : index
    %78 = vector.load %arg3[%c0_72, %c0_73, %c0_74, %c0_75, %c0_76] : memref<1x16x2x16x4xf32, #tpu.memory_space<vmem>>, vector<1x16x1x16x2xf32>
    %79 = vector.shape_cast %78 : vector<1x16x1x16x2xf32> to vector<16x16x2xf32>
    %c0_77 = arith.constant 0 : index
    %c0_78 = arith.constant 0 : index
    %c0_79 = arith.constant 0 : index
    %c0_80 = arith.constant 0 : index
    %c8 = arith.constant 8 : index
    %80 = vector.load %arg5[%c0_77, %c0_78, %c0_79, %c0_80, %c8] : memref<1x16x2x16x24xf32, #tpu.memory_space<vmem>>, vector<1x16x1x16x2xf32>
    %81 = vector.shape_cast %80 : vector<1x16x1x16x2xf32> to vector<16x16x2xf32>
    %82 = vector.shape_cast %79 : vector<16x16x2xf32> to vector<1x16x1x16x2xf32>
    tpu.vector_store %arg5[%c0_77, %c0_78, %c0_79, %c0_80, %c8], %82 {strides = array<i32>} : memref<1x16x2x16x24xf32, #tpu.memory_space<vmem>>, vector<1x16x1x16x2xf32>,
    %c0_81 = arith.constant 0 : index
    %c0_82 = arith.constant 0 : index
    %c0_83 = arith.constant 0 : index
    %c0_84 = arith.constant 0 : index
    %c2_85 = arith.constant 2 : index
    %83 = vector.load %arg3[%c0_81, %c0_82, %c0_83, %c0_84, %c2_85] : memref<1x16x2x16x4xf32, #tpu.memory_space<vmem>>, vector<1x16x1x16x2xf32>
    %84 = vector.shape_cast %83 : vector<1x16x1x16x2xf32> to vector<16x16x2xf32>
    %c0_86 = arith.constant 0 : index
    %c0_87 = arith.constant 0 : index
    %c0_88 = arith.constant 0 : index
    %c0_89 = arith.constant 0 : index
    %c20 = arith.constant 20 : index
    %85 = vector.load %arg5[%c0_86, %c0_87, %c0_88, %c0_89, %c20] : memref<1x16x2x16x24xf32, #tpu.memory_space<vmem>>, vector<1x16x1x16x2xf32>
    %86 = vector.shape_cast %85 : vector<1x16x1x16x2xf32> to vector<16x16x2xf32>
    %87 = vector.shape_cast %84 : vector<16x16x2xf32> to vector<1x16x1x16x2xf32>
    tpu.vector_store %arg5[%c0_86, %c0_87, %c0_88, %c0_89, %c20], %87 {strides = array<i32>} : memref<1x16x2x16x24xf32, #tpu.memory_space<vmem>>, vector<1x16x1x16x2xf32>,
    %c0_90 = arith.constant 0 : index
    %c0_91 = arith.constant 0 : index
    %c1_92 = arith.constant 1 : index
    %c0_93 = arith.constant 0 : index
    %c0_94 = arith.constant 0 : index
    %88 = vector.load %arg3[%c0_90, %c0_91, %c1_92, %c0_93, %c0_94] : memref<1x16x2x16x4xf32, #tpu.memory_space<vmem>>, vector<1x16x1x16x2xf32>
    %89 = vector.shape_cast %88 : vector<1x16x1x16x2xf32> to vector<16x16x2xf32>
    %c0_95 = arith.constant 0 : index
    %c0_96 = arith.constant 0 : index
    %c1_97 = arith.constant 1 : index
    %c0_98 = arith.constant 0 : index
    %c8_99 = arith.constant 8 : index
    %90 = vector.load %arg5[%c0_95, %c0_96, %c1_97, %c0_98, %c8_99] : memref<1x16x2x16x24xf32, #tpu.memory_space<vmem>>, vector<1x16x1x16x2xf32>
    %91 = vector.shape_cast %90 : vector<1x16x1x16x2xf32> to vector<16x16x2xf32>
    %92 = vector.shape_cast %89 : vector<16x16x2xf32> to vector<1x16x1x16x2xf32>
    tpu.vector_store %arg5[%c0_95, %c0_96, %c1_97, %c0_98, %c8_99], %92 {strides = array<i32>} : memref<1x16x2x16x24xf32, #tpu.memory_space<vmem>>, vector<1x16x1x16x2xf32>,
    %c0_100 = arith.constant 0 : index
    %c0_101 = arith.constant 0 : index
    %c1_102 = arith.constant 1 : index
    %c0_103 = arith.constant 0 : index
    %c2_104 = arith.constant 2 : index
    %93 = vector.load %arg3[%c0_100, %c0_101, %c1_102, %c0_103, %c2_104] : memref<1x16x2x16x4xf32, #tpu.memory_space<vmem>>, vector<1x16x1x16x2xf32>
    %94 = vector.shape_cast %93 : vector<1x16x1x16x2xf32> to vector<16x16x2xf32>
    %c0_105 = arith.constant 0 : index
    %c0_106 = arith.constant 0 : index
    %c1_107 = arith.constant 1 : index
    %c0_108 = arith.constant 0 : index
    %c20_109 = arith.constant 20 : index
    %95 = vector.load %arg5[%c0_105, %c0_106, %c1_107, %c0_108, %c20_109] : memref<1x16x2x16x24xf32, #tpu.memory_space<vmem>>, vector<1x16x1x16x2xf32>
    %96 = vector.shape_cast %95 : vector<1x16x1x16x2xf32> to vector<16x16x2xf32>
    %97 = vector.shape_cast %94 : vector<16x16x2xf32> to vector<1x16x1x16x2xf32>
    tpu.vector_store %arg5[%c0_105, %c0_106, %c1_107, %c0_108, %c20_109], %97 {strides = array<i32>} : memref<1x16x2x16x24xf32, #tpu.memory_space<vmem>>, vector<1x16x1x16x2xf32>,
    %c0_110 = arith.constant 0 : index
    %c0_111 = arith.constant 0 : index
    %c0_112 = arith.constant 0 : index
    %c0_113 = arith.constant 0 : index
    %98 = vector.load %arg4[%c0_110, %c0_111, %c0_112, %c0_113] : memref<1x16x16x2xf32, #tpu.memory_space<vmem>>, vector<1x16x16x2xf32>
    %99 = vector.shape_cast %98 : vector<1x16x16x2xf32> to vector<16x16x2xf32>
    %c0_114 = arith.constant 0 : index
    %c0_115 = arith.constant 0 : index
    %c0_116 = arith.constant 0 : index
    %c0_117 = arith.constant 0 : index
    %c10 = arith.constant 10 : index
    %100 = vector.load %arg5[%c0_114, %c0_115, %c0_116, %c0_117, %c10] : memref<1x16x2x16x24xf32, #tpu.memory_space<vmem>>, vector<1x16x1x16x2xf32>
    %101 = vector.shape_cast %100 : vector<1x16x1x16x2xf32> to vector<16x16x2xf32>
    %102 = vector.shape_cast %99 : vector<16x16x2xf32> to vector<1x16x1x16x2xf32>
    tpu.vector_store %arg5[%c0_114, %c0_115, %c0_116, %c0_117, %c10], %102 {strides = array<i32>} : memref<1x16x2x16x24xf32, #tpu.memory_space<vmem>>, vector<1x16x1x16x2xf32>,
    %c0_118 = arith.constant 0 : index
    %c0_119 = arith.constant 0 : index
    %c0_120 = arith.constant 0 : index
    %c0_121 = arith.constant 0 : index
    %c22 = arith.constant 22 : index
    %103 = vector.load %arg5[%c0_118, %c0_119, %c0_120, %c0_121, %c22] : memref<1x16x2x16x24xf32, #tpu.memory_space<vmem>>, vector<1x16x1x16x2xf32>
    %104 = vector.shape_cast %103 : vector<1x16x1x16x2xf32> to vector<16x16x2xf32>
    %105 = vector.shape_cast %99 : vector<16x16x2xf32> to vector<1x16x1x16x2xf32>
    tpu.vector_store %arg5[%c0_118, %c0_119, %c0_120, %c0_121, %c22], %105 {strides = array<i32>} : memref<1x16x2x16x24xf32, #tpu.memory_space<vmem>>, vector<1x16x1x16x2xf32>,
    %c0_122 = arith.constant 0 : index
    %c0_123 = arith.constant 0 : index
    %c1_124 = arith.constant 1 : index
    %c0_125 = arith.constant 0 : index
    %c10_126 = arith.constant 10 : index
    %106 = vector.load %arg5[%c0_122, %c0_123, %c1_124, %c0_125, %c10_126] : memref<1x16x2x16x24xf32, #tpu.memory_space<vmem>>, vector<1x16x1x16x2xf32>
    %107 = vector.shape_cast %106 : vector<1x16x1x16x2xf32> to vector<16x16x2xf32>
    %108 = vector.shape_cast %99 : vector<16x16x2xf32> to vector<1x16x1x16x2xf32>
    tpu.vector_store %arg5[%c0_122, %c0_123, %c1_124, %c0_125, %c10_126], %108 {strides = array<i32>} : memref<1x16x2x16x24xf32, #tpu.memory_space<vmem>>, vector<1x16x1x16x2xf32>,
    %c0_127 = arith.constant 0 : index
    %c0_128 = arith.constant 0 : index
    %c1_129 = arith.constant 1 : index
    %c0_130 = arith.constant 0 : index
    %c22_131 = arith.constant 22 : index
    %109 = vector.load %arg5[%c0_127, %c0_128, %c1_129, %c0_130, %c22_131] : memref<1x16x2x16x24xf32, #tpu.memory_space<vmem>>, vector<1x16x1x16x2xf32>
    %110 = vector.shape_cast %109 : vector<1x16x1x16x2xf32> to vector<16x16x2xf32>
    %111 = vector.shape_cast %99 : vector<16x16x2xf32> to vector<1x16x1x16x2xf32>
    tpu.vector_store %arg5[%c0_127, %c0_128, %c1_129, %c0_130, %c22_131], %111 {strides = array<i32>} : memref<1x16x2x16x24xf32, #tpu.memory_space<vmem>>, vector<1x16x1x16x2xf32>,
    return
  }
  func.func @transform_0(%arg0: i32) -> (i32, i32, i32, i32) {
    %c0_i32 = arith.constant 0 : i32
    %c0_i32_0 = arith.constant 0 : i32
    %c0_i32_1 = arith.constant 0 : i32
    %c0_i32_2 = arith.constant 0 : i32
    return %arg0, %c0_i32, %c0_i32_0, %c0_i32_1 : i32, i32, i32, i32
  }
  func.func @transform_1(%arg0: i32) -> (i32, i32) {
    %c0_i32 = arith.constant 0 : i32
    %c0_i32_0 = arith.constant 0 : i32
    %c0_i32_1 = arith.constant 0 : i32
    return %c0_i32, %c0_i32_0 : i32, i32
  }
  func.func @transform_2(%arg0: i32) -> (i32, i32, i32, i32, i32) {
    %c0_i32 = arith.constant 0 : i32
    %c0_i32_0 = arith.constant 0 : i32
    %c0_i32_1 = arith.constant 0 : i32
    %c0_i32_2 = arith.constant 0 : i32
    %c0_i32_3 = arith.constant 0 : i32
    return %arg0, %c0_i32, %c0_i32_0, %c0_i32_1, %c0_i32_2 : i32, i32, i32, i32, i32
  }
  func.func @transform_3(%arg0: i32) -> (i32, i32, i32, i32) {
    %c0_i32 = arith.constant 0 : i32
    %c0_i32_0 = arith.constant 0 : i32
    %c0_i32_1 = arith.constant 0 : i32
    %c0_i32_2 = arith.constant 0 : i32
    return %arg0, %c0_i32, %c0_i32_0, %c0_i32_1 : i32, i32, i32, i32
  }
  func.func @transform_4(%arg0: i32) -> (i32, i32, i32, i32, i32) {
    %c0_i32 = arith.constant 0 : i32
    %c0_i32_0 = arith.constant 0 : i32
    %c0_i32_1 = arith.constant 0 : i32
    %c0_i32_2 = arith.constant 0 : i32
    %c0_i32_3 = arith.constant 0 : i32
    return %arg0, %c0_i32, %c0_i32_0, %c0_i32_1, %c0_i32_2 : i32, i32, i32, i32, i32
  }
}

</mosaic_0001>

<bundles_post_ra>
// kernel: decoder_block_forward.1
= control target key start
LH: loop header
LB: loop body
LE: loop exit
PB: predicated region body
PF: predicated region fallthrough
CT: control target
= control target key end

     0   :  { %s4833_s15 = smov 0   ;;  %s8844_s0 = inlined_call_operand.vmem [shape: f32[2,16,16,8], index: 0, kind: input, shape index: {}]   ;;  %s8845_s1 = inlined_call_operand.vmem [shape: f32[72,32], index: 1, kind: input, shape index: {}]   ;;  %s8846_s2 = inlined_call_operand.vmem [shape: f32[2,16,2,16,4], index: 2, kind: input, shape index: {}]   ;;  %s8847_s3 = inlined_call_operand.vmem [shape: f32[2,16,16,2], index: 3, kind: input, shape index: {}]   ;;  %s8848_s4 = inlined_call_operand.vmem [shape: f32[2,16,2,16,24], index: 4, kind: output, shape index: {}]  }
   0x1 LB: > { %s4274_s16 = sadd.s32 4294967295, %s4789_s15   ;;  %p4278_p0 = scmp.ge.s32.totalorder %s4789_s15, 1  ;;  %s4789_s15 = sphi %s4833_s15, %s14_s15  }
   0x2   : > { %p182_p1 = scmp.lt.s32.totalorder %s4789_s15, 3 }
   0x4   : > { %p183_p2 = pnand %p4278_p0, %p182_p1 }
   0x6   : > { %186 = sbr.rel (%p183_p2) target bundleno = 1913 (0x779), region = 36 }
   0xd   : > { %vm238_vm0 = vcmask 64512   ;;  %vm241_vm1 = vcmask 58368   ;;  %p4843_p3 = scmp.lt.s32.totalorder %s4274_s16, 1  ;;  %vm247_vm2 = vcmask 57344   ;;  %v4791_v0 = vmov 0.0   ;;  %s4792_s22 = smov 8  }
   0xe   : > { %239 = vst.msk [vmem:[#allocation2] sm:$0xff] %vm238_vm0, %v4791_v0  ;;  %240 = vst.msk [vmem:[#allocation2 + $0x8] sm:$0xff] %vm238_vm0, %v4791_v0  ;;  %s4793_s23 = smov 16   ;;  %s4794_s24 = smov 24   ;;  %vm1694_vm3 = vcmask 130048   ;;  %vm1727_vm4 = vcmask 195584  }
   0xf   : > { %244 = vst.msk [vmem:[#allocation2 + $0x198] sm:$0xff] %vm238_vm0, %v4791_v0  ;;  %245 = vst.msk [vmem:[#allocation2 + $0x1a0] sm:$0xff] %vm238_vm0, %v4791_v0  ;;  %s9444_s16 = smov (!%p4843_p3, %s4274_s16), 1  ;;  %s4795_s25 = smov 32   ;;  %vm1760_vm5 = vcmask 261120   ;;  %vm1793_vm6 = vcmask 326656  }
  0x10   : > { %242 = vst.msk [vmem:[#allocation2 + $0x10] sm:$0x3] %vm241_vm1, %v4791_v0  ;;  %246 = vst.msk [vmem:[#allocation2 + $0x1a8] sm:$0x3] %vm241_vm1, %v4791_v0  ;;  %s4577_s18 = sshll.u32 %s9444_s16, 8  ;;  %s4796_s26 = smov 40  }
  0x11   : > { %249 = vst.msk [vmem:[#allocation2 + $0x18] sm:$0x1] %vm247_vm2, %v4791_v0  ;;  %250 = vst.msk [vmem:[#allocation2 + $0x30] sm:$0x1] %vm247_vm2, %v4791_v0  ;;  %s4899_s21 = scalar_lea.vmem %s8844_s0, %s4577_s18  ;;  %s4797_s5 = smov 48   ;;  %vm1826_vm7 = vcmask 392192  }
  0x12   : > { %251 = vst.msk [vmem:[#allocation2 + $0x48] sm:$0x1] %vm247_vm2, %v4791_v0  ;;  %252 = vst.msk [vmem:[#allocation2 + $0x60] sm:$0x1] %vm247_vm2, %v4791_v0  ;;  %v284_v1 = vld [vmem:[%s4899_s21] sm:$0xff]  ;;  %v286_v2 = vld [vmem:[%s4899_s21 + $0x10] sm:$0xff]  ;;  %s7271_s12 = scalar_lea.vmem %s8847_s3, %s4577_s18 }
  0x13   : > { %253 = vst.msk [vmem:[#allocation2 + $0x78] sm:$0x1] %vm247_vm2, %v4791_v0  ;;  %254 = vst.msk [vmem:[#allocation2 + $0x90] sm:$0x1] %vm247_vm2, %v4791_v0  ;;  %v285_v3 = vld [vmem:[%s4899_s21 + $0x8] sm:$0xff]  ;;  %v288_v4 = vld [vmem:[%s4899_s21 + $0x20] sm:$0xff] }
  0x14   : > { %255 = vst.msk [vmem:[#allocation2 + $0xa8] sm:$0x1] %vm247_vm2, %v4791_v0  ;;  %256 = vst.msk [vmem:[#allocation2 + $0xc0] sm:$0x1] %vm247_vm2, %v4791_v0  ;;  %v287_v5 = vld [vmem:[%s4899_s21 + $0x18] sm:$0xff]  ;;  %v290_v6 = vld [vmem:[%s4899_s21 + $0x30] sm:$0xff] }
  0x15   : > { %257 = vst.msk [vmem:[#allocation2 + $0xd8] sm:$0x1] %vm247_vm2, %v4791_v0  ;;  %258 = vst.msk [vmem:[#allocation2 + $0xf0] sm:$0x1] %vm247_vm2, %v4791_v0  ;;  %v381_v7 = vld [vmem:[#allocation2 + $0x1] sm:$0xff]  ;;  %v291_v11 = vld [vmem:[%s4899_s21 + $0x38] sm:$0xff] }
  0x16   : > { %259 = vst.msk [vmem:[#allocation2 + $0x108] sm:$0x1] %vm247_vm2, %v4791_v0  ;;  %260 = vst.msk [vmem:[#allocation2 + $0x120] sm:$0x1] %vm247_vm2, %v4791_v0  ;;  %v289_v9 = vld [vmem:[%s4899_s21 + $0x28] sm:$0xff]  ;;  %670 = vrot.lane.b32.xlu0 %v381_v7, %s4792_s22  ;;  %v292_v10 = vld [vmem:[%s4899_s21 + $0x40] sm:$0xff] }
  0x17   : > { %261 = vst.msk [vmem:[#allocation2 + $0x138] sm:$0x1] %vm247_vm2, %v4791_v0  ;;  %262 = vst.msk [vmem:[#allocation2 + $0x150] sm:$0x1] %vm247_vm2, %v4791_v0  ;;  %v382_v8 = vld [vmem:[#allocation2 + $0x9] sm:$0xff]  ;;  %v296_v14 = vld [vmem:[%s4899_s21 + $0x60] sm:$0xff] }
  0x18   : > { %263 = vst.msk [vmem:[#allocation2 + $0x168] sm:$0x1] %vm247_vm2, %v4791_v0  ;;  %264 = vst.msk [vmem:[#allocation2 + $0x180] sm:$0x1] %vm247_vm2, %v4791_v0  ;;  %v294_v12 = vld [vmem:[%s4899_s21 + $0x50] sm:$0xff]  ;;  %v293_v13 = vld [vmem:[%s4899_s21 + $0x48] sm:$0xff] }
  0x19   : > { %267 = vst.msk [vmem:[#allocation2 + $0x29] sm:$0x1] %vm247_vm2, %v4791_v0  ;;  %268 = vst.msk [vmem:[#allocation2 + $0x41] sm:$0x1] %vm247_vm2, %v4791_v0  ;;  %v295_v15 = vld [vmem:[%s4899_s21 + $0x58] sm:$0xff]  ;;  %v298_v16 = vld [vmem:[%s4899_s21 + $0x70] sm:$0xff] }
  0x1a   : > { %269 = vst.msk [vmem:[#allocation2 + $0x59] sm:$0x1] %vm247_vm2, %v4791_v0  ;;  %270 = vst.msk [vmem:[#allocation2 + $0x71] sm:$0x1] %vm247_vm2, %v4791_v0  ;;  %v297_v17 = vld [vmem:[%s4899_s21 + $0x68] sm:$0xff]  ;;  %v300_v18 = vld [vmem:[%s4899_s21 + $0x80] sm:$0xff]  ;;  %672 = vrot.lane.b32.xlu0 %v382_v8, %s4792_s22 }
  0x1b   : > { %271 = vst.msk [vmem:[#allocation2 + $0x89] sm:$0x1] %vm247_vm2, %v4791_v0  ;;  %272 = vst.msk [vmem:[#allocation2 + $0xa1] sm:$0x1] %vm247_vm2, %v4791_v0  ;;  %v299_v19 = vld [vmem:[%s4899_s21 + $0x78] sm:$0xff]  ;;  %v302_v20 = vld [vmem:[%s4899_s21 + $0x90] sm:$0xff] }
  0x1c   : > { %273 = vst.msk [vmem:[#allocation2 + $0xb9] sm:$0x1] %vm247_vm2, %v4791_v0  ;;  %274 = vst.msk [vmem:[#allocation2 + $0xd1] sm:$0x1] %vm247_vm2, %v4791_v0  ;;  %v301_v21 = vld [vmem:[%s4899_s21 + $0x88] sm:$0xff]  ;;  %v304_v22 = vld [vmem:[%s4899_s21 + $0xa0] sm:$0xff] }
  0x1d   : > { %275 = vst.msk [vmem:[#allocation2 + $0xe9] sm:$0x1] %vm247_vm2, %v4791_v0  ;;  %276 = vst.msk [vmem:[#allocation2 + $0x101] sm:$0x1] %vm247_vm2, %v4791_v0  ;;  %v303_v23 = vld [vmem:[%s4899_s21 + $0x98] sm:$0xff]  ;;  %v306_v24 = vld [vmem:[%s4899_s21 + $0xb0] sm:$0xff] }
  0x1e   : > { %277 = vst.msk [vmem:[#allocation2 + $0x119] sm:$0x1] %vm247_vm2, %v4791_v0  ;;  %278 = vst.msk [vmem:[#allocation2 + $0x131] sm:$0x1] %vm247_vm2, %v4791_v0  ;;  %v305_v28 = vld [vmem:[%s4899_s21 + $0xa8] sm:$0xff]  ;;  %v308_v29 = vld [vmem:[%s4899_s21 + $0xc0] sm:$0xff] }
  0x1f   : > { %279 = vst.msk [vmem:[#allocation2 + $0x149] sm:$0x1] %vm247_vm2, %v4791_v0  ;;  %280 = vst.msk [vmem:[#allocation2 + $0x161] sm:$0x1] %vm247_vm2, %v4791_v0  ;;  %v307_v33 = vld [vmem:[%s4899_s21 + $0xb8] sm:$0xff]  ;;  %v310_v34 = vld [vmem:[%s4899_s21 + $0xd0] sm:$0xff] }
  0x20   : > { %281 = vst.msk [vmem:[#allocation2 + $0x179] sm:$0x1] %vm247_vm2, %v4791_v0  ;;  %282 = vst.msk [vmem:[#allocation2 + $0x191] sm:$0x1] %vm247_vm2, %v4791_v0  ;;  %v309_v35 = vld [vmem:[%s4899_s21 + $0xc8] sm:$0xff]  ;;  %v312_v36 = vld [vmem:[%s4899_s21 + $0xe0] sm:$0xff] }
  0x21   : > { %266 = vst.msk [vmem:[#allocation2 + $0x11] sm:$0x1] %vm247_vm2, %v4791_v0  ;;  %248 = vst.msk [vmem:[#allocation2] sm:$0x1] %vm247_vm2, %v4791_v0  ;;  %v311_v37 = vld [vmem:[%s4899_s21 + $0xd8] sm:$0xff]  ;;  %v313_v39 = vld [vmem:[%s4899_s21 + $0xe8] sm:$0xff] }
  0x22   : > { %265 = vst.msk [vmem:[#allocation2 + $0x198] sm:$0x1] %vm247_vm2, %v4791_v0  ;;  %283 = vst.msk [vmem:[#allocation2 + $0x1a9] sm:$0x1] %vm247_vm2, %v4791_v0  ;;  %v314_v58 = vld [vmem:[%s4899_s21 + $0xf0] sm:$0xff]  ;;  %v315_v62 = vld [vmem:[%s4899_s21 + $0xf8] sm:$0xff] }
  0x23   : > { %317 = vst.msk [vmem:[#allocation2 + $0x19] sm:$0xff] %vm238_vm0, %v284_v1  ;;  %319 = vst.msk [vmem:[#allocation2 + $0x31] sm:$0xff] %vm238_vm0, %v286_v2  ;;  %v413_v0 = vld [vmem:[#allocation2 + $0x2] sm:$0xff]  ;;  %s4799_s27 = smov 64   ;;  %vm1859_vm8 = vcmask 457728   ;;  %vm1892_vm9 = vcmask 523264  }
  0x24   : > { %318 = vst.msk [vmem:[#allocation2 + $0x21] sm:$0xff] %vm238_vm0, %v285_v3  ;;  %321 = vst.msk [vmem:[#allocation2 + $0x49] sm:$0xff] %vm238_vm0, %v288_v4  ;;  %vm1934_vm10 = vcmask 588800   ;;  %s4578_s28 = sshll.u32 %s9444_s16, 9  ;;  %s4800_s6 = smov 112   ;;  %vm2748_vm11 = vcmask 162912  }
  0x25   : > { %320 = vst.msk [vmem:[#allocation2 + $0x39] sm:$0xff] %vm238_vm0, %v287_v5  ;;  %323 = vst.msk [vmem:[#allocation2 + $0x61] sm:$0xff] %vm238_vm0, %v290_v6  ;;  %s4801_s7 = smov 120   ;;  %s4802_s8 = smov 104   ;;  %vm3198_vm12 = vcmask 80960   ;;  %vm3391_vm13 = vcmask 179360  }
  0x26   : > { %322 = vst.msk [vmem:[#allocation2 + $0x51] sm:$0xff] %vm238_vm0, %v289_v9  ;;  %325 = vst.msk [vmem:[#allocation2 + $0x79] sm:$0xff] %vm238_vm0, %v292_v10  ;;  %s4803_s9 = smov 18   ;;  %s4804_s18 = smov 10   ;;  %vm3969_vm14 = vcmask 97360   ;;  %vm4098_vm15 = vcmask 195760  }
  0x27   : > { %324 = vst.msk [vmem:[#allocation2 + $0x69] sm:$0xff] %vm238_vm0, %v291_v11  ;;  %327 = vst.msk [vmem:[#allocation2 + $0x91] sm:$0xff] %vm238_vm0, %v294_v12  ;;  %s4805_s16 = smov 4   ;;  %s4806_s13 = smov 116  }
  0x28   : > { %326 = vst.msk [vmem:[#allocation2 + $0x81] sm:$0xff] %vm238_vm0, %v293_v13  ;;  %329 = vst.msk [vmem:[#allocation2 + $0xa9] sm:$0xff] %vm238_vm0, %v296_v14  ;;  %v414_v3 = vld [vmem:[#allocation2 + $0xa] sm:$0xff]  ;;  %s4807_s14 = smov 22  }
  0x29   : > { %328 = vst.msk [vmem:[#allocation2 + $0x99] sm:$0xff] %vm238_vm0, %v295_v15  ;;  %331 = vst.msk [vmem:[#allocation2 + $0xc1] sm:$0xff] %vm238_vm0, %v298_v16 }
  0x2a   : > { %330 = vst.msk [vmem:[#allocation2 + $0xb1] sm:$0xff] %vm238_vm0, %v297_v17  ;;  %333 = vst.msk [vmem:[#allocation2 + $0xd9] sm:$0xff] %vm238_vm0, %v300_v18  ;;  %v4944_v25 = vld [vmem:[#allocation2 + $0x19] sm:$0xff]  ;;  %v4946_v26 = vld [vmem:[#allocation2 + $0x31] sm:$0xff] }
  0x2b   : > { %332 = vst.msk [vmem:[#allocation2 + $0xc9] sm:$0xff] %vm238_vm0, %v299_v19  ;;  %335 = vst.msk [vmem:[#allocation2 + $0xf1] sm:$0xff] %vm238_vm0, %v302_v20  ;;  %674 = vrot.lane.b32.xlu1 %v4944_v25, %s4792_s22  ;;  %v4953_v27 = vld [vmem:[#allocation2 + $0x21] sm:$0xff]  ;;  %678 = vrot.lane.b32.xlu0 %v4946_v26, %s4792_s22  ;;  %v4961_v30 = vld [vmem:[#allocation2 + $0x49] sm:$0xff] }
  0x2c   : > { %334 = vst.msk [vmem:[#allocation2 + $0xe1] sm:$0xff] %vm238_vm0, %v301_v21  ;;  %337 = vst.msk [vmem:[#allocation2 + $0x109] sm:$0xff] %vm238_vm0, %v304_v22  ;;  %v4965_v31 = vld [vmem:[#allocation2 + $0x39] sm:$0xff]  ;;  %v4969_v32 = vld [vmem:[#allocation2 + $0x61] sm:$0xff] }
  0x2d   : > { %336 = vst.msk [vmem:[#allocation2 + $0xf9] sm:$0xff] %vm238_vm0, %v303_v23  ;;  %339 = vst.msk [vmem:[#allocation2 + $0x121] sm:$0xff] %vm238_vm0, %v306_v24  ;;  %v4981_v38 = vld [vmem:[#allocation2 + $0x51] sm:$0xff]  ;;  %v4989_v40 = vld [vmem:[#allocation2 + $0x79] sm:$0xff] }
  0x2e   : > { %338 = vst.msk [vmem:[#allocation2 + $0x111] sm:$0xff] %vm238_vm0, %v305_v28  ;;  %341 = vst.msk [vmem:[#allocation2 + $0x139] sm:$0xff] %vm238_vm0, %v308_v29  ;;  %v4993_v41 = vld [vmem:[#allocation2 + $0x69] sm:$0xff]  ;;  %v4997_v42 = vld [vmem:[#allocation2 + $0x91] sm:$0xff] }
  0x2f   : > { %676 = vrot.lane.b32.xlu1 %v4953_v27, %s4792_s22  ;;  %682 = vrot.lane.b32.xlu0 %v4961_v30, %s4792_s22  ;;  %340 = vst.msk [vmem:[#allocation2 + $0x129] sm:$0xff] %vm238_vm0, %v307_v33  ;;  %343 = vst.msk [vmem:[#allocation2 + $0x151] sm:$0xff] %vm238_vm0, %v310_v34  ;;  %v5001_v43 = vld [vmem:[#allocation2 + $0x81] sm:$0xff]  ;;  %v5005_v44 = vld [vmem:[#allocation2 + $0xa9] sm:$0xff] }
  0x30   : > { %342 = vst.msk [vmem:[#allocation2 + $0x141] sm:$0xff] %vm238_vm0, %v309_v35  ;;  %345 = vst.msk [vmem:[#allocation2 + $0x169] sm:$0xff] %vm238_vm0, %v312_v36  ;;  %v5009_v45 = vld [vmem:[#allocation2 + $0x99] sm:$0xff]  ;;  %v5013_v46 = vld [vmem:[#allocation2 + $0xc1] sm:$0xff] }
  0x31   : > { %344 = vst.msk [vmem:[#allocation2 + $0x159] sm:$0xff] %vm238_vm0, %v311_v37  ;;  %346 = vst.msk [vmem:[#allocation2 + $0x171] sm:$0xff] %vm238_vm0, %v313_v39  ;;  %v5017_v47 = vld [vmem:[#allocation2 + $0xb1] sm:$0xff]  ;;  %v5021_v48 = vld [vmem:[#allocation2 + $0xd9] sm:$0xff] }
  0x32   : > { %v5025_v49 = vld [vmem:[#allocation2 + $0xc9] sm:$0xff]  ;;  %v5029_v50 = vld [vmem:[#allocation2 + $0xf1] sm:$0xff]  ;;  %347 = vst.msk [vmem:[#allocation2 + $0x181] sm:$0xff] %vm238_vm0, %v314_v58  ;;  %348 = vst.msk [vmem:[#allocation2 + $0x189] sm:$0xff] %vm238_vm0, %v315_v62 }
  0x33   : > { %680 = vrot.lane.b32.xlu1 %v4965_v31, %s4792_s22  ;;  %686 = vrot.lane.b32.xlu0 %v4969_v32, %s4792_s22  ;;  %v5033_v51 = vld [vmem:[#allocation2 + $0xe1] sm:$0xff]  ;;  %v5037_v52 = vld [vmem:[#allocation2 + $0x109] sm:$0xff]  ;;  %v5092_v4 = vld [vmem:[#allocation2 + $0x32] sm:$0xff] }
  0x34   : > { %v5041_v53 = vld [vmem:[#allocation2 + $0xf9] sm:$0xff]  ;;  %v5045_v54 = vld [vmem:[#allocation2 + $0x121] sm:$0xff]  ;;  %v5099_v6 = vld [vmem:[#allocation2 + $0x4a] sm:$0xff] }
  0x35   : > { %v5049_v55 = vld [vmem:[#allocation2 + $0x111] sm:$0xff]  ;;  %v5053_v56 = vld [vmem:[#allocation2 + $0x139] sm:$0xff]  ;;  %v5095_v5 = vld [vmem:[#allocation2 + $0x22] sm:$0xff] }
  0x36   : > { %v5057_v57 = vld [vmem:[#allocation2 + $0x129] sm:$0xff]  ;;  %v5063_v59 = vld [vmem:[#allocation2 + $0x151] sm:$0xff]  ;;  %v5086_v2 = vld [vmem:[#allocation2 + $0x1a] sm:$0xff] }
  0x37   : > { %684 = vrot.lane.b32.xlu1 %v4981_v38, %s4792_s22  ;;  %690 = vrot.lane.b32.xlu0 %v4989_v40, %s4792_s22  ;;  %v5067_v60 = vld [vmem:[#allocation2 + $0x141] sm:$0xff]  ;;  %v5071_v61 = vld [vmem:[#allocation2 + $0x169] sm:$0xff]  ;;  %v5111_v9 = vld [vmem:[#allocation2 + $0x52] sm:$0xff] }
  0x38   : > { %v5077_v63 = vld [vmem:[#allocation2 + $0x159] sm:$0xff]  ;;  %v5083_v1 = vld [vmem:[#allocation2 + $0x171] sm:$0xff]  ;;  %v5107_v8 = vld [vmem:[#allocation2 + $0x62] sm:$0xff] }
  0x39   : > { %v5103_v7 = vld [vmem:[#allocation2 + $0x3a] sm:$0xff]  ;;  %v5119_v11 = vld [vmem:[#allocation2 + $0x6a] sm:$0xff]  ;;  %v5123_v12 = vld [vmem:[#allocation2 + $0x92] sm:$0xff] }
  0x3a   : > { %v5115_v10 = vld [vmem:[#allocation2 + $0x7a] sm:$0xff]  ;;  %v5127_v13 = vld [vmem:[#allocation2 + $0x82] sm:$0xff]  ;;  %v5131_v14 = vld [vmem:[#allocation2 + $0xaa] sm:$0xff] }
  0x3b   : > { %688 = vrot.lane.b32.xlu1 %v4993_v41, %s4792_s22  ;;  %694 = vrot.lane.b32.xlu0 %v4997_v42, %s4792_s22  ;;  %v5135_v15 = vld [vmem:[#allocation2 + $0x9a] sm:$0xff]  ;;  %v5139_v16 = vld [vmem:[#allocation2 + $0xc2] sm:$0xff]  ;;  %v5143_v17 = vld [vmem:[#allocation2 + $0xb2] sm:$0xff] }
  0x3c   : > { %v5147_v18 = vld [vmem:[#allocation2 + $0xda] sm:$0xff]  ;;  %v5151_v19 = vld [vmem:[#allocation2 + $0xca] sm:$0xff]  ;;  %v5155_v20 = vld [vmem:[#allocation2 + $0xf2] sm:$0xff] }
  0x3d   : > { %v5159_v21 = vld [vmem:[#allocation2 + $0xe2] sm:$0xff]  ;;  %v5163_v22 = vld [vmem:[#allocation2 + $0x10a] sm:$0xff]  ;;  %v5167_v23 = vld [vmem:[#allocation2 + $0xfa] sm:$0xff] }
  0x3e   : > { %v5171_v24 = vld [vmem:[#allocation2 + $0x122] sm:$0xff]  ;;  %v5175_v28 = vld [vmem:[#allocation2 + $0x112] sm:$0xff]  ;;  %v5179_v29 = vld [vmem:[#allocation2 + $0x13a] sm:$0xff] }
  0x3f   : > { %692 = vrot.lane.b32.xlu1 %v5001_v43, %s4792_s22  ;;  %698 = vrot.lane.b32.xlu0 %v5005_v44, %s4792_s22  ;;  %v5185_v34 = vld [vmem:[#allocation2 + $0x12a] sm:$0xff]  ;;  %v5189_v35 = vld [vmem:[#allocation2 + $0x152] sm:$0xff]  ;;  %v5195_v37 = vld [vmem:[#allocation2 + $0x142] sm:$0xff] }
  0x40   : > { %8887 = vst [vmem:[#allocation4_spill] sm:$0xff] %v5185_v34  ;;  %8888 = vst [vmem:[#allocation5_spill] sm:$0xff] %v5189_v35  ;;  %v5201_v58 = vld [vmem:[#allocation2 + $0x16a] sm:$0xff] }
  0x41   : > { %8890 = vst [vmem:[#allocation7_spill] sm:$0xff] %v5195_v37  ;;  %8892 = vst [vmem:[#allocation9_spill] sm:$0xff] %v5201_v58 }
  0x43   : > { %696 = vrot.lane.b32.xlu1 %v5009_v45, %s4792_s22  ;;  %702 = vrot.lane.b32.xlu0 %v5013_v46, %s4792_s22 }
  0x47   : > { %700 = vrot.lane.b32.xlu1 %v5017_v47, %s4792_s22  ;;  %706 = vrot.lane.b32.xlu0 %v5021_v48, %s4792_s22 }
  0x4b   : > { %704 = vrot.lane.b32.xlu1 %v5025_v49, %s4792_s22  ;;  %710 = vrot.lane.b32.xlu0 %v5029_v50, %s4792_s22 }
  0x4f   : > { %708 = vrot.lane.b32.xlu1 %v5033_v51, %s4792_s22  ;;  %714 = vrot.lane.b32.xlu0 %v5037_v52, %s4792_s22 }
  0x53   : > { %712 = vrot.lane.b32.xlu1 %v5041_v53, %s4792_s22  ;;  %718 = vrot.lane.b32.xlu0 %v5045_v54, %s4792_s22 }
  0x57   : > { %716 = vrot.lane.b32.xlu1 %v5049_v55, %s4792_s22  ;;  %722 = vrot.lane.b32.xlu0 %v5053_v56, %s4792_s22 }
  0x5b   : > { %720 = vrot.lane.b32.xlu1 %v5057_v57, %s4792_s22  ;;  %726 = vrot.lane.b32.xlu0 %v5063_v59, %s4792_s22 }
  0x5f   : > { %724 = vrot.lane.b32.xlu1 %v5067_v60, %s4792_s22  ;;  %730 = vrot.lane.b32.xlu0 %v5071_v61, %s4792_s22 }
  0x63   : > { %728 = vrot.lane.b32.xlu1 %v5077_v63, %s4792_s22  ;;  %798 = vrot.lane.b32.xlu0 %v413_v0, %s4793_s23  ;;  %v5207_v0 = vld [vmem:[#allocation2 + $0x15a] sm:$0xff] }
  0x64   : > { %8894 = vst [vmem:[#allocation11_spill] sm:$0xff] %v5207_v0 }
  0x67   : > { %732 = vrot.lane.b32.xlu1 %v5083_v1, %s4792_s22  ;;  %802 = vrot.lane.b32.xlu0 %v5086_v2, %s4793_s23 }
  0x6b   : > { %800 = vrot.lane.b32.xlu1 %v414_v3, %s4793_s23  ;;  %806 = vrot.lane.b32.xlu0 %v5092_v4, %s4793_s23 }
  0x6f   : > { %804 = vrot.lane.b32.xlu1 %v5095_v5, %s4793_s23  ;;  %810 = vrot.lane.b32.xlu0 %v5099_v6, %s4793_s23 }
  0x73   : > { %808 = vrot.lane.b32.xlu1 %v5103_v7, %s4793_s23  ;;  %814 = vrot.lane.b32.xlu0 %v5107_v8, %s4793_s23 }
  0x77   : > { %812 = vrot.lane.b32.xlu1 %v5111_v9, %s4793_s23  ;;  %818 = vrot.lane.b32.xlu0 %v5115_v10, %s4793_s23 }
  0x7b   : > { %816 = vrot.lane.b32.xlu1 %v5119_v11, %s4793_s23  ;;  %822 = vrot.lane.b32.xlu0 %v5123_v12, %s4793_s23 }
  0x7f   : > { %820 = vrot.lane.b32.xlu1 %v5127_v13, %s4793_s23  ;;  %826 = vrot.lane.b32.xlu0 %v5131_v14, %s4793_s23 }
  0x83   : > { %824 = vrot.lane.b32.xlu1 %v5135_v15, %s4793_s23  ;;  %830 = vrot.lane.b32.xlu0 %v5139_v16, %s4793_s23 }
  0x87   : > { %828 = vrot.lane.b32.xlu1 %v5143_v17, %s4793_s23  ;;  %834 = vrot.lane.b32.xlu0 %v5147_v18, %s4793_s23 }
  0x88   : > { %v5181_v33 = vpop.permute.xlu0 %670 }
  0x89   : > { %8886 = vst [vmem:[#allocation3_spill] sm:$0xff] %v5181_v33  ;;  %v5219_v33 = vld [vmem:[#allocation2 + $0x172] sm:$0xff] }
  0x8a   : > { %8898 = vst [vmem:[#allocation15_spill] sm:$0xff] %v5219_v33 }
  0x8b   : > { %832 = vrot.lane.b32.xlu1 %v5151_v19, %s4793_s23  ;;  %838 = vrot.lane.b32.xlu0 %v5155_v20, %s4793_s23 }
  0x8c   : > { %v5191_v36 = vpop.permute.xlu0 %672 }
  0x8d   : > { %8889 = vst [vmem:[#allocation6_spill] sm:$0xff] %v5191_v36 }
  0x8f   : > { %836 = vrot.lane.b32.xlu1 %v5159_v21, %s4793_s23  ;;  %842 = vrot.lane.b32.xlu0 %v5163_v22, %s4793_s23 }
  0x93   : > { %840 = vrot.lane.b32.xlu1 %v5167_v23, %s4793_s23  ;;  %846 = vrot.lane.b32.xlu0 %v5171_v24, %s4793_s23 }
  0x97   : > { %844 = vrot.lane.b32.xlu1 %v5175_v28, %s4793_s23  ;;  %850 = vrot.lane.b32.xlu0 %v5179_v29, %s4793_s23 }
  0x9b   : > { %848 = vrot.lane.b32.xlu1 %v5185_v34, %s4793_s23  ;;  %854 = vrot.lane.b32.xlu0 %v5189_v35, %s4793_s23 }
  0x9d   : > { %v5199_v39 = vpop.permute.xlu1 %674  ;;  %v5203_v62 = vpop.permute.xlu0 %678 }
  0x9e   : > { %8891 = vst [vmem:[#allocation8_spill] sm:$0xff] %v5199_v39  ;;  %8893 = vst [vmem:[#allocation10_spill] sm:$0xff] %v5203_v62  ;;  %v5217_v39 = vld [vmem:[#allocation2 + $0x18] sm:$0xff] }
  0x9f   : > { %852 = vrot.lane.b32.xlu1 %v5195_v37, %s4793_s23  ;;  %858 = vrot.lane.b32.xlu0 %v5201_v58, %s4793_s23  ;;  %8897 = vst [vmem:[#allocation14_spill] sm:$0xff] %v5217_v39 }
  0xa1   : > { %v5211_v3 = vpop.permute.xlu1 %676  ;;  %v5213_v36 = vpop.permute.xlu0 %682 }
  0xa2   : > { %8895 = vst [vmem:[#allocation12_spill] sm:$0xff] %v5211_v3  ;;  %8896 = vst [vmem:[#allocation13_spill] sm:$0xff] %v5213_v36  ;;  %v5229_v3 = vld [vmem:[#allocation2 + $0x30] sm:$0xff] }
  0xa3   : > { %856 = vrot.lane.b32.xlu1 %v5207_v0, %s4793_s23  ;;  %926 = vrot.lane.b32.xlu0 %v5217_v39, %s4794_s24  ;;  %8901 = vst [vmem:[#allocation18_spill] sm:$0xff] %v5229_v3  ;;  %v5235_v0 = vld [vmem:[#allocation2 + $0x20] sm:$0xff]  ;;  %v5247_v39 = vld [vmem:[#allocation2 + $0x38] sm:$0xff] }
  0xa4   : > { %8903 = vst [vmem:[#allocation20_spill] sm:$0xff] %v5235_v0  ;;  %8907 = vst [vmem:[#allocation24_spill] sm:$0xff] %v5247_v39 }
  0xa5   : > { %v5223_v62 = vpop.permute.xlu1 %680  ;;  %v5225_v37 = vpop.permute.xlu0 %686 }
  0xa6   : > { %8899 = vst [vmem:[#allocation16_spill] sm:$0xff] %v5223_v62  ;;  %8900 = vst [vmem:[#allocation17_spill] sm:$0xff] %v5225_v37  ;;  %v5241_v62 = vld [vmem:[#allocation2 + $0x48] sm:$0xff] }
  0xa7   : > { %860 = vrot.lane.b32.xlu1 %v5219_v33, %s4793_s23  ;;  %930 = vrot.lane.b32.xlu0 %v5229_v3, %s4794_s24  ;;  %8905 = vst [vmem:[#allocation22_spill] sm:$0xff] %v5241_v62 }
  0xa9   : > { %v5233_v36 = vpop.permute.xlu1 %684  ;;  %v5237_v58 = vpop.permute.xlu0 %690 }
  0xaa   : > { %8902 = vst [vmem:[#allocation19_spill] sm:$0xff] %v5233_v36  ;;  %8904 = vst [vmem:[#allocation21_spill] sm:$0xff] %v5237_v58  ;;  %v5253_v36 = vld [vmem:[#allocation2 + $0x60] sm:$0xff] }
  0xab   : > { %928 = vrot.lane.b32.xlu1 %v5235_v0, %s4794_s24  ;;  %934 = vrot.lane.b32.xlu0 %v5241_v62, %s4794_s24  ;;  %8909 = vst [vmem:[#allocation26_spill] sm:$0xff] %v5253_v36  ;;  %v5259_v0 = vld [vmem:[#allocation2 + $0x50] sm:$0xff] }
  0xac   : > { %8911 = vst [vmem:[#allocation28_spill] sm:$0xff] %v5259_v0 }
  0xad   : > { %v5245_v37 = vpop.permute.xlu1 %688  ;;  %v5249_v33 = vpop.permute.xlu0 %694 }
  0xae   : > { %8906 = vst [vmem:[#allocation23_spill] sm:$0xff] %v5245_v37  ;;  %8908 = vst [vmem:[#allocation25_spill] sm:$0xff] %v5249_v33  ;;  %v5265_v37 = vld [vmem:[#allocation2 + $0x78] sm:$0xff] }
  0xaf   : > { %932 = vrot.lane.b32.xlu1 %v5247_v39, %s4794_s24  ;;  %938 = vrot.lane.b32.xlu0 %v5253_v36, %s4794_s24  ;;  %8913 = vst [vmem:[#allocation30_spill] sm:$0xff] %v5265_v37  ;;  %v5271_v39 = vld [vmem:[#allocation2 + $0x68] sm:$0xff] }
  0xb0   : > { %8915 = vst [vmem:[#allocation32_spill] sm:$0xff] %v5271_v39 }
  0xb1   : > { %v5257_v58 = vpop.permute.xlu1 %692  ;;  %v5261_v3 = vpop.permute.xlu0 %698 }
  0xb2   : > { %8910 = vst [vmem:[#allocation27_spill] sm:$0xff] %v5257_v58  ;;  %8912 = vst [vmem:[#allocation29_spill] sm:$0xff] %v5261_v3  ;;  %v5277_v58 = vld [vmem:[#allocation2 + $0x90] sm:$0xff] }
  0xb3   : > { %936 = vrot.lane.b32.xlu1 %v5259_v0, %s4794_s24  ;;  %942 = vrot.lane.b32.xlu0 %v5265_v37, %s4794_s24  ;;  %8917 = vst [vmem:[#allocation34_spill] sm:$0xff] %v5277_v58  ;;  %v5283_v0 = vld [vmem:[#allocation2 + $0x80] sm:$0xff] }
  0xb4   : > { %8919 = vst [vmem:[#allocation36_spill] sm:$0xff] %v5283_v0 }
  0xb5   : > { %v5269_v33 = vpop.permute.xlu1 %696  ;;  %v5273_v62 = vpop.permute.xlu0 %702 }
  0xb6   : > { %8914 = vst [vmem:[#allocation31_spill] sm:$0xff] %v5269_v33  ;;  %8916 = vst [vmem:[#allocation33_spill] sm:$0xff] %v5273_v62  ;;  %v5289_v33 = vld [vmem:[#allocation2 + $0xa8] sm:$0xff] }
  0xb7   : > { %940 = vrot.lane.b32.xlu1 %v5271_v39, %s4794_s24  ;;  %946 = vrot.lane.b32.xlu0 %v5277_v58, %s4794_s24  ;;  %8921 = vst [vmem:[#allocation38_spill] sm:$0xff] %v5289_v33  ;;  %v5295_v39 = vld [vmem:[#allocation2 + $0x98] sm:$0xff] }
  0xb8   : > { %8923 = vst [vmem:[#allocation40_spill] sm:$0xff] %v5295_v39 }
  0xb9   : > { %v5281_v3 = vpop.permute.xlu1 %700  ;;  %v5285_v36 = vpop.permute.xlu0 %706 }
  0xba   : > { %8918 = vst [vmem:[#allocation35_spill] sm:$0xff] %v5281_v3  ;;  %8920 = vst [vmem:[#allocation37_spill] sm:$0xff] %v5285_v36  ;;  %v365_v3 = vld [vmem:[#allocation2 + $0xc0] sm:$0xff] }
  0xbb   : > { %944 = vrot.lane.b32.xlu1 %v5283_v0, %s4794_s24  ;;  %950 = vrot.lane.b32.xlu0 %v5289_v33, %s4794_s24  ;;  %v5304_v0 = vld [vmem:[#allocation2 + $0xb0] sm:$0xff] }
  0xbc   : > { %8926 = vst [vmem:[#allocation43_spill] sm:$0xff] %v5304_v0 }
  0xbd   : > { %v5293_v62 = vpop.permute.xlu1 %704  ;;  %v5297_v37 = vpop.permute.xlu0 %710 }
  0xbe   : > { %8922 = vst [vmem:[#allocation39_spill] sm:$0xff] %v5293_v62  ;;  %8924 = vst [vmem:[#allocation41_spill] sm:$0xff] %v5297_v37  ;;  %v367_v62 = vld [vmem:[#allocation2 + $0xd8] sm:$0xff]  ;;  %v366_v37 = vld [vmem:[#allocation2 + $0xc8] sm:$0xff] }
  0xbf   : > { %948 = vrot.lane.b32.xlu1 %v5295_v39, %s4794_s24  ;;  %954 = vrot.lane.b32.xlu0 %v365_v3, %s4794_s24  ;;  %v369_v3 = vld [vmem:[#allocation2 + $0xf0] sm:$0xff]  ;;  %v368_v39 = vld [vmem:[#allocation2 + $0xe0] sm:$0xff] }
  0xc1   : > { %v5302_v36 = vpop.permute.xlu1 %708  ;;  %v5306_v58 = vpop.permute.xlu0 %714 }
  0xc2   : > { %8925 = vst [vmem:[#allocation42_spill] sm:$0xff] %v5302_v36  ;;  %8927 = vst [vmem:[#allocation44_spill] sm:$0xff] %v5306_v58 }
  0xc3   : > { %952 = vrot.lane.b32.xlu1 %v5304_v0, %s4794_s24  ;;  %958 = vrot.lane.b32.xlu0 %v367_v62, %s4794_s24  ;;  %v371_v0 = vld [vmem:[#allocation2 + $0x108] sm:$0xff] }
  0xc5   : > { %v5311_v33 = vpop.permute.xlu1 %712  ;;  %v5313_v35 = vpop.permute.xlu0 %718 }
  0xc6   : > { %8928 = vst [vmem:[#allocation45_spill] sm:$0xff] %v5311_v33  ;;  %8929 = vst [vmem:[#allocation46_spill] sm:$0xff] %v5313_v35  ;;  %v370_v33 = vld [vmem:[#allocation2 + $0xf8] sm:$0xff]  ;;  %v372_v35 = vld [vmem:[#allocation2 + $0x110] sm:$0xff] }
  0xc7   : > { %956 = vrot.lane.b32.xlu1 %v366_v37, %s4794_s24  ;;  %962 = vrot.lane.b32.xlu0 %v369_v3, %s4794_s24  ;;  %v373_v37 = vld [vmem:[#allocation2 + $0x120] sm:$0xff] }
  0xc9   : > { %v5317_v36 = vpop.permute.xlu1 %716  ;;  %v5319_v58 = vpop.permute.xlu0 %722 }
  0xca   : > { %8930 = vst [vmem:[#allocation47_spill] sm:$0xff] %v5317_v36  ;;  %8931 = vst [vmem:[#allocation48_spill] sm:$0xff] %v5319_v58  ;;  %v374_v58 = vld [vmem:[#allocation2 + $0x128] sm:$0xff] }
  0xcb   : > { %960 = vrot.lane.b32.xlu1 %v368_v39, %s4794_s24  ;;  %966 = vrot.lane.b32.xlu0 %v371_v0, %s4794_s24  ;;  %v375_v39 = vld [vmem:[#allocation2 + $0x138] sm:$0xff] }
  0xcd   : > { %v5323_v62 = vpop.permute.xlu1 %720  ;;  %v5325_v34 = vpop.permute.xlu0 %726 }
  0xce   : > { %8932 = vst [vmem:[#allocation49_spill] sm:$0xff] %v5323_v62  ;;  %8933 = vst [vmem:[#allocation50_spill] sm:$0xff] %v5325_v34  ;;  %v376_v34 = vld [vmem:[#allocation2 + $0x140] sm:$0xff] }
  0xcf   : > { %964 = vrot.lane.b32.xlu1 %v370_v33, %s4794_s24  ;;  %970 = vrot.lane.b32.xlu0 %v373_v37, %s4794_s24  ;;  %v377_v33 = vld [vmem:[#allocation2 + $0x150] sm:$0xff] }
  0xd1   : > { %v5329_v3 = vpop.permute.xlu1 %724  ;;  %v5331_v36 = vpop.permute.xlu0 %730 }
  0xd2   : > { %8934 = vst [vmem:[#allocation51_spill] sm:$0xff] %v5329_v3  ;;  %8935 = vst [vmem:[#allocation52_spill] sm:$0xff] %v5331_v36  ;;  %v378_v36 = vld [vmem:[#allocation2 + $0x158] sm:$0xff] }
  0xd3   : > { %968 = vrot.lane.b32.xlu1 %v372_v35, %s4794_s24  ;;  %974 = vrot.lane.b32.xlu0 %v375_v39, %s4794_s24  ;;  %v379_v35 = vld [vmem:[#allocation2 + $0x168] sm:$0xff] }
  0xd5   : > { %v5335_v0 = vpop.permute.xlu1 %728  ;;  %v5337_v62 = vpop.permute.xlu0 %798 }
  0xd6   : > { %8936 = vst [vmem:[#allocation53_spill] sm:$0xff] %v5335_v0  ;;  %8937 = vst [vmem:[#allocation54_spill] sm:$0xff] %v5337_v62  ;;  %v475_v0 = vld [vmem:[#allocation2 + $0x180] sm:$0xff] }
  0xd7   : > { %972 = vrot.lane.b32.xlu1 %v374_v58, %s4794_s24  ;;  %978 = vrot.lane.b32.xlu0 %v377_v33, %s4794_s24  ;;  %v380_v33 = vld [vmem:[#allocation2 + $0x170] sm:$0xff] }
  0xd9   : > { %v5341_v37 = vpop.permute.xlu1 %732  ;;  %v5343_v3 = vpop.permute.xlu0 %802 }
  0xda   : > { %8938 = vst [vmem:[#allocation55_spill] sm:$0xff] %v5341_v37  ;;  %8939 = vst [vmem:[#allocation56_spill] sm:$0xff] %v5343_v3 }
  0xdb   : > { %976 = vrot.lane.b32.xlu1 %v376_v34, %s4794_s24  ;;  %982 = vrot.lane.b32.xlu0 %v379_v35, %s4794_s24  ;;  %v476_v34 = vld [vmem:[#allocation2 + $0x188] sm:$0xff] }
  0xdd   : > { %v5347_v39 = vpop.permute.xlu1 %800  ;;  %v5349_v62 = vpop.permute.xlu0 %806 }
  0xdf   : > { %980 = vrot.lane.b32.xlu1 %v378_v36, %s4794_s24  ;;  %986 = vrot.lane.b32.xlu0 %v475_v0, %s4794_s24 }
  0xe1   : > { %v5353_v58 = vpop.permute.xlu1 %804  ;;  %v5355_v37 = vpop.permute.xlu0 %810 }
  0xe3   : > { %984 = vrot.lane.b32.xlu1 %v380_v33, %s4794_s24  ;;  %1054 = vrot.lane.b32.xlu0 %v4944_v25, %s4795_s25 }
  0xe5   : > { %v5360_v35 = vpop.permute.xlu1 %808  ;;  %v5362_v3 = vpop.permute.xlu0 %814 }
  0xe7   : > { %988 = vrot.lane.b32.xlu1 %v476_v34, %s4794_s24  ;;  %1058 = vrot.lane.b32.xlu0 %v4946_v26, %s4795_s25 }
  0xe9   : > { %v5367_v36 = vpop.permute.xlu1 %812  ;;  %v5369_v0 = vpop.permute.xlu0 %818 }
  0xeb   : > { %1056 = vrot.lane.b32.xlu1 %v4953_v27, %s4795_s25  ;;  %1062 = vrot.lane.b32.xlu0 %v4961_v30, %s4795_s25 }
  0xed   : > { %v5375_v25 = vpop.permute.xlu1 %816  ;;  %v5377_v33 = vpop.permute.xlu0 %822 }
  0xee   : > { %8940 = vst [vmem:[#allocation57_spill] sm:$0xff] %v5377_v33 }
  0xef   : > { %1060 = vrot.lane.b32.xlu1 %v4965_v31, %s4795_s25  ;;  %1066 = vrot.lane.b32.xlu0 %v4969_v32, %s4795_s25 }
  0xf1   : > { %v5383_v26 = vpop.permute.xlu1 %820  ;;  %v5385_v34 = vpop.permute.xlu0 %826 }
  0xf2   : > { %8941 = vst [vmem:[#allocation58_spill] sm:$0xff] %v5383_v26  ;;  %8942 = vst [vmem:[#allocation59_spill] sm:$0xff] %v5385_v34 }
  0xf3   : > { %1064 = vrot.lane.b32.xlu1 %v4981_v38, %s4795_s25  ;;  %1070 = vrot.lane.b32.xlu0 %v4989_v40, %s4795_s25 }
  0xf5   : > { %v5391_v27 = vpop.permute.xlu1 %824  ;;  %v5393_v30 = vpop.permute.xlu0 %830 }
  0xf6   : > { %8943 = vst [vmem:[#allocation60_spill] sm:$0xff] %v5391_v27  ;;  %8944 = vst [vmem:[#allocation61_spill] sm:$0xff] %v5393_v30 }
  0xf7   : > { %1068 = vrot.lane.b32.xlu1 %v4993_v41, %s4795_s25  ;;  %1074 = vrot.lane.b32.xlu0 %v4997_v42, %s4795_s25 }
  0xf9   : > { %v5399_v31 = vpop.permute.xlu1 %828  ;;  %v5401_v32 = vpop.permute.xlu0 %834 }
  0xfa   : > { %8945 = vst [vmem:[#allocation62_spill] sm:$0xff] %v5399_v31  ;;  %8946 = vst [vmem:[#allocation63_spill] sm:$0xff] %v5401_v32  ;;  %v609_v32 = vld [vmem:[#allocation2 + $0x52] sm:$0xff]  ;;  %v618_v31 = vld [vmem:[#allocation2 + $0xc2] sm:$0xff] }
  0xfb   : > { %1072 = vrot.lane.b32.xlu1 %v5001_v43, %s4795_s25  ;;  %1078 = vrot.lane.b32.xlu0 %v5005_v44, %s4795_s25 }
  0xfd   : > { %v5407_v38 = vpop.permute.xlu1 %832  ;;  %v5409_v40 = vpop.permute.xlu0 %838 }
  0xfe   : > { %8947 = vst [vmem:[#allocation64_spill] sm:$0xff] %v5407_v38  ;;  %8948 = vst [vmem:[#allocation65_spill] sm:$0xff] %v5409_v40  ;;  %v574_v40 = vld [vmem:[#allocation2 + $0x31] sm:$0xff] }
  0xff   : > { %1076 = vrot.lane.b32.xlu1 %v5009_v45, %s4795_s25  ;;  %1082 = vrot.lane.b32.xlu0 %v5013_v46, %s4795_s25 }
 0x101   : > { %v5415_v41 = vpop.permute.xlu1 %836  ;;  %v5417_v42 = vpop.permute.xlu0 %842 }
 0x102   : > { %8949 = vst [vmem:[#allocation66_spill] sm:$0xff] %v5415_v41  ;;  %8950 = vst [vmem:[#allocation67_spill] sm:$0xff] %v5417_v42 }
 0x103   : > { %1080 = vrot.lane.b32.xlu1 %v5017_v47, %s4795_s25  ;;  %1086 = vrot.lane.b32.xlu0 %v5021_v48, %s4795_s25 }
 0x105   : > { %v5423_v43 = vpop.permute.xlu1 %840  ;;  %v5425_v44 = vpop.permute.xlu0 %846 }
 0x106   : > { %8951 = vst [vmem:[#allocation68_spill] sm:$0xff] %v5423_v43  ;;  %8952 = vst [vmem:[#allocation69_spill] sm:$0xff] %v5425_v44  ;;  %v8993_v44 = vld [vmem:[#allocation24_spill] sm:$0xff] }
 0x107   : > { %1084 = vrot.lane.b32.xlu1 %v5025_v49, %s4795_s25  ;;  %1090 = vrot.lane.b32.xlu0 %v5029_v50, %s4795_s25 }
 0x109   : > { %v5431_v45 = vpop.permute.xlu1 %844  ;;  %v5433_v46 = vpop.permute.xlu0 %850 }
 0x10a   : > { %8953 = vst [vmem:[#allocation70_spill] sm:$0xff] %v5431_v45  ;;  %8954 = vst [vmem:[#allocation71_spill] sm:$0xff] %v5433_v46 }
 0x10b   : > { %1088 = vrot.lane.b32.xlu1 %v5033_v51, %s4795_s25  ;;  %1094 = vrot.lane.b32.xlu0 %v5037_v52, %s4795_s25 }
 0x10d   : > { %v5439_v47 = vpop.permute.xlu1 %848  ;;  %v5441_v48 = vpop.permute.xlu0 %854 }
 0x10e   : > { %8955 = vst [vmem:[#allocation72_spill] sm:$0xff] %v5439_v47  ;;  %8956 = vst [vmem:[#allocation73_spill] sm:$0xff] %v5441_v48 }
 0x10f   : > { %1092 = vrot.lane.b32.xlu1 %v5041_v53, %s4795_s25  ;;  %1098 = vrot.lane.b32.xlu0 %v5045_v54, %s4795_s25 }
 0x111   : > { %v5447_v49 = vpop.permute.xlu1 %852  ;;  %v5449_v50 = vpop.permute.xlu0 %858 }
 0x112   : > { %8957 = vst [vmem:[#allocation74_spill] sm:$0xff] %v5447_v49  ;;  %8958 = vst [vmem:[#allocation75_spill] sm:$0xff] %v5449_v50  ;;  %v5619_v49 = vld [vmem:[#allocation2 + $0x18a] sm:$0xff] }
 0x113   : > { %1096 = vrot.lane.b32.xlu1 %v5049_v55, %s4795_s25  ;;  %1102 = vrot.lane.b32.xlu0 %v5053_v56, %s4795_s25  ;;  %v507_v56 = vld [vmem:[#allocation2 + $0x181] sm:$0xff] }
 0x115   : > { %v5455_v51 = vpop.permute.xlu1 %856  ;;  %v5457_v52 = vpop.permute.xlu0 %926 }
 0x116   : > { %8959 = vst [vmem:[#allocation76_spill] sm:$0xff] %v5455_v51  ;;  %v8982_v51 = vld [vmem:[#allocation4_spill] sm:$0xff] }
 0x117   : > { %1100 = vrot.lane.b32.xlu1 %v5057_v57, %s4795_s25  ;;  %1106 = vrot.lane.b32.xlu0 %v5063_v59, %s4795_s25 }
 0x119   : > { %v5463_v53 = vpop.permute.xlu1 %860  ;;  %v5465_v54 = vpop.permute.xlu0 %930 }
 0x11a   : > { %8960 = vst [vmem:[#allocation77_spill] sm:$0xff] %v5463_v53 }
 0x11b   : > { %1104 = vrot.lane.b32.xlu1 %v5067_v60, %s4795_s25  ;;  %1110 = vrot.lane.b32.xlu0 %v5071_v61, %s4795_s25  ;;  %v508_v60 = vld [vmem:[#allocation2 + $0x189] sm:$0xff] }
 0x11d   : > { %v5471_v55 = vpop.permute.xlu1 %928  ;;  %v5473_v50 = vpop.permute.xlu0 %934 }
 0x11f   : > { %1108 = vrot.lane.b32.xlu1 %v5077_v63, %s4795_s25  ;;  %1114 = vrot.lane.b32.xlu0 %v507_v56, %s4795_s25 }
 0x121   : > { %v5478_v57 = vpop.permute.xlu1 %932  ;;  %v5480_v59 = vpop.permute.xlu0 %938 }
 0x123   : > { %1112 = vrot.lane.b32.xlu1 %v5083_v1, %s4795_s25  ;;  %1182 = vrot.lane.b32.xlu0 %v5086_v2, %s4796_s26 }
 0x125   : > { %v5486_v61 = vpop.permute.xlu1 %936  ;;  %v5488_v53 = vpop.permute.xlu0 %942 }
 0x127   : > { %1116 = vrot.lane.b32.xlu1 %v508_v60, %s4795_s25  ;;  %1186 = vrot.lane.b32.xlu0 %v5092_v4, %s4796_s26 }
 0x129   : > { %v5493_v63 = vpop.permute.xlu1 %940  ;;  %v5495_v56 = vpop.permute.xlu0 %946 }
 0x12a   : > { %8961 = vst [vmem:[#allocation78_spill] sm:$0xff] %v5495_v56 }
 0x12b   : > { %1184 = vrot.lane.b32.xlu1 %v5095_v5, %s4796_s26  ;;  %1190 = vrot.lane.b32.xlu0 %v5099_v6, %s4796_s26 }
 0x12d   : > { %v5501_v1 = vpop.permute.xlu1 %944  ;;  %v5503_v2 = vpop.permute.xlu0 %950 }
 0x12e   : > { %8962 = vst [vmem:[#allocation79_spill] sm:$0xff] %v5503_v2  ;;  %v596_v2 = vld [vmem:[#allocation2 + $0x139] sm:$0xff] }
 0x12f   : > { %1188 = vrot.lane.b32.xlu1 %v5103_v7, %s4796_s26  ;;  %1194 = vrot.lane.b32.xlu0 %v5107_v8, %s4796_s26 }
 0x131   : > { %v5509_v4 = vpop.permute.xlu1 %948  ;;  %v5511_v60 = vpop.permute.xlu0 %954 }
 0x132   : > { %8963 = vst [vmem:[#allocation80_spill] sm:$0xff] %v5509_v4  ;;  %8964 = vst [vmem:[#allocation81_spill] sm:$0xff] %v5511_v60  ;;  %v556_v60 = vld [vmem:[#allocation2 + $0xd8] sm:$0xff]  ;;  %v9047_v4 = vld [vmem:[#allocation3_spill] sm:$0xff] }
 0x133   : > { %1192 = vrot.lane.b32.xlu1 %v5111_v9, %s4796_s26  ;;  %1198 = vrot.lane.b32.xlu0 %v5115_v10, %s4796_s26 }
 0x135   : > { %v5517_v5 = vpop.permute.xlu1 %952  ;;  %v5519_v6 = vpop.permute.xlu0 %958 }
 0x136   : > { %8965 = vst [vmem:[#allocation82_spill] sm:$0xff] %v5517_v5  ;;  %8966 = vst [vmem:[#allocation83_spill] sm:$0xff] %v5519_v6  ;;  %v554_v6 = vld [vmem:[#allocation2 + $0xc0] sm:$0xff] }
 0x137   : > { %1196 = vrot.lane.b32.xlu1 %v5119_v11, %s4796_s26  ;;  %1202 = vrot.lane.b32.xlu0 %v5123_v12, %s4796_s26 }
 0x139   : > { %v5525_v7 = vpop.permute.xlu1 %956  ;;  %v5527_v8 = vpop.permute.xlu0 %962 }
 0x13a   : > { %8967 = vst [vmem:[#allocation84_spill] sm:$0xff] %v5525_v7  ;;  %8968 = vst [vmem:[#allocation85_spill] sm:$0xff] %v5527_v8 }
 0x13b   : > { %1200 = vrot.lane.b32.xlu1 %v5127_v13, %s4796_s26  ;;  %1206 = vrot.lane.b32.xlu0 %v5131_v14, %s4796_s26 }
 0x13d   : > { %v5533_v9 = vpop.permute.xlu1 %960  ;;  %v5535_v10 = vpop.permute.xlu0 %966 }
 0x13e   : > { %8969 = vst [vmem:[#allocation86_spill] sm:$0xff] %v5533_v9  ;;  %8970 = vst [vmem:[#allocation87_spill] sm:$0xff] %v5535_v10  ;;  %v9008_v10 = vld [vmem:[#allocation40_spill] sm:$0xff] }
 0x13f   : > { %1204 = vrot.lane.b32.xlu1 %v5135_v15, %s4796_s26  ;;  %1210 = vrot.lane.b32.xlu0 %v5139_v16, %s4796_s26 }
 0x141   : > { %v5541_v11 = vpop.permute.xlu1 %964  ;;  %v5543_v12 = vpop.permute.xlu0 %970 }
 0x142   : > { %8971 = vst [vmem:[#allocation88_spill] sm:$0xff] %v5541_v11  ;;  %8972 = vst [vmem:[#allocation89_spill] sm:$0xff] %v5543_v12  ;;  %v1931_v12 = vld [vmem:[%s8845_s1 + $0x30] sm:$0xff] }
 0x143   : > { %1208 = vrot.lane.b32.xlu1 %v5143_v17, %s4796_s26  ;;  %1214 = vrot.lane.b32.xlu0 %v5147_v18, %s4796_s26 }
 0x145   : > { %v5549_v13 = vpop.permute.xlu1 %968  ;;  %v5551_v14 = vpop.permute.xlu0 %974 }
 0x146   : > { %8973 = vst [vmem:[#allocation90_spill] sm:$0xff] %v5549_v13  ;;  %8974 = vst [vmem:[#allocation91_spill] sm:$0xff] %v5551_v14  ;;  %v9001_v13 = vld [vmem:[#allocation34_spill] sm:$0xff] }
 0x147   : > { %1212 = vrot.lane.b32.xlu1 %v5151_v19, %s4796_s26  ;;  %1218 = vrot.lane.b32.xlu0 %v5155_v20, %s4796_s26 }
 0x149   : > { %v5557_v15 = vpop.permute.xlu1 %972  ;;  %v5559_v16 = vpop.permute.xlu0 %978 }
 0x14a   : > { %8975 = vst [vmem:[#allocation92_spill] sm:$0xff] %v5557_v15  ;;  %8976 = vst [vmem:[#allocation93_spill] sm:$0xff] %v5559_v16  ;;  %v8990_v16 = vld [vmem:[#allocation18_spill] sm:$0xff]  ;;  %v1929_v15 = vld [vmem:[%s8845_s1 + $0x20] sm:$0xff] }
 0x14b   : > { %1216 = vrot.lane.b32.xlu1 %v5159_v21, %s4796_s26  ;;  %1222 = vrot.lane.b32.xlu0 %v5163_v22, %s4796_s26 }
 0x14d   : > { %v5565_v17 = vpop.permute.xlu1 %976  ;;  %v5567_v18 = vpop.permute.xlu0 %982 }
 0x14e   : > { %8977 = vst [vmem:[#allocation94_spill] sm:$0xff] %v5565_v17  ;;  %8978 = vst [vmem:[#allocation95_spill] sm:$0xff] %v5567_v18  ;;  %v1927_v17 = vld [vmem:[%s8845_s1 + $0x10] sm:$0xff] }
 0x14f   : > { %1220 = vrot.lane.b32.xlu1 %v5167_v23, %s4796_s26  ;;  %1226 = vrot.lane.b32.xlu0 %v5171_v24, %s4796_s26  ;;  %v8983_v23 = vld [vmem:[#allocation5_spill] sm:$0xff] }
 0x150   : > { %8989 = vst [vmem:[#allocation5_spill] sm:$0xff] %v5619_v49 }
 0x151   : > { %v5573_v19 = vpop.permute.xlu1 %980  ;;  %v5575_v20 = vpop.permute.xlu0 %986 }
 0x152   : > { %8979 = vst [vmem:[#allocation96_spill] sm:$0xff] %v5573_v19  ;;  %8980 = vst [vmem:[#allocation97_spill] sm:$0xff] %v5575_v20  ;;  %v8985_v20 = vld [vmem:[#allocation7_spill] sm:$0xff]  ;;  %v1926_v19 = vld [vmem:[%s8845_s1 + $0x8] sm:$0xff] }
 0x153   : > { %1224 = vrot.lane.b32.xlu1 %v5175_v28, %s4796_s26  ;;  %1230 = vrot.lane.b32.xlu0 %v5179_v29, %s4796_s26  ;;  %v8986_v28 = vld [vmem:[#allocation9_spill] sm:$0xff] }
 0x155   : > { %v5581_v21 = vpop.permute.xlu1 %984  ;;  %v5583_v22 = vpop.permute.xlu0 %1054 }
 0x156   : > { %8981 = vst [vmem:[#allocation98_spill] sm:$0xff] %v5581_v21  ;;  %v5599_v21 = vld [vmem:[#allocation2 + $0x182] sm:$0xff] }
 0x157   : > { %1228 = vrot.lane.b32.xlu1 %v8982_v51, %s4796_s26  ;;  %1234 = vrot.lane.b32.xlu0 %v8983_v23, %s4796_s26  ;;  %v8987_v51 = vld [vmem:[#allocation11_spill] sm:$0xff] }
 0x159   : > { %v5589_v24 = vpop.permute.xlu1 %988  ;;  %v5591_v18 = vpop.permute.xlu0 %1058 }
 0x15a   : > { %8984 = vst [vmem:[#allocation4_spill] sm:$0xff] %v5589_v24 }
 0x15b   : > { %1232 = vrot.lane.b32.xlu1 %v8985_v20, %s4796_s26  ;;  %1238 = vrot.lane.b32.xlu0 %v8986_v28, %s4796_s26  ;;  %v8988_v20 = vld [vmem:[#allocation15_spill] sm:$0xff]  ;;  %v1925_v28 = vld [vmem:[%s8845_s1] sm:$0xff] }
 0x15d   : > { %v5597_v29 = vpop.permute.xlu1 %1056  ;;  %v5601_v48 = vpop.permute.xlu0 %1062 }
 0x15f   : > { %1236 = vrot.lane.b32.xlu1 %v8987_v51, %s4796_s26  ;;  %1242 = vrot.lane.b32.xlu0 %v5599_v21, %s4796_s26  ;;  %v4688_v51 = vpack.c.bf16 %v1926_v19, %v1925_v28  ;;  %v1928_v19 = vld [vmem:[%s8845_s1 + $0x18] sm:$0xff] }
 0x160   : > { %v4692_v28 = vpack.c.bf16 %v1928_v19, %v1927_v17  ;;  %v1930_v17 = vld [vmem:[%s8845_s1 + $0x28] sm:$0xff] }
 0x161   : > { %v5607_v23 = vpop.permute.xlu1 %1060  ;;  %v5609_v24 = vpop.permute.xlu0 %1066  ;;  %4689 = vmatprep.subr.bf16.mxu0 %v4688_v51  ;;  %4704 = vmatprep.subr.bf16.mxu1 %v4688_v51  ;;  %v8994_v19 = vld [vmem:[#allocation26_spill] sm:$0xff] }
 0x162   : > { %4691 = vmatpush3.bf16.msra.mxu0 %v4688_v51  ;;  %4709 = vmatpush3.bf16.msra.mxu1 %v4688_v51  ;;  %v4696_v51 = vpack.c.bf16 %v1930_v17, %v1929_v15  ;;  %v1932_v15 = vld [vmem:[%s8845_s1 + $0x38] sm:$0xff]  ;;  %v8997_v17 = vld [vmem:[#allocation30_spill] sm:$0xff] }
 0x163   : > { %1240 = vrot.lane.b32.xlu1 %v8988_v20, %s4796_s26  ;;  %1310 = vrot.lane.b32.xlu0 %v8990_v16, %s4797_s5  ;;  %v8991_v16 = vld [vmem:[#allocation22_spill] sm:$0xff] }
 0x164   : > { %4693 = vmatprep.subr.bf16.mxu0 %v4692_v28  ;;  %4705 = vmatprep.subr.bf16.mxu1 %v4692_v28 }
 0x165   : > { %v5623_v46 = vpop.permute.xlu1 %1064  ;;  %v5625_v20 = vpop.permute.xlu0 %1070 }
 0x166   : > { %4695 = vmatpush3.bf16.msra.mxu0 %v4692_v28  ;;  %4710 = vmatpush3.bf16.msra.mxu1 %v4692_v28  ;;  %v4700_v28 = vpack.c.bf16 %v1932_v15, %v1931_v12  ;;  %v1933_v12 = vld [vmem:[%s8845_s1 + $0x40] sm:$0xff]  ;;  %v9004_v15 = vld [vmem:[#allocation36_spill] sm:$0xff] }
 0x167   : > { %1244 = vrot.lane.b32.xlu1 %v5619_v49, %s4796_s26  ;;  %1314 = vrot.lane.b32.xlu0 %v8991_v16, %s4797_s5  ;;  %s4798_s26 = smov 56   ;;  %v9048_v49 = vld [vmem:[#allocation6_spill] sm:$0xff] }
 0x168   : > { %4697 = vmatprep.subr.bf16.mxu0 %v4696_v51  ;;  %4706 = vmatprep.subr.bf16.mxu1 %v4696_v51 }
 0x169   : > { %v5637_v47 = vpop.permute.xlu1 %1068  ;;  %v5639_v14 = vpop.permute.xlu0 %1074 }
 0x16a   : > { %8992 = vst [vmem:[#allocation7_spill] sm:$0xff] %v5639_v14  ;;  %4699 = vmatpush3.bf16.msra.mxu0 %v4696_v51  ;;  %4711 = vmatpush3.bf16.msra.mxu1 %v4696_v51  ;;  %v597_v14 = vld [vmem:[#allocation2 + $0x141] sm:$0xff] }
 0x16b   : > { %1312 = vrot.lane.b32.xlu1 %v8993_v44, %s4797_s5  ;;  %1318 = vrot.lane.b32.xlu0 %v8994_v19, %s4797_s5  ;;  %v8996_v44 = vld [vmem:[#allocation28_spill] sm:$0xff] }
 0x16c   : > { %4701 = vmatprep.subr.bf16.mxu0 %v4700_v28  ;;  %4707 = vmatprep.subr.bf16.mxu1 %v4700_v28 }
 0x16d   : > { %v5651_v16 = vpop.permute.xlu1 %1072  ;;  %v5653_v45 = vpop.permute.xlu0 %1078 }
 0x16e   : > { %8995 = vst [vmem:[#allocation9_spill] sm:$0xff] %v5653_v45  ;;  %4703 = vmatpush3.bf16.msra.mxu0 %v4700_v28  ;;  %4712 = vmatpush3.bf16.msra.mxu1 %v4700_v28  ;;  %v9005_v28 = vld [vmem:[#allocation38_spill] sm:$0xff] }
 0x16f   : > { %1316 = vrot.lane.b32.xlu1 %v8996_v44, %s4797_s5  ;;  %1322 = vrot.lane.b32.xlu0 %v8997_v17, %s4797_s5  ;;  %v9000_v44 = vld [vmem:[#allocation32_spill] sm:$0xff] }
 0x170   : > { %4638 = vmatprep.subr.mxu0 %v1933_v12  ;;  %4708 = vmatprep.subr.mxu1 %v1933_v12 }
 0x171   : > { %v5665_v19 = vpop.permute.xlu1 %1076  ;;  %v5667_v42 = vpop.permute.xlu0 %1082 }
 0x172   : > { %8998 = vst [vmem:[#allocation11_spill] sm:$0xff] %v5665_v19  ;;  %8999 = vst [vmem:[#allocation15_spill] sm:$0xff] %v5667_v42  ;;  %4639 = vmatpush3.msra.mxu0 %v1933_v12  ;;  %4713 = vmatpush3.msra.mxu1 %v1933_v12  ;;  %v606_v12 = vld [vmem:[#allocation2 + $0x32] sm:$0xff] }
 0x173   : > { %1320 = vrot.lane.b32.xlu1 %v9000_v44, %s4797_s5  ;;  %1326 = vrot.lane.b32.xlu0 %v9001_v13, %s4797_s5  ;;  %v575_v13 = vld [vmem:[#allocation2 + $0x39] sm:$0xff] }
 0x175   : > { %v5673_v43 = vpop.permute.xlu1 %1080  ;;  %v5678_v51 = vpop.permute.xlu0 %1086 }
 0x176   : > { %9002 = vst [vmem:[#allocation18_spill] sm:$0xff] %v5673_v43  ;;  %9003 = vst [vmem:[#allocation22_spill] sm:$0xff] %v5678_v51  ;;  %v9023_v51 = vld [vmem:[#allocation43_spill] sm:$0xff]  ;;  %v588_v43 = vld [vmem:[#allocation2 + $0xd9] sm:$0xff] }
 0x177   : > { %1324 = vrot.lane.b32.xlu1 %v9004_v15, %s4797_s5  ;;  %1330 = vrot.lane.b32.xlu0 %v9005_v28, %s4797_s5  ;;  %v607_v15 = vld [vmem:[#allocation2 + $0x3a] sm:$0xff] }
 0x179   : > { %v5684_v17 = vpop.permute.xlu1 %1084  ;;  %v5686_v44 = vpop.permute.xlu0 %1090 }
 0x17a   : > { %9006 = vst [vmem:[#allocation24_spill] sm:$0xff] %v5684_v17  ;;  %9007 = vst [vmem:[#allocation26_spill] sm:$0xff] %v5686_v44  ;;  %v577_v44 = vld [vmem:[#allocation2 + $0x51] sm:$0xff]  ;;  %v586_v17 = vld [vmem:[#allocation2 + $0xc1] sm:$0xff] }
 0x17b   : > { %1328 = vrot.lane.b32.xlu1 %v9008_v10, %s4797_s5  ;;  %1440 = vrot.lane.b32.xlu0 %v575_v13, %s4798_s26  ;;  %v576_v10 = vld [vmem:[#allocation2 + $0x49] sm:$0xff] }
 0x17d   : > { %v5691_v11 = vpop.permute.xlu1 %1088  ;;  %v5693_v41 = vpop.permute.xlu0 %1094 }
 0x17e   : > { %9009 = vst [vmem:[#allocation28_spill] sm:$0xff] %v5691_v11  ;;  %9010 = vst [vmem:[#allocation30_spill] sm:$0xff] %v5693_v41 }
 0x17f   : > { %1438 = vrot.lane.b32.xlu1 %v574_v40, %s4798_s26  ;;  %1568 = vrot.lane.b32.xlu0 %v607_v15, %s4799_s27  ;;  %v608_v40 = vld [vmem:[#allocation2 + $0x4a] sm:$0xff] }
 0x181   : > { %v5697_v28 = vpop.permute.xlu1 %1092  ;;  %v5699_v8 = vpop.permute.xlu0 %1098 }
 0x182   : > { %9011 = vst [vmem:[#allocation32_spill] sm:$0xff] %v5697_v28  ;;  %9012 = vst [vmem:[#allocation34_spill] sm:$0xff] %v5699_v8  ;;  %v579_v28 = vld [vmem:[#allocation2 + $0x69] sm:$0xff] }
 0x183   : > { %1566 = vrot.lane.b32.xlu1 %v606_v12, %s4799_s27  ;;  %1444 = vrot.lane.b32.xlu0 %v577_v44, %s4798_s26  ;;  %v578_v12 = vld [vmem:[#allocation2 + $0x61] sm:$0xff]  ;;  %v611_v8 = vld [vmem:[#allocation2 + $0x6a] sm:$0xff] }
 0x185   : > { %v5703_v13 = vpop.permute.xlu1 %1096  ;;  %v5705_v41 = vpop.permute.xlu0 %1102 }
 0x186   : > { %9013 = vst [vmem:[#allocation36_spill] sm:$0xff] %v5703_v13  ;;  %9014 = vst [vmem:[#allocation38_spill] sm:$0xff] %v5705_v41  ;;  %v581_v41 = vld [vmem:[#allocation2 + $0x81] sm:$0xff] }
 0x187   : > { %1442 = vrot.lane.b32.xlu1 %v576_v10, %s4798_s26  ;;  %1572 = vrot.lane.b32.xlu0 %v609_v32, %s4799_s27  ;;  %v610_v10 = vld [vmem:[#allocation2 + $0x62] sm:$0xff] }
 0x189   : > { %v5709_v15 = vpop.permute.xlu1 %1100  ;;  %v5711_v11 = vpop.permute.xlu0 %1106 }
 0x18a   : > { %9015 = vst [vmem:[#allocation40_spill] sm:$0xff] %v5709_v15  ;;  %9016 = vst [vmem:[#allocation99_spill] sm:$0xff] %v5711_v11  ;;  %v613_v11 = vld [vmem:[#allocation2 + $0x82] sm:$0xff] }
 0x18b   : > { %1570 = vrot.lane.b32.xlu1 %v608_v40, %s4799_s27  ;;  %1448 = vrot.lane.b32.xlu0 %v579_v28, %s4798_s26  ;;  %v580_v40 = vld [vmem:[#allocation2 + $0x79] sm:$0xff] }
 0x18d   : > { %v5715_v44 = vpop.permute.xlu1 %1104  ;;  %v5717_v13 = vpop.permute.xlu0 %1110 }
 0x18e   : > { %9017 = vst [vmem:[#allocation100_spill] sm:$0xff] %v5715_v44  ;;  %9018 = vst [vmem:[#allocation101_spill] sm:$0xff] %v5717_v13  ;;  %v583_v13 = vld [vmem:[#allocation2 + $0x99] sm:$0xff] }
 0x18f   : > { %1446 = vrot.lane.b32.xlu1 %v578_v12, %s4798_s26  ;;  %1576 = vrot.lane.b32.xlu0 %v611_v8, %s4799_s27  ;;  %v612_v12 = vld [vmem:[#allocation2 + $0x7a] sm:$0xff] }
 0x191   : > { %v5721_v32 = vpop.permute.xlu1 %1108  ;;  %v5723_v15 = vpop.permute.xlu0 %1114 }
 0x192   : > { %9019 = vst [vmem:[#allocation102_spill] sm:$0xff] %v5721_v32  ;;  %9020 = vst [vmem:[#allocation103_spill] sm:$0xff] %v5723_v15  ;;  %v615_v15 = vld [vmem:[#allocation2 + $0x9a] sm:$0xff] }
 0x193   : > { %1574 = vrot.lane.b32.xlu1 %v610_v10, %s4799_s27  ;;  %1452 = vrot.lane.b32.xlu0 %v581_v41, %s4798_s26  ;;  %v582_v10 = vld [vmem:[#allocation2 + $0x91] sm:$0xff] }
 0x195   : > { %v5727_v28 = vpop.permute.xlu1 %1112  ;;  %v5729_v44 = vpop.permute.xlu0 %1182 }
 0x196   : > { %9021 = vst [vmem:[#allocation104_spill] sm:$0xff] %v5727_v28 }
 0x197   : > { %1450 = vrot.lane.b32.xlu1 %v580_v40, %s4798_s26  ;;  %1580 = vrot.lane.b32.xlu0 %v613_v11, %s4799_s27  ;;  %v614_v40 = vld [vmem:[#allocation2 + $0x92] sm:$0xff] }
 0x199   : > { %v5733_v8 = vpop.permute.xlu1 %1116  ;;  %v5735_v32 = vpop.permute.xlu0 %1186 }
 0x19a   : > { %9022 = vst [vmem:[#allocation105_spill] sm:$0xff] %v5733_v8  ;;  %v584_v8 = vld [vmem:[#allocation2 + $0xa9] sm:$0xff] }
 0x19b   : > { %1578 = vrot.lane.b32.xlu1 %v612_v12, %s4799_s27  ;;  %1456 = vrot.lane.b32.xlu0 %v583_v13, %s4798_s26  ;;  %v616_v12 = vld [vmem:[#allocation2 + $0xaa] sm:$0xff] }
 0x19d   : > { %v5739_v41 = vpop.permute.xlu1 %1184  ;;  %v5741_v28 = vpop.permute.xlu0 %1190 }
 0x19f   : > { %1454 = vrot.lane.b32.xlu1 %v582_v10, %s4798_s26  ;;  %1584 = vrot.lane.b32.xlu0 %v615_v15, %s4799_s27  ;;  %v585_v10 = vld [vmem:[#allocation2 + $0xb1] sm:$0xff] }
 0x1a1   : > { %v5745_v11 = vpop.permute.xlu1 %1188  ;;  %v5747_v9 = vpop.permute.xlu0 %1194 }
 0x1a3   : > { %1582 = vrot.lane.b32.xlu1 %v614_v40, %s4799_s27  ;;  %1458 = vrot.lane.b32.xlu0 %v584_v8, %s4798_s26  ;;  %v617_v40 = vld [vmem:[#allocation2 + $0xb2] sm:$0xff] }
 0x1a5   : > { %v5751_v13 = vpop.permute.xlu1 %1192  ;;  %v5753_v38 = vpop.permute.xlu0 %1198 }
 0x1a7   : > { %1332 = vrot.lane.b32.xlu1 %v9023_v51, %s4797_s5  ;;  %1586 = vrot.lane.b32.xlu0 %v616_v12, %s4799_s27  ;;  %v555_v51 = vld [vmem:[#allocation2 + $0xc8] sm:$0xff] }
 0x1a9   : > { %v5758_v15 = vpop.permute.xlu1 %1196  ;;  %v5760_v30 = vpop.permute.xlu0 %1202 }
 0x1aa   : > { %9024 = vst [vmem:[#allocation43_spill] sm:$0xff] %v5760_v30 }
 0x1ab   : > { %1460 = vrot.lane.b32.xlu1 %v585_v10, %s4798_s26  ;;  %1334 = vrot.lane.b32.xlu0 %v554_v6, %s4797_s5  ;;  %v587_v10 = vld [vmem:[#allocation2 + $0xc9] sm:$0xff] }
 0x1ad   : > { %v5764_v8 = vpop.permute.xlu1 %1200  ;;  %v5766_v7 = vpop.permute.xlu0 %1206 }
 0x1ae   : > { %9025 = vst [vmem:[#allocation106_spill] sm:$0xff] %v5766_v7  ;;  %v564_v7 = vld [vmem:[#allocation2 + $0x138] sm:$0xff] }
 0x1af   : > { %1588 = vrot.lane.b32.xlu1 %v617_v40, %s4799_s27  ;;  %1462 = vrot.lane.b32.xlu0 %v586_v17, %s4798_s26  ;;  %v619_v40 = vld [vmem:[#allocation2 + $0xca] sm:$0xff] }
 0x1b1   : > { %v5770_v12 = vpop.permute.xlu1 %1204  ;;  %v5772_v42 = vpop.permute.xlu0 %1210 }
 0x1b2   : > { %9026 = vst [vmem:[#allocation107_spill] sm:$0xff] %v5770_v12  ;;  %9027 = vst [vmem:[#allocation108_spill] sm:$0xff] %v5772_v42  ;;  %v620_v42 = vld [vmem:[#allocation2 + $0xda] sm:$0xff] }
 0x1b3   : > { %1336 = vrot.lane.b32.xlu1 %v555_v51, %s4797_s5  ;;  %1590 = vrot.lane.b32.xlu0 %v618_v31, %s4799_s27  ;;  %v557_v51 = vld [vmem:[#allocation2 + $0xe0] sm:$0xff] }
 0x1b4   : > { %v565_v12 = vld [vmem:[#allocation2 + $0x140] sm:$0xff] }
 0x1b5   : > { %v5776_v6 = vpop.permute.xlu1 %1208  ;;  %v5778_v34 = vpop.permute.xlu0 %1214 }
 0x1b6   : > { %9028 = vst [vmem:[#allocation109_spill] sm:$0xff] %v5776_v6  ;;  %9029 = vst [vmem:[#allocation110_spill] sm:$0xff] %v5778_v34  ;;  %v558_v34 = vld [vmem:[#allocation2 + $0xf0] sm:$0xff] }
 0x1b7   : > { %1464 = vrot.lane.b32.xlu1 %v587_v10, %s4798_s26  ;;  %1338 = vrot.lane.b32.xlu0 %v556_v60, %s4797_s5  ;;  %v589_v10 = vld [vmem:[#allocation2 + $0xe1] sm:$0xff] }
 0x1b9   : > { %v5782_v17 = vpop.permute.xlu1 %1212  ;;  %v5784_v5 = vpop.permute.xlu0 %1218 }
 0x1ba   : > { %9030 = vst [vmem:[#allocation111_spill] sm:$0xff] %v5782_v17  ;;  %9031 = vst [vmem:[#allocation112_spill] sm:$0xff] %v5784_v5  ;;  %v590_v5 = vld [vmem:[#allocation2 + $0xf1] sm:$0xff] }
 0x1bb   : > { %1592 = vrot.lane.b32.xlu1 %v619_v40, %s4799_s27  ;;  %1466 = vrot.lane.b32.xlu0 %v588_v43, %s4798_s26  ;;  %v621_v40 = vld [vmem:[#allocation2 + $0xe2] sm:$0xff] }
 0x1bd   : > { %v5788_v31 = vpop.permute.xlu1 %1216  ;;  %v5790_v6 = vpop.permute.xlu0 %1222 }
 0x1be   : > { %9032 = vst [vmem:[#allocation113_spill] sm:$0xff] %v5788_v31  ;;  %9033 = vst [vmem:[#allocation114_spill] sm:$0xff] %v5790_v6  ;;  %v622_v6 = vld [vmem:[#allocation2 + $0xf2] sm:$0xff] }
 0x1bf   : > { %1340 = vrot.lane.b32.xlu1 %v557_v51, %s4797_s5  ;;  %1594 = vrot.lane.b32.xlu0 %v620_v42, %s4799_s27  ;;  %v559_v51 = vld [vmem:[#allocation2 + $0xf8] sm:$0xff] }
 0x1c1   : > { %v5794_v60 = vpop.permute.xlu1 %1220  ;;  %v5796_v17 = vpop.permute.xlu0 %1226 }
 0x1c2   : > { %9034 = vst [vmem:[#allocation115_spill] sm:$0xff] %v5794_v60  ;;  %9035 = vst [vmem:[#allocation116_spill] sm:$0xff] %v5796_v17  ;;  %v560_v17 = vld [vmem:[#allocation2 + $0x108] sm:$0xff] }
 0x1c3   : > { %1468 = vrot.lane.b32.xlu1 %v589_v10, %s4798_s26  ;;  %1342 = vrot.lane.b32.xlu0 %v558_v34, %s4797_s5  ;;  %v591_v10 = vld [vmem:[#allocation2 + $0xf9] sm:$0xff] }
 0x1c5   : > { %v5800_v43 = vpop.permute.xlu1 %1224  ;;  %v5802_v31 = vpop.permute.xlu0 %1230 }
 0x1c6   : > { %9036 = vst [vmem:[#allocation117_spill] sm:$0xff] %v5800_v43  ;;  %9037 = vst [vmem:[#allocation118_spill] sm:$0xff] %v5802_v31  ;;  %v592_v31 = vld [vmem:[#allocation2 + $0x109] sm:$0xff] }
 0x1c7   : > { %1596 = vrot.lane.b32.xlu1 %v621_v40, %s4799_s27  ;;  %1470 = vrot.lane.b32.xlu0 %v590_v5, %s4798_s26  ;;  %v623_v40 = vld [vmem:[#allocation2 + $0xfa] sm:$0xff] }
 0x1c9   : > { %v5806_v42 = vpop.permute.xlu1 %1228  ;;  %v5808_v60 = vpop.permute.xlu0 %1234 }
 0x1ca   : > { %9038 = vst [vmem:[#allocation119_spill] sm:$0xff] %v5806_v42  ;;  %9039 = vst [vmem:[#allocation120_spill] sm:$0xff] %v5808_v60  ;;  %v624_v60 = vld [vmem:[#allocation2 + $0x10a] sm:$0xff] }
 0x1cb   : > { %1344 = vrot.lane.b32.xlu1 %v559_v51, %s4797_s5  ;;  %1598 = vrot.lane.b32.xlu0 %v622_v6, %s4799_s27  ;;  %v561_v51 = vld [vmem:[#allocation2 + $0x110] sm:$0xff] }
 0x1cd   : > { %v5812_v34 = vpop.permute.xlu1 %1232  ;;  %v5814_v43 = vpop.permute.xlu0 %1238 }
 0x1ce   : > { %9040 = vst [vmem:[#allocation121_spill] sm:$0xff] %v5812_v34  ;;  %9041 = vst [vmem:[#allocation122_spill] sm:$0xff] %v5814_v43  ;;  %v562_v43 = vld [vmem:[#allocation2 + $0x120] sm:$0xff] }
 0x1cf   : > { %1472 = vrot.lane.b32.xlu1 %v591_v10, %s4798_s26  ;;  %1346 = vrot.lane.b32.xlu0 %v560_v17, %s4797_s5  ;;  %v593_v10 = vld [vmem:[#allocation2 + $0x111] sm:$0xff] }
 0x1d1   : > { %v5818_v5 = vpop.permute.xlu1 %1236  ;;  %v5820_v42 = vpop.permute.xlu0 %1242 }
 0x1d2   : > { %9042 = vst [vmem:[#allocation123_spill] sm:$0xff] %v5818_v5  ;;  %9043 = vst [vmem:[#allocation124_spill] sm:$0xff] %v5820_v42  ;;  %v594_v42 = vld [vmem:[#allocation2 + $0x121] sm:$0xff] }
 0x1d3   : > { %1600 = vrot.lane.b32.xlu1 %v623_v40, %s4799_s27  ;;  %1474 = vrot.lane.b32.xlu0 %v592_v31, %s4798_s26  ;;  %v625_v40 = vld [vmem:[#allocation2 + $0x112] sm:$0xff] }
 0x1d5   : > { %v5824_v6 = vpop.permute.xlu1 %1240  ;;  %v5826_v34 = vpop.permute.xlu0 %1310 }
 0x1d6   : > { %9044 = vst [vmem:[#allocation125_spill] sm:$0xff] %v5824_v6 }
 0x1d7   : > { %1348 = vrot.lane.b32.xlu1 %v561_v51, %s4797_s5  ;;  %1602 = vrot.lane.b32.xlu0 %v624_v60, %s4799_s27  ;;  %v563_v51 = vld [vmem:[#allocation2 + $0x128] sm:$0xff] }
 0x1d9   : > { %v5830_v17 = vpop.permute.xlu1 %1244  ;;  %v5832_v5 = vpop.permute.xlu0 %1314 }
 0x1da   : > { %9045 = vst [vmem:[#allocation126_spill] sm:$0xff] %v5830_v17  ;;  %v626_v17 = vld [vmem:[#allocation2 + $0x122] sm:$0xff] }
 0x1db   : > { %1476 = vrot.lane.b32.xlu1 %v593_v10, %s4798_s26  ;;  %1350 = vrot.lane.b32.xlu0 %v562_v43, %s4797_s5  ;;  %v595_v10 = vld [vmem:[#allocation2 + $0x129] sm:$0xff] }
 0x1dd   : > { %v1313_v31 = vpop.permute.xlu1 %1312  ;;  %v5836_v6 = vpop.permute.xlu0 %1318 }
 0x1df   : > { %1604 = vrot.lane.b32.xlu1 %v625_v40, %s4799_s27  ;;  %1478 = vrot.lane.b32.xlu0 %v594_v42, %s4798_s26  ;;  %v627_v40 = vld [vmem:[#allocation2 + $0x12a] sm:$0xff] }
 0x1e1   : > { %v5840_v60 = vpop.permute.xlu1 %1316  ;;  %v5842_v27 = vpop.permute.xlu0 %1322 }
 0x1e3   : > { %1352 = vrot.lane.b32.xlu1 %v563_v51, %s4797_s5  ;;  %1606 = vrot.lane.b32.xlu0 %v626_v17, %s4799_s27  ;;  %v349_v51 = vld [vmem:[#allocation2] sm:$0xff]  ;;  %v350_v17 = vld [vmem:[#allocation2 + $0x8] sm:$0xff] }
 0x1e5   : > { %v5846_v43 = vpop.permute.xlu1 %1320  ;;  %v5848_v45 = vpop.permute.xlu0 %1326 }
 0x1e7   : > { %1480 = vrot.lane.b32.xlu1 %v595_v10, %s4798_s26  ;;  %1354 = vrot.lane.b32.xlu0 %v564_v7, %s4797_s5  ;;  %v628_v10 = vld [vmem:[#allocation2 + $0x13a] sm:$0xff]  ;;  %v1662_v7 = vsel %vm238_vm0, %v349_v51, %v9047_v4  ;;  %v566_v51 = vld [vmem:[#allocation2 + $0x150] sm:$0xff] }
 0x1e9   : > { %v5852_v42 = vpop.permute.xlu1 %1324  ;;  %v5854_v33 = vpop.permute.xlu0 %1330 }
 0x1ea   : > { %9046 = vst [vmem:[#allocation127_spill] sm:$0xff] %v5854_v33  ;;  %v9049_v33 = vld [vmem:[#allocation54_spill] sm:$0xff] }
 0x1eb   : > { %1608 = vrot.lane.b32.xlu1 %v627_v40, %s4799_s27  ;;  %1482 = vrot.lane.b32.xlu0 %v596_v2, %s4798_s26  ;;  %v1663_v40 = vsel %vm238_vm0, %v350_v17, %v9048_v49  ;;  %v1695_v30 = vsel %vm1694_vm3, %v1662_v7, %v9049_v33  ;;  %v9050_v7 = vld [vmem:[#allocation8_spill] sm:$0xff] }
 0x1ec   : > { %v1696_v2 = vsel %vm1694_vm3, %v1663_v40, %v5347_v39  ;;  %v1728_v56 = vsel %vm1727_vm4, %v1695_v30, %v5457_v52 }
 0x1ed   : > { %v5858_v19 = vpop.permute.xlu1 %1328  ;;  %v1441_v26 = vpop.permute.xlu0 %1440  ;;  %v1761_v49 = vsel %vm1760_vm5, %v1728_v56, %v5583_v22 }
 0x1ee   : > { %v1794_v39 = vsel %vm1793_vm6, %v1761_v49, %v5729_v44  ;;  %v9054_v49 = vld [vmem:[#allocation56_spill] sm:$0xff] }
 0x1ef   : > { %1356 = vrot.lane.b32.xlu1 %v565_v12, %s4797_s5  ;;  %1610 = vrot.lane.b32.xlu0 %v628_v10, %s4799_s27  ;;  %v1729_v12 = vsel %vm1727_vm4, %v1696_v2, %v5471_v55  ;;  %v1827_v52 = vsel %vm1826_vm7, %v1794_v39, %v5826_v34  ;;  %v629_v55 = vld [vmem:[#allocation2 + $0x142] sm:$0xff]  ;;  %v598_v10 = vld [vmem:[#allocation2 + $0x151] sm:$0xff] }
 0x1f0   : > { %v1762_v33 = vsel %vm1760_vm5, %v1729_v12, %v5597_v29 }
 0x1f1   : > { %v1439_v4 = vpop.permute.xlu1 %1438  ;;  %v1569_v17 = vpop.permute.xlu0 %1568  ;;  %v1795_v30 = vsel %vm1793_vm6, %v1762_v33, %v5739_v41  ;;  %v9051_v41 = vld [vmem:[#allocation14_spill] sm:$0xff] }
 0x1f2   : > { %v1828_v56 = vsel %vm1826_vm7, %v1795_v30, %v1313_v31  ;;  %v1860_v22 = vsel %vm1859_vm8, %v1827_v52, %v1439_v4  ;;  %v1664_v40 = vsel %vm238_vm0, %v9051_v41, %v9050_v7  ;;  %v9052_v31 = vld [vmem:[#allocation12_spill] sm:$0xff]  ;;  %v4741_v7 = vld [vmem:[#allocation2 + $0x30] sm:$0xff]  ;;  %v9055_v41 = vld [vmem:[#allocation10_spill] sm:$0xff] }
 0x1f3   : > { %1484 = vrot.lane.b32.xlu1 %v597_v14, %s4798_s26  ;;  %1358 = vrot.lane.b32.xlu0 %v566_v51, %s4797_s5  ;;  %v1861_v44 = vsel %vm1859_vm8, %v1828_v56, %v1441_v26  ;;  %v9053_v4 = vld [vmem:[#allocation20_spill] sm:$0xff]  ;;  %v1697_v26 = vsel %vm1694_vm3, %v1664_v40, %v9054_v49 }
 0x1f4   : > { %v1894_v34 = vsel %vm1892_vm9, %v1861_v44, %v1569_v17  ;;  %v1665_v12 = vsel %vm238_vm0, %v9053_v4, %v9052_v31  ;;  %v567_v51 = vld [vmem:[#allocation2 + $0x158] sm:$0xff]  ;;  %v1730_v39 = vsel %vm1727_vm4, %v1697_v26, %v5465_v54 }
 0x1f5   : > { %v1567_v29 = vpop.permute.xlu1 %1566  ;;  %v1445_v2 = vpop.permute.xlu0 %1444  ;;  %v1698_v33 = vsel %vm1694_vm3, %v1665_v12, %v5353_v58  ;;  %v1763_v52 = vsel %vm1760_vm5, %v1730_v39, %v5591_v18  ;;  %v631_v4 = vld [vmem:[#allocation2 + $0x15a] sm:$0xff]  ;;  %v600_v39 = vld [vmem:[#allocation2 + $0x169] sm:$0xff] }
 0x1f6   : > { %v1893_v14 = vsel %vm1892_vm9, %v1860_v22, %v1567_v29  ;;  %v1731_v30 = vsel %vm1727_vm4, %v1698_v33, %v5478_v57  ;;  %v1796_v22 = vsel %vm1793_vm6, %v1763_v52, %v5735_v32  ;;  %v599_v57 = vld [vmem:[#allocation2 + $0x159] sm:$0xff] }
 0x1f7   : > { %1612 = vrot.lane.b32.xlu1 %v629_v55, %s4799_s27  ;;  %4640 = vmatprep.mubr.msk.f32.mxu0 %vm1934_vm10, %v1893_v14  ;;  %v630_v55 = vld [vmem:[#allocation2 + $0x152] sm:$0xff]  ;;  %v1764_v56 = vsel %vm1760_vm5, %v1731_v30, %v5607_v23  ;;  %v1829_v29 = vsel %vm1826_vm7, %v1796_v22, %v5832_v5  ;;  %v4743_v22 = vld [vmem:[#allocation2 + $0x48] sm:$0xff] }
 0x1f8   : > { %4641 = vmatmul.mubr.msk.f32.vlgmr.msra.gmra.mrb[0].mxu0 %vm1934_vm10, %v1894_v34  ;;  %1486 = vrot.lane.b32.xlu0 %v598_v10, %s4798_s26  ;;  %v1797_v54 = vsel %vm1793_vm6, %v1764_v56, %v5745_v11  ;;  %v568_v10 = vld [vmem:[#allocation2 + $0x168] sm:$0xff]  ;;  %v1666_v11 = vsel %vm238_vm0, %v4741_v7, %v9055_v41  ;;  %v9056_v34 = vld [vmem:[#allocation16_spill] sm:$0xff]  ;;  %v570_v41 = vld [vmem:[#allocation2 + $0x180] sm:$0xff] }
 0x1f9   : > { %v1443_v17 = vpop.permute.xlu1 %1442  ;;  %v1573_v58 = vpop.permute.xlu0 %1572  ;;  %v1830_v18 = vsel %vm1826_vm7, %v1797_v54, %v5840_v60  ;;  %v4742_v60 = vld [vmem:[#allocation2 + $0x38] sm:$0xff]  ;;  %v632_v56 = vld [vmem:[#allocation2 + $0x16a] sm:$0xff] }
 0x1fa   : > { %v1862_v44 = vsel %vm1859_vm8, %v1829_v29, %v1443_v17  ;;  %v1863_v32 = vsel %vm1859_vm8, %v1830_v18, %v1445_v2  ;;  %v1667_v31 = vsel %vm238_vm0, %v4742_v60, %v9056_v34  ;;  %v1699_v2 = vsel %vm1694_vm3, %v1666_v11, %v5349_v62  ;;  %v9058_v29 = vld [vmem:[#allocation19_spill] sm:$0xff]  ;;  %v602_v34 = vld [vmem:[#allocation2 + $0x181] sm:$0xff] }
 0x1fb   : > { %1360 = vrot.lane.b32.xlu1 %v567_v51, %s4797_s5  ;;  %v1896_v5 = vsel %vm1892_vm9, %v1863_v32, %v1573_v58  ;;  %v1700_v12 = vsel %vm1694_vm3, %v1667_v31, %v5360_v35  ;;  %v1732_v49 = vsel %vm1727_vm4, %v1699_v2, %v5473_v50  ;;  %v9057_v58 = vld [vmem:[#allocation13_spill] sm:$0xff] }
 0x1fc   : > { %1614 = vrot.lane.b32.xlu0 %v630_v55, %s4799_s27  ;;  %v1733_v51 = vsel %vm1727_vm4, %v1700_v12, %v5486_v61  ;;  %v1765_v33 = vsel %vm1760_vm5, %v1732_v49, %v5601_v48  ;;  %v569_v61 = vld [vmem:[#allocation2 + $0x170] sm:$0xff]  ;;  %v4745_v31 = vld [vmem:[#allocation2 + $0x60] sm:$0xff] }
 0x1fd   : > { %v1571_v23 = vpop.permute.xlu1 %1570  ;;  %v1449_v40 = vpop.permute.xlu0 %1448  ;;  %v1766_v62 = vsel %vm1760_vm5, %v1733_v51, %v5623_v46  ;;  %v1798_v17 = vsel %vm1793_vm6, %v1765_v33, %v5741_v28  ;;  %v9059_v2 = vld [vmem:[#allocation17_spill] sm:$0xff]  ;;  %v9060_v12 = vld [vmem:[#allocation23_spill] sm:$0xff]  ;;  %v571_v51 = vld [vmem:[#allocation2 + $0x188] sm:$0xff] }
 0x1fe   : > { %v1895_v14 = vsel %vm1892_vm9, %v1862_v44, %v1571_v23  ;;  %v1799_v50 = vsel %vm1793_vm6, %v1766_v62, %v5751_v13  ;;  %v1831_v30 = vsel %vm1826_vm7, %v1798_v17, %v5836_v6  ;;  %v1668_v13 = vsel %vm238_vm0, %v4743_v22, %v9057_v58  ;;  %v601_v44 = vld [vmem:[#allocation2 + $0x171] sm:$0xff] }
 0x1ff   : > { %1488 = vrot.lane.b32.xlu1 %v599_v57, %s4798_s26  ;;  %4643 = vmatprep.mubr.msk.f32.mxu0 %vm1934_vm10, %v1895_v14  ;;  %v1832_v48 = vsel %vm1826_vm7, %v1799_v50, %v5846_v43  ;;  %v4744_v43 = vld [vmem:[#allocation2 + $0x50] sm:$0xff]  ;;  %v1701_v18 = vsel %vm1694_vm3, %v1668_v13, %v5355_v37 }
 0x200   : > { %4644 = vmatmul.mubr.msk.f32.gmra.mrb[2].mxu0 %vm1934_vm10, %v1896_v5  ;;  %1362 = vrot.lane.b32.xlu0 %v568_v10, %s4797_s5  ;;  %v1865_v28 = vsel %vm1859_vm8, %v1832_v48, %v1449_v40  ;;  %v1669_v57 = vsel %vm238_vm0, %v4744_v43, %v9058_v29  ;;  %v1734_v32 = vsel %vm1727_vm4, %v1701_v18, %v5480_v59  ;;  %v9061_v48 = vld [vmem:[#allocation21_spill] sm:$0xff]  ;;  %v9066_v18 = vld [vmem:[#allocation27_spill] sm:$0xff] }
 0x201   : > { %v1447_v26 = vpop.permute.xlu1 %1446  ;;  %v1577_v35 = vpop.permute.xlu0 %1576  ;;  %v1702_v23 = vsel %vm1694_vm3, %v1669_v57, %v5367_v36  ;;  %v1767_v7 = vsel %vm1760_vm5, %v1734_v32, %v5609_v24  ;;  %v604_v29 = vld [vmem:[#allocation2 + $0x199] sm:$0xff] }
 0x202   : > { %v1864_v52 = vsel %vm1859_vm8, %v1831_v30, %v1447_v26  ;;  %v1898_v6 = vsel %vm1892_vm9, %v1865_v28, %v1577_v35  ;;  %v1735_v10 = vsel %vm1727_vm4, %v1702_v23, %v5493_v63  ;;  %v1800_v11 = vsel %vm1793_vm6, %v1767_v7, %v5747_v9  ;;  %v633_v63 = vld [vmem:[#allocation2 + $0x172] sm:$0xff]  ;;  %v4748_v57 = vld [vmem:[#allocation2 + $0x80] sm:$0xff] }
 0x203   : > { %1616 = vrot.lane.b32.xlu1 %v631_v4, %s4799_s27  ;;  %v1768_v37 = vsel %vm1760_vm5, %v1735_v10, %v5637_v47  ;;  %v1833_v5 = vsel %vm1826_vm7, %v1800_v11, %v5842_v27  ;;  %v572_v28 = vld [vmem:[#allocation2 + $0x198] sm:$0xff]  ;;  %v9068_v10 = vld [vmem:[#allocation58_spill] sm:$0xff] }
 0x204   : > { %1490 = vrot.lane.b32.xlu0 %v600_v39, %s4798_s26  ;;  %v1801_v59 = vsel %vm1793_vm6, %v1768_v37, %v5758_v15  ;;  %v1670_v15 = vsel %vm238_vm0, %v4745_v31, %v9059_v2  ;;  %v573_v37 = vld [vmem:[#allocation2 + $0x1a0] sm:$0xff]  ;;  %v9069_v11 = vld [vmem:[#allocation80_spill] sm:$0xff]  ;;  %v4749_v31 = vld [vmem:[#allocation2 + $0x90] sm:$0xff] }
 0x205   : > { %v1575_v46 = vpop.permute.xlu1 %1574  ;;  %v1453_v54 = vpop.permute.xlu0 %1452  ;;  %v1834_v24 = vsel %vm1826_vm7, %v1801_v59, %v5852_v42  ;;  %v4746_v42 = vld [vmem:[#allocation2 + $0x68] sm:$0xff]  ;;  %v1703_v26 = vsel %vm1694_vm3, %v1670_v15, %v5362_v3  ;;  %v9072_v2 = vld [vmem:[#allocation25_spill] sm:$0xff] }
 0x206   : > { %v1897_v55 = vsel %vm1892_vm9, %v1864_v52, %v1575_v46  ;;  %v1867_v9 = vsel %vm1859_vm8, %v1834_v24, %v1453_v54  ;;  %v1671_v49 = vsel %vm238_vm0, %v4746_v42, %v9060_v12  ;;  %v1736_v39 = vsel %vm1727_vm4, %v1703_v26, %v5488_v53  ;;  %v9065_v54 = vld [vmem:[#allocation127_spill] sm:$0xff]  ;;  %v636_v24 = vld [vmem:[#allocation2 + $0x19a] sm:$0xff] }
 0x207   : > { %1364 = vrot.lane.b32.xlu1 %v569_v61, %s4797_s5  ;;  %4646 = vmatprep.mubr.msk.f32.mxu0 %vm1934_vm10, %v1897_v55  ;;  %v1704_v33 = vsel %vm1694_vm3, %v1671_v49, %v5375_v25  ;;  %v1769_v35 = vsel %vm1760_vm5, %v1736_v39, %v5625_v20  ;;  %v603_v61 = vld [vmem:[#allocation2 + $0x189] sm:$0xff]  ;;  %v1674_v15 = vsel %vm238_vm0, %v4749_v31, %v9072_v2  ;;  %v9073_v42 = vld [vmem:[#allocation57_spill] sm:$0xff] }
 0x208   : > { %4647 = vmatmul.mubr.msk.f32.gmra.mrb[4].mxu0 %vm1934_vm10, %v1898_v6  ;;  %1618 = vrot.lane.b32.xlu0 %v632_v56, %s4799_s27  ;;  %v1737_v17 = vsel %vm1727_vm4, %v1704_v33, %v5501_v1  ;;  %v1802_v50 = vsel %vm1793_vm6, %v1769_v35, %v5753_v38  ;;  %v4747_v1 = vld [vmem:[#allocation2 + $0x78] sm:$0xff]  ;;  %v9062_v55 = vld [vmem:[#allocation78_spill] sm:$0xff]  ;;  %v1707_v12 = vsel %vm1694_vm3, %v1674_v15, %v9073_v42  ;;  %v9074_v26 = vld [vmem:[#allocation79_spill] sm:$0xff] }
 0x209   : > { %v1451_v14 = vpop.permute.xlu1 %1450  ;;  %v1581_v36 = vpop.permute.xlu0 %1580  ;;  %v1770_v3 = vsel %vm1760_vm5, %v1737_v17, %v5651_v16  ;;  %v1835_v53 = vsel %vm1826_vm7, %v1802_v50, %v5848_v45  ;;  %v1672_v20 = vsel %vm238_vm0, %v4747_v1, %v9061_v48  ;;  %v9075_v39 = vld [vmem:[#allocation9_spill] sm:$0xff]  ;;  %v9076_v35 = vld [vmem:[#allocation106_spill] sm:$0xff]  ;;  %v9091_v2 = vld [vmem:[#allocation111_spill] sm:$0xff] }
 0x20a   : > { %v1866_v40 = vsel %vm1859_vm8, %v1833_v5, %v1451_v14  ;;  %v1900_v27 = vsel %vm1892_vm9, %v1867_v9, %v1581_v36  ;;  %v1803_v25 = vsel %vm1793_vm6, %v1770_v3, %v5764_v8  ;;  %v1705_v8 = vsel %vm1694_vm3, %v1672_v20, %v5369_v0  ;;  %v9064_v0 = vld [vmem:[#allocation43_spill] sm:$0xff]  ;;  %v9067_v14 = vld [vmem:[#allocation5_spill] sm:$0xff]  ;;  %v9078_v20 = vld [vmem:[#allocation60_spill] sm:$0xff] }
 0x20b   : > { %1492 = vrot.lane.b32.xlu1 %v601_v44, %s4798_s26  ;;  %v1836_v16 = vsel %vm1826_vm7, %v1803_v25, %v5858_v19  ;;  %v1738_v56 = vsel %vm1727_vm4, %v1705_v8, %v9062_v55  ;;  %v1673_v44 = vsel %vm238_vm0, %v4748_v57, %v9066_v18  ;;  %v9070_v5 = vld [vmem:[#allocation11_spill] sm:$0xff]  ;;  %v637_v17 = vld [vmem:[#allocation2 + $0x1a2] sm:$0xff]  ;;  %v4750_v25 = vld [vmem:[#allocation2 + $0x98] sm:$0xff] }
 0x20c   : > { %1366 = vrot.lane.b32.xlu0 %v570_v41, %s4797_s5  ;;  %v1706_v7 = vsel %vm1694_vm3, %v1673_v44, %v9068_v10  ;;  %v9081_v55 = vld [vmem:[#allocation109_spill] sm:$0xff] }
 0x20d   : > { %v1579_v47 = vpop.permute.xlu1 %1578  ;;  %v1457_v4 = vpop.permute.xlu0 %1456  ;;  %v1739_v36 = vsel %vm1727_vm4, %v1706_v7, %v9069_v11  ;;  %v9084_v57 = vld [vmem:[#allocation81_spill] sm:$0xff]  ;;  %v9087_v11 = vld [vmem:[#allocation35_spill] sm:$0xff] }
 0x20e   : > { %v1899_v60 = vsel %vm1892_vm9, %v1866_v40, %v1579_v47  ;;  %v1869_v46 = vsel %vm1859_vm8, %v1836_v16, %v1457_v4  ;;  %v9071_v40 = vld [vmem:[#allocation107_spill] sm:$0xff]  ;;  %v4753_v42 = vld [vmem:[#allocation2 + $0xc0] sm:$0xff] }
 0x20f   : > { %1620 = vrot.lane.b32.xlu1 %v633_v63, %s4799_s27  ;;  %4649 = vmatprep.mubr.msk.f32.mxu0 %vm1934_vm10, %v1899_v60  ;;  %v1772_v63 = vsel %vm1760_vm5, %v1739_v36, %v9070_v5 }
 0x210   : > { %4650 = vmatmul.mubr.msk.f32.gmra.mrb[6].mxu0 %vm1934_vm10, %v1900_v27  ;;  %1494 = vrot.lane.b32.xlu0 %v602_v34, %s4798_s26  ;;  %v1805_v47 = vsel %vm1793_vm6, %v1772_v63, %v9071_v40  ;;  %v605_v34 = vld [vmem:[#allocation2 + $0x1a1] sm:$0xff] }
 0x211   : > { %v1455_v62 = vpop.permute.xlu1 %1454  ;;  %v1585_v30 = vpop.permute.xlu0 %1584  ;;  %v9088_v63 = vld [vmem:[#allocation62_spill] sm:$0xff] }
 0x212   : > { %v1868_v52 = vsel %vm1859_vm8, %v1835_v53, %v1455_v62  ;;  %v1902_v22 = vsel %vm1892_vm9, %v1869_v46, %v1585_v30  ;;  %v9077_v53 = vld [vmem:[#allocation31_spill] sm:$0xff] }
 0x213   : > { %1368 = vrot.lane.b32.xlu1 %v571_v51, %s4797_s5  ;;  %v1740_v51 = vsel %vm1727_vm4, %v1707_v12, %v9074_v26  ;;  %v9092_v12 = vld [vmem:[#allocation33_spill] sm:$0xff] }
 0x214   : > { %1622 = vrot.lane.b32.xlu0 %v5599_v21, %s4799_s27  ;;  %v9063_v21 = vld [vmem:[#allocation7_spill] sm:$0xff]  ;;  %v1773_v62 = vsel %vm1760_vm5, %v1740_v51, %v9075_v39 }
 0x215   : > { %v1583_v38 = vpop.permute.xlu1 %1582  ;;  %v1459_v19 = vpop.permute.xlu0 %1458  ;;  %v1771_v58 = vsel %vm1760_vm5, %v1738_v56, %v9063_v21  ;;  %v1806_v3 = vsel %vm1793_vm6, %v1773_v62, %v9076_v35  ;;  %v4751_v21 = vld [vmem:[#allocation2 + $0xa8] sm:$0xff] }
 0x216   : > { %v1901_v45 = vsel %vm1892_vm9, %v1868_v52, %v1583_v38  ;;  %v1804_v13 = vsel %vm1793_vm6, %v1771_v58, %v9064_v0  ;;  %v9079_v38 = vld [vmem:[#allocation82_spill] sm:$0xff]  ;;  %v9082_v58 = vld [vmem:[#allocation29_spill] sm:$0xff] }
 0x217   : > { %1496 = vrot.lane.b32.xlu1 %v603_v61, %s4798_s26  ;;  %4652 = vmatprep.mubr.msk.f32.mxu0 %vm1934_vm10, %v1901_v45  ;;  %v1837_v43 = vsel %vm1826_vm7, %v1804_v13, %v9065_v54  ;;  %v1675_v61 = vsel %vm238_vm0, %v4750_v25, %v9077_v53  ;;  %v9080_v45 = vld [vmem:[#allocation18_spill] sm:$0xff]  ;;  %v1676_v0 = vsel %vm238_vm0, %v4751_v21, %v9082_v58  ;;  %v9083_v54 = vld [vmem:[#allocation59_spill] sm:$0xff]  ;;  %v9101_v21 = vld [vmem:[#allocation113_spill] sm:$0xff] }
 0x218   : > { %4653 = vmatmul.mubr.msk.f32.gmra.mrb[8].mxu0 %vm1934_vm10, %v1902_v22  ;;  %1370 = vrot.lane.b32.xlu0 %v572_v28, %s4797_s5  ;;  %v1870_v23 = vsel %vm1859_vm8, %v1837_v43, %v1459_v19  ;;  %v1708_v16 = vsel %vm1694_vm3, %v1675_v61, %v9078_v20  ;;  %v1709_v43 = vsel %vm1694_vm3, %v1676_v0, %v9083_v54  ;;  %v9096_v25 = vld [vmem:[#allocation110_spill] sm:$0xff]  ;;  %v9097_v20 = vld [vmem:[#allocation39_spill] sm:$0xff]  ;;  %v9102_v54 = vld [vmem:[#allocation37_spill] sm:$0xff] }
 0x219   : > { %v1333_v6 = vpop.permute.xlu1 %1332  ;;  %v1587_v32 = vpop.permute.xlu0 %1586  ;;  %v1741_v8 = vsel %vm1727_vm4, %v1708_v16, %v9079_v38  ;;  %v1742_v18 = vsel %vm1727_vm4, %v1709_v43, %v9084_v57 }
 0x21a   : > { %v1903_v41 = vsel %vm1892_vm9, %v1870_v23, %v1587_v32  ;;  %v1838_v60 = vsel %vm1826_vm7, %v1805_v47, %v1333_v6  ;;  %v1774_v28 = vsel %vm1760_vm5, %v1741_v8, %v9080_v45  ;;  %v9085_v23 = vld [vmem:[#allocation15_spill] sm:$0xff]  ;;  %v9089_v47 = vld [vmem:[#allocation84_spill] sm:$0xff] }
 0x21b   : > { %1624 = vrot.lane.b32.xlu1 %v9067_v14, %s4799_s27  ;;  %4655 = vmatprep.mubr.msk.f32.mxu0 %vm1934_vm10, %v1903_v41  ;;  %v1807_v56 = vsel %vm1793_vm6, %v1774_v28, %v9081_v55  ;;  %v1775_v32 = vsel %vm1760_vm5, %v1742_v18, %v9085_v23  ;;  %v9086_v14 = vld [vmem:[#allocation108_spill] sm:$0xff]  ;;  %v9099_v28 = vld [vmem:[#allocation86_spill] sm:$0xff]  ;;  %v9103_v18 = vld [vmem:[#allocation63_spill] sm:$0xff] }
 0x21c   : > { %1498 = vrot.lane.b32.xlu0 %v604_v29, %s4798_s26  ;;  %v1808_v10 = vsel %vm1793_vm6, %v1775_v32, %v9086_v14  ;;  %v9098_v8 = vld [vmem:[#allocation64_spill] sm:$0xff]  ;;  %v9104_v32 = vld [vmem:[#allocation85_spill] sm:$0xff] }
 0x21d   : > { %v1461_v59 = vpop.permute.xlu1 %1460  ;;  %v1335_v9 = vpop.permute.xlu0 %1334 }
 0x21e   : > { %v1871_v27 = vsel %vm1859_vm8, %v1838_v60, %v1461_v59  ;;  %v1839_v30 = vsel %vm1826_vm7, %v1806_v3, %v1335_v9 }
 0x21f   : > { %1372 = vrot.lane.b32.xlu1 %v573_v37, %s4797_s5  ;;  %v4752_v37 = vld [vmem:[#allocation2 + $0xb0] sm:$0xff]  ;;  %s6484_s5 = scalar_lea.vmem %s8846_s2, %s4578_s28 }
 0x220   : > { %1626 = vrot.lane.b32.xlu0 %v636_v24, %s4799_s27  ;;  %v1677_v36 = vsel %vm238_vm0, %v4752_v37, %v9087_v11  ;;  %v9106_v37 = vld [vmem:[#allocation112_spill] sm:$0xff] }
 0x221   : > { %v1589_v4 = vpop.permute.xlu1 %1588  ;;  %v1463_v33 = vpop.permute.xlu0 %1462  ;;  %v1710_v24 = vsel %vm1694_vm3, %v1677_v36, %v9088_v63  ;;  %v9107_v63 = vld [vmem:[#allocation42_spill] sm:$0xff] }
 0x222   : > { %v1904_v49 = vsel %vm1892_vm9, %v1871_v27, %v1589_v4  ;;  %v1872_v1 = vsel %vm1859_vm8, %v1839_v30, %v1463_v33  ;;  %v1743_v9 = vsel %vm1727_vm4, %v1710_v24, %v9089_v47  ;;  %v9093_v33 = vld [vmem:[#allocation61_spill] sm:$0xff] }
 0x223   : > { %1500 = vrot.lane.b32.xlu1 %v605_v34, %s4798_s26  ;;  %4656 = vmatmul.mubr.msk.f32.gmra.mrb[10].mxu0 %vm1934_vm10, %v1904_v49  ;;  %v9090_v34 = vld [vmem:[#allocation24_spill] sm:$0xff]  ;;  %v1678_v49 = vsel %vm238_vm0, %v4753_v42, %v9092_v12  ;;  %v9111_v42 = vld [vmem:[#allocation115_spill] sm:$0xff] }
 0x224   : > { %v1776_v31 = vsel %vm1760_vm5, %v1743_v9, %v9090_v34  ;;  %v1711_v39 = vsel %vm1694_vm3, %v1678_v49, %v9093_v33  ;;  %v9108_v9 = vld [vmem:[#allocation66_spill] sm:$0xff]  ;;  %v9112_v33 = vld [vmem:[#allocation41_spill] sm:$0xff] }
 0x225   : > { %v1337_v50 = vpop.permute.xlu1 %1336  ;;  %v1591_v48 = vpop.permute.xlu0 %1590  ;;  %v1809_v15 = vsel %vm1793_vm6, %v1776_v31, %v9091_v2  ;;  %v9109_v31 = vld [vmem:[#allocation88_spill] sm:$0xff] }
 0x226   : > { %v1905_v52 = vsel %vm1892_vm9, %v1872_v1, %v1591_v48  ;;  %v1840_v19 = vsel %vm1826_vm7, %v1807_v56, %v1337_v50  ;;  %v9095_v50 = vld [vmem:[#allocation22_spill] sm:$0xff] }
 0x227   : > { %1628 = vrot.lane.b32.xlu1 %v637_v17, %s4799_s27  ;;  %4658 = vmatprep.mubr.msk.f32.mxu0 %vm1934_vm10, %v1905_v52  ;;  %v9094_v17 = vld [vmem:[#allocation83_spill] sm:$0xff]  ;;  %v4754_v48 = vld [vmem:[#allocation2 + $0xc8] sm:$0xff] }
 0x228   : > { %v1744_v35 = vsel %vm1727_vm4, %v1711_v39, %v9094_v17  ;;  %v1679_v16 = vsel %vm238_vm0, %v4754_v48, %v9097_v20  ;;  %v9116_v48 = vld [vmem:[#allocation114_spill] sm:$0xff] }
 0x229   : > { %v1465_v46 = vpop.permute.xlu1 %1464  ;;  %v1339_v22 = vpop.permute.xlu0 %1338  ;;  %v1777_v30 = vsel %vm1760_vm5, %v1744_v35, %v9095_v50  ;;  %v9113_v35 = vld [vmem:[#allocation65_spill] sm:$0xff] }
 0x22a   : > { %v1873_v13 = vsel %vm1859_vm8, %v1840_v19, %v1465_v46  ;;  %v1841_v41 = vsel %vm1826_vm7, %v1808_v10, %v1339_v22  ;;  %v1810_v53 = vsel %vm1793_vm6, %v1777_v30, %v9096_v25  ;;  %v1712_v46 = vsel %vm1694_vm3, %v1679_v16, %v9098_v8  ;;  %v9100_v22 = vld [vmem:[#allocation28_spill] sm:$0xff]  ;;  %v9114_v30 = vld [vmem:[#allocation87_spill] sm:$0xff]  ;;  %v9117_v8 = vld [vmem:[#allocation45_spill] sm:$0xff] }
 0x22b   : > { %v1745_v55 = vsel %vm1727_vm4, %v1712_v46, %v9099_v28 }
 0x22c   : > { %v1778_v19 = vsel %vm1760_vm5, %v1745_v55, %v9100_v22  ;;  %v9118_v55 = vld [vmem:[#allocation68_spill] sm:$0xff] }
 0x22d   : > { %v1593_v6 = vpop.permute.xlu1 %1592  ;;  %v1467_v44 = vpop.permute.xlu0 %1466  ;;  %v1811_v58 = vsel %vm1793_vm6, %v1778_v19, %v9101_v21  ;;  %v9119_v19 = vld [vmem:[#allocation90_spill] sm:$0xff] }
 0x22e   : > { %v1906_v29 = vsel %vm1892_vm9, %v1873_v13, %v1593_v6  ;;  %v1874_v59 = vsel %vm1859_vm8, %v1841_v41, %v1467_v44  ;;  %v4755_v6 = vld [vmem:[#allocation2 + $0xd8] sm:$0xff] }
 0x22f   : > { %4659 = vmatmul.mubr.msk.f32.gmra.mrb[12].mxu0 %vm1934_vm10, %v1906_v29  ;;  %v1680_v43 = vsel %vm238_vm0, %v4755_v6, %v9102_v54  ;;  %v9121_v6 = vld [vmem:[#allocation117_spill] sm:$0xff] }
 0x230   : > { %v1713_v44 = vsel %vm1694_vm3, %v1680_v43, %v9103_v18  ;;  %v9122_v18 = vld [vmem:[#allocation44_spill] sm:$0xff] }
 0x231   : > { %v1341_v7 = vpop.permute.xlu1 %1340  ;;  %v1595_v5 = vpop.permute.xlu0 %1594  ;;  %v1746_v14 = vsel %vm1727_vm4, %v1713_v44, %v9104_v32 }
 0x232   : > { %v1907_v40 = vsel %vm1892_vm9, %v1874_v59, %v1595_v5  ;;  %v1842_v4 = vsel %vm1826_vm7, %v1809_v15, %v1341_v7  ;;  %v9105_v7 = vld [vmem:[#allocation26_spill] sm:$0xff]  ;;  %v4756_v5 = vld [vmem:[#allocation2 + $0xe0] sm:$0xff] }
 0x233   : > { %4661 = vmatprep.mubr.msk.f32.mxu0 %vm1934_vm10, %v1907_v40  ;;  %v1779_v41 = vsel %vm1760_vm5, %v1746_v14, %v9105_v7  ;;  %v1681_v24 = vsel %vm238_vm0, %v4756_v5, %v9107_v63  ;;  %v9123_v14 = vld [vmem:[#allocation67_spill] sm:$0xff]  ;;  %v9126_v5 = vld [vmem:[#allocation116_spill] sm:$0xff] }
 0x234   : > { %v1812_v11 = vsel %vm1793_vm6, %v1779_v41, %v9106_v37  ;;  %v9124_v41 = vld [vmem:[#allocation89_spill] sm:$0xff] }
 0x235   : > { %v1469_v60 = vpop.permute.xlu1 %1468  ;;  %v1343_v27 = vpop.permute.xlu0 %1342 }
 0x236   : > { %v1875_v26 = vsel %vm1859_vm8, %v1842_v4, %v1469_v60  ;;  %v1843_v1 = vsel %vm1826_vm7, %v1810_v53, %v1343_v27  ;;  %v1714_v60 = vsel %vm1694_vm3, %v1681_v24, %v9108_v9  ;;  %v9110_v27 = vld [vmem:[#allocation32_spill] sm:$0xff]  ;;  %v9127_v9 = vld [vmem:[#allocation47_spill] sm:$0xff] }
 0x237   : > { %v1747_v2 = vsel %vm1727_vm4, %v1714_v60, %v9109_v31 }
 0x238   : > { %v1780_v4 = vsel %vm1760_vm5, %v1747_v2, %v9110_v27  ;;  %v9128_v2 = vld [vmem:[#allocation70_spill] sm:$0xff] }
 0x239   : > { %v1597_v51 = vpop.permute.xlu1 %1596  ;;  %v1471_v3 = vpop.permute.xlu0 %1470  ;;  %v1813_v12 = vsel %vm1793_vm6, %v1780_v4, %v9111_v42  ;;  %v9129_v4 = vld [vmem:[#allocation92_spill] sm:$0xff] }
 0x23a   : > { %v1908_v62 = vsel %vm1892_vm9, %v1875_v26, %v1597_v51  ;;  %v1876_v52 = vsel %vm1859_vm8, %v1843_v1, %v1471_v3  ;;  %v4757_v51 = vld [vmem:[#allocation2 + $0xf0] sm:$0xff] }
 0x23b   : > { %4662 = vmatmul.mubr.msk.f32.gmra.mrb[14].mxu0 %vm1934_vm10, %v1908_v62  ;;  %v1682_v39 = vsel %vm238_vm0, %v4757_v51, %v9112_v33  ;;  %v9131_v51 = vld [vmem:[#allocation119_spill] sm:$0xff] }
 0x23c   : > { %v1715_v3 = vsel %vm1694_vm3, %v1682_v39, %v9113_v35  ;;  %v9132_v35 = vld [vmem:[#allocation46_spill] sm:$0xff] }
 0x23d   : > { %v1345_v61 = vpop.permute.xlu1 %1344  ;;  %v1599_v38 = vpop.permute.xlu0 %1598  ;;  %v1748_v25 = vsel %vm1727_vm4, %v1715_v3, %v9114_v30 }
 0x23e   : > { %v1909_v45 = vsel %vm1892_vm9, %v1876_v52, %v1599_v38  ;;  %v1844_v13 = vsel %vm1826_vm7, %v1811_v58, %v1345_v61  ;;  %v9115_v61 = vld [vmem:[#allocation30_spill] sm:$0xff]  ;;  %v4758_v38 = vld [vmem:[#allocation2 + $0xf8] sm:$0xff] }
 0x23f   : > { %4664 = vmatprep.mubr.msk.f32.mxu1 %vm1934_vm10, %v1909_v45  ;;  %v1781_v1 = vsel %vm1760_vm5, %v1748_v25, %v9115_v61  ;;  %v1683_v46 = vsel %vm238_vm0, %v4758_v38, %v9117_v8  ;;  %v9133_v25 = vld [vmem:[#allocation69_spill] sm:$0xff]  ;;  %v9136_v38 = vld [vmem:[#allocation118_spill] sm:$0xff] }
 0x240   : > { %v1814_v20 = vsel %vm1793_vm6, %v1781_v1, %v9116_v48  ;;  %v9134_v1 = vld [vmem:[#allocation91_spill] sm:$0xff] }
 0x241   : > { %v1473_v56 = vpop.permute.xlu1 %1472  ;;  %v1347_v0 = vpop.permute.xlu0 %1346 }
 0x242   : > { %v1877_v29 = vsel %vm1859_vm8, %v1844_v13, %v1473_v56  ;;  %v1845_v59 = vsel %vm1826_vm7, %v1812_v11, %v1347_v0  ;;  %v1716_v56 = vsel %vm1694_vm3, %v1683_v46, %v9118_v55  ;;  %v9120_v0 = vld [vmem:[#allocation36_spill] sm:$0xff]  ;;  %v9137_v55 = vld [vmem:[#allocation49_spill] sm:$0xff] }
 0x243   : > { %v1749_v21 = vsel %vm1727_vm4, %v1716_v56, %v9119_v19 }
 0x244   : > { %v1782_v13 = vsel %vm1760_vm5, %v1749_v21, %v9120_v0  ;;  %v9138_v21 = vld [vmem:[#allocation72_spill] sm:$0xff] }
 0x245   : > { %v1601_v57 = vpop.permute.xlu1 %1600  ;;  %v1475_v10 = vpop.permute.xlu0 %1474  ;;  %v1815_v54 = vsel %vm1793_vm6, %v1782_v13, %v9121_v6  ;;  %v9139_v13 = vld [vmem:[#allocation94_spill] sm:$0xff] }
 0x246   : > { %v1910_v23 = vsel %vm1892_vm9, %v1877_v29, %v1601_v57  ;;  %v1878_v40 = vsel %vm1859_vm8, %v1845_v59, %v1475_v10  ;;  %v4759_v57 = vld [vmem:[#allocation2 + $0x108] sm:$0xff] }
 0x247   : > { %4665 = vmatmul.mubr.msk.f32.vlgmr.msra.gmra.mrb[0].mxu1 %vm1934_vm10, %v1910_v23  ;;  %v1684_v44 = vsel %vm238_vm0, %v4759_v57, %v9122_v18  ;;  %v9141_v57 = vld [vmem:[#allocation121_spill] sm:$0xff] }
 0x248   : > { %v1717_v10 = vsel %vm1694_vm3, %v1684_v44, %v9123_v14  ;;  %v9142_v14 = vld [vmem:[#allocation48_spill] sm:$0xff] }
 0x249   : > { %v1349_v36 = vpop.permute.xlu1 %1348  ;;  %v1603_v47 = vpop.permute.xlu0 %1602  ;;  %v1750_v37 = vsel %vm1727_vm4, %v1717_v10, %v9124_v41 }
 0x24a   : > { %v1911_v34 = vsel %vm1892_vm9, %v1878_v40, %v1603_v47  ;;  %v1846_v26 = vsel %vm1826_vm7, %v1813_v12, %v1349_v36  ;;  %v9125_v36 = vld [vmem:[#allocation34_spill] sm:$0xff]  ;;  %v4760_v47 = vld [vmem:[#allocation2 + $0x110] sm:$0xff] }
 0x24b   : > { %4667 = vmatprep.mubr.msk.f32.mxu1 %vm1934_vm10, %v1911_v34  ;;  %v1783_v59 = vsel %vm1760_vm5, %v1750_v37, %v9125_v36  ;;  %v1685_v60 = vsel %vm238_vm0, %v4760_v47, %v9127_v9  ;;  %v9143_v37 = vld [vmem:[#allocation71_spill] sm:$0xff]  ;;  %v9146_v47 = vld [vmem:[#allocation120_spill] sm:$0xff] }
 0x24c   : > { %v1816_v63 = vsel %vm1793_vm6, %v1783_v59, %v9126_v5  ;;  %v9144_v59 = vld [vmem:[#allocation93_spill] sm:$0xff] }
 0x24d   : > { %v1477_v15 = vpop.permute.xlu1 %1476  ;;  %v1351_v49 = vpop.permute.xlu0 %1350 }
 0x24e   : > { %v1879_v62 = vsel %vm1859_vm8, %v1846_v26, %v1477_v15  ;;  %v1847_v52 = vsel %vm1826_vm7, %v1814_v20, %v1351_v49  ;;  %v1718_v15 = vsel %vm1694_vm3, %v1685_v60, %v9128_v2  ;;  %v9130_v49 = vld [vmem:[#allocation40_spill] sm:$0xff]  ;;  %v9147_v2 = vld [vmem:[#allocation51_spill] sm:$0xff] }
 0x24f   : > { %v1751_v42 = vsel %vm1727_vm4, %v1718_v15, %v9129_v4 }
 0x250   : > { %v1784_v26 = vsel %vm1760_vm5, %v1751_v42, %v9130_v49  ;;  %v9148_v42 = vld [vmem:[#allocation74_spill] sm:$0xff] }
 0x251   : > { %v1605_v17 = vpop.permute.xlu1 %1604  ;;  %v1479_v53 = vpop.permute.xlu0 %1478  ;;  %v1817_v33 = vsel %vm1793_vm6, %v1784_v26, %v9131_v51  ;;  %v9149_v26 = vld [vmem:[#allocation96_spill] sm:$0xff] }
 0x252   : > { %v1912_v50 = vsel %vm1892_vm9, %v1879_v62, %v1605_v17  ;;  %v1880_v45 = vsel %vm1859_vm8, %v1847_v52, %v1479_v53  ;;  %v4761_v17 = vld [vmem:[#allocation2 + $0x120] sm:$0xff] }
 0x253   : > { %4668 = vmatmul.mubr.msk.f32.gmra.mrb[2].mxu1 %vm1934_vm10, %v1912_v50  ;;  %v1686_v3 = vsel %vm238_vm0, %v4761_v17, %v9132_v35  ;;  %v9151_v17 = vld [vmem:[#allocation123_spill] sm:$0xff] }
 0x254   : > { %v1719_v53 = vsel %vm1694_vm3, %v1686_v3, %v9133_v25  ;;  %v9152_v25 = vld [vmem:[#allocation50_spill] sm:$0xff] }
 0x255   : > { %v1353_v16 = vpop.permute.xlu1 %1352  ;;  %v1607_v28 = vpop.permute.xlu0 %1606  ;;  %v1752_v48 = vsel %vm1727_vm4, %v1719_v53, %v9134_v1 }
 0x256   : > { %v1913_v22 = vsel %vm1892_vm9, %v1880_v45, %v1607_v28  ;;  %v1848_v29 = vsel %vm1826_vm7, %v1815_v54, %v1353_v16  ;;  %v9135_v16 = vld [vmem:[#allocation38_spill] sm:$0xff] }
 0x257   : > { %4670 = vmatprep.mubr.msk.f32.mxu1 %vm1934_vm10, %v1913_v22  ;;  %v1785_v52 = vsel %vm1760_vm5, %v1752_v48, %v9135_v16  ;;  %v4762_v28 = vld [vmem:[#allocation2 + $0x128] sm:$0xff]  ;;  %v9153_v48 = vld [vmem:[#allocation73_spill] sm:$0xff] }
 0x258   : > { %v1818_v8 = vsel %vm1793_vm6, %v1785_v52, %v9136_v38  ;;  %v1687_v56 = vsel %vm238_vm0, %v4762_v28, %v9137_v55  ;;  %v9154_v52 = vld [vmem:[#allocation95_spill] sm:$0xff]  ;;  %v9156_v28 = vld [vmem:[#allocation122_spill] sm:$0xff] }
 0x259   : > { %v1481_v58 = vpop.permute.xlu1 %1480  ;;  %v1355_v43 = vpop.permute.xlu0 %1354 }
 0x25a   : > { %v1881_v23 = vsel %vm1859_vm8, %v1848_v29, %v1481_v58  ;;  %v1849_v40 = vsel %vm1826_vm7, %v1816_v63, %v1355_v43  ;;  %v1720_v58 = vsel %vm1694_vm3, %v1687_v56, %v9138_v21  ;;  %v9140_v43 = vld [vmem:[#allocation100_spill] sm:$0xff]  ;;  %v9157_v21 = vld [vmem:[#allocation53_spill] sm:$0xff] }
 0x25b   : > { %v1753_v6 = vsel %vm1727_vm4, %v1720_v58, %v9139_v13 }
 0x25c   : > { %v1786_v29 = vsel %vm1760_vm5, %v1753_v6, %v9140_v43  ;;  %v9158_v6 = vld [vmem:[#allocation76_spill] sm:$0xff] }
 0x25d   : > { %v1609_v32 = vpop.permute.xlu1 %1608  ;;  %v1483_v11 = vpop.permute.xlu0 %1482  ;;  %v1819_v18 = vsel %vm1793_vm6, %v1786_v29, %v9141_v57  ;;  %v9159_v29 = vld [vmem:[#allocation98_spill] sm:$0xff] }
 0x25e   : > { %v1914_v7 = vsel %vm1892_vm9, %v1881_v23, %v1609_v32  ;;  %v1882_v34 = vsel %vm1859_vm8, %v1849_v40, %v1483_v11  ;;  %v4763_v32 = vld [vmem:[#allocation2 + $0x138] sm:$0xff] }
 0x25f   : > { %4671 = vmatmul.mubr.msk.f32.gmra.mrb[4].mxu1 %vm1934_vm10, %v1914_v7  ;;  %v1688_v10 = vsel %vm238_vm0, %v4763_v32, %v9142_v14  ;;  %v9161_v32 = vld [vmem:[#allocation125_spill] sm:$0xff] }
 0x260   : > { %v1721_v11 = vsel %vm1694_vm3, %v1688_v10, %v9143_v37  ;;  %v9162_v37 = vld [vmem:[#allocation52_spill] sm:$0xff] }
 0x261   : > { %v1357_v24 = vpop.permute.xlu1 %1356  ;;  %v1611_v31 = vpop.permute.xlu0 %1610  ;;  %v1754_v5 = vsel %vm1727_vm4, %v1721_v11, %v9144_v59 }
 0x262   : > { %v1915_v27 = vsel %vm1892_vm9, %v1882_v34, %v1611_v31  ;;  %v1850_v62 = vsel %vm1826_vm7, %v1817_v33, %v1357_v24  ;;  %v9145_v24 = vld [vmem:[#allocation99_spill] sm:$0xff]  ;;  %v4764_v31 = vld [vmem:[#allocation2 + $0x140] sm:$0xff] }
 0x263   : > { %4673 = vmatprep.mubr.msk.f32.mxu1 %vm1934_vm10, %v1915_v27  ;;  %v1787_v40 = vsel %vm1760_vm5, %v1754_v5, %v9145_v24  ;;  %v1689_v15 = vsel %vm238_vm0, %v4764_v31, %v9147_v2  ;;  %v9163_v5 = vld [vmem:[#allocation75_spill] sm:$0xff]  ;;  %v9166_v31 = vld [vmem:[#allocation124_spill] sm:$0xff] }
 0x264   : > { %v1820_v9 = vsel %vm1793_vm6, %v1787_v40, %v9146_v47  ;;  %v9164_v40 = vld [vmem:[#allocation97_spill] sm:$0xff] }
 0x265   : > { %v1485_v12 = vpop.permute.xlu1 %1484  ;;  %v1359_v39 = vpop.permute.xlu0 %1358 }
 0x266   : > { %v1883_v50 = vsel %vm1859_vm8, %v1850_v62, %v1485_v12  ;;  %v1851_v45 = vsel %vm1826_vm7, %v1818_v8, %v1359_v39  ;;  %v1722_v12 = vsel %vm1694_vm3, %v1689_v15, %v9148_v42  ;;  %v9150_v39 = vld [vmem:[#allocation102_spill] sm:$0xff]  ;;  %v9167_v42 = vld [vmem:[#allocation55_spill] sm:$0xff] }
 0x267   : > { %v1755_v51 = vsel %vm1727_vm4, %v1722_v12, %v9149_v26 }
 0x268   : > { %v1788_v62 = vsel %vm1760_vm5, %v1755_v51, %v9150_v39  ;;  %v9168_v51 = vld [vmem:[#allocation77_spill] sm:$0xff] }
 0x269   : > { %v1613_v30 = vpop.permute.xlu1 %1612  ;;  %v1821_v35 = vsel %vm1793_vm6, %v1788_v62, %v9151_v17  ;;  %v9169_v62 = vld [vmem:[#allocation4_spill] sm:$0xff] }
 0x26a   : > { %v1916_v61 = vsel %vm1892_vm9, %v1883_v50, %v1613_v30  ;;  %v1487_v20 = vpop.permute.xlu0 %1486  ;;  %v4765_v30 = vld [vmem:[#allocation2 + $0x150] sm:$0xff] }
 0x26b   : > { %4674 = vmatmul.mubr.msk.f32.gmra.mrb[6].mxu1 %vm1934_vm10, %v1916_v61  ;;  %v1884_v22 = vsel %vm1859_vm8, %v1851_v45, %v1487_v20  ;;  %v1690_v53 = vsel %vm238_vm0, %v4765_v30, %v9152_v25  ;;  %v9171_v30 = vld [vmem:[#allocation126_spill] sm:$0xff] }
 0x26c   : > { %v1723_v20 = vsel %vm1694_vm3, %v1690_v53, %v9153_v48 }
 0x26d   : > { %v1361_v46 = vpop.permute.xlu1 %1360  ;;  %v1756_v38 = vsel %vm1727_vm4, %v1723_v20, %v9154_v52 }
 0x26e   : > { %v1615_v19 = vpop.permute.xlu0 %1614  ;;  %v1852_v23 = vsel %vm1826_vm7, %v1819_v18, %v1361_v46  ;;  %v9155_v46 = vld [vmem:[#allocation101_spill] sm:$0xff] }
 0x26f   : > { %v1917_v0 = vsel %vm1892_vm9, %v1884_v22, %v1615_v19  ;;  %v1789_v45 = vsel %vm1760_vm5, %v1756_v38, %v9155_v46  ;;  %v4766_v19 = vld [vmem:[#allocation2 + $0x158] sm:$0xff] }
 0x270   : > { %4676 = vmatprep.mubr.msk.f32.mxu1 %vm1934_vm10, %v1917_v0  ;;  %v1822_v55 = vsel %vm1793_vm6, %v1789_v45, %v9156_v28  ;;  %v1691_v58 = vsel %vm238_vm0, %v4766_v19, %v9157_v21 }
 0x271   : > { %v1489_v54 = vpop.permute.xlu1 %1488 }
 0x272   : > { %v1363_v44 = vpop.permute.xlu0 %1362  ;;  %v1885_v7 = vsel %vm1859_vm8, %v1852_v23, %v1489_v54  ;;  %v1724_v54 = vsel %vm1694_vm3, %v1691_v58, %v9158_v6 }
 0x273   : > { %v1853_v34 = vsel %vm1826_vm7, %v1820_v9, %v1363_v44  ;;  %v1757_v57 = vsel %vm1727_vm4, %v1724_v54, %v9159_v29  ;;  %v9160_v44 = vld [vmem:[#allocation104_spill] sm:$0xff] }
 0x274   : > { %v1790_v23 = vsel %vm1760_vm5, %v1757_v57, %v9160_v44 }
 0x275   : > { %v1617_v41 = vpop.permute.xlu1 %1616  ;;  %v1823_v14 = vsel %vm1793_vm6, %v1790_v23, %v9161_v32 }
 0x276   : > { %v1918_v36 = vsel %vm1892_vm9, %v1885_v7, %v1617_v41  ;;  %v1491_v63 = vpop.permute.xlu0 %1490  ;;  %v4767_v41 = vld [vmem:[#allocation2 + $0x168] sm:$0xff] }
 0x277   : > { %4677 = vmatmul.mubr.msk.f32.gmra.mrb[8].mxu1 %vm1934_vm10, %v1918_v36  ;;  %v1886_v27 = vsel %vm1859_vm8, %v1853_v34, %v1491_v63  ;;  %v1692_v11 = vsel %vm238_vm0, %v4767_v41, %v9162_v37 }
 0x278   : > { %v1725_v63 = vsel %vm1694_vm3, %v1692_v11, %v9163_v5 }
 0x279   : > { %v1365_v60 = vpop.permute.xlu1 %1364  ;;  %v1758_v47 = vsel %vm1727_vm4, %v1725_v63, %v9164_v40 }
 0x27a   : > { %v1619_v4 = vpop.permute.xlu0 %1618  ;;  %v1854_v50 = vsel %vm1826_vm7, %v1821_v35, %v1365_v60  ;;  %v9165_v60 = vld [vmem:[#allocation103_spill] sm:$0xff] }
 0x27b   : > { %v1919_v49 = vsel %vm1892_vm9, %v1886_v27, %v1619_v4  ;;  %v1791_v34 = vsel %vm1760_vm5, %v1758_v47, %v9165_v60  ;;  %v4768_v4 = vld [vmem:[#allocation2 + $0x170] sm:$0xff] }
 0x27c   : > { %4679 = vmatprep.mubr.msk.f32.mxu1 %vm1934_vm10, %v1919_v49  ;;  %v1824_v2 = vsel %vm1793_vm6, %v1791_v34, %v9166_v31  ;;  %v1693_v12 = vsel %vm238_vm0, %v4768_v4, %v9167_v42 }
 0x27d   : > { %v1493_v33 = vpop.permute.xlu1 %1492 }
 0x27e   : > { %v1367_v3 = vpop.permute.xlu0 %1366  ;;  %v1887_v61 = vsel %vm1859_vm8, %v1854_v50, %v1493_v33  ;;  %v1726_v33 = vsel %vm1694_vm3, %v1693_v12, %v9168_v51 }
 0x27f   : > { %v1855_v22 = vsel %vm1826_vm7, %v1822_v55, %v1367_v3  ;;  %v1759_v17 = vsel %vm1727_vm4, %v1726_v33, %v9169_v62  ;;  %v9170_v3 = vld [vmem:[#allocation105_spill] sm:$0xff] }
 0x280   : > { %v1792_v50 = vsel %vm1760_vm5, %v1759_v17, %v9170_v3 }
 0x281   : > { %v1621_v1 = vpop.permute.xlu1 %1620  ;;  %v1825_v25 = vsel %vm1793_vm6, %v1792_v50, %v9171_v30 }
 0x282   : > { %v1920_v16 = vsel %vm1892_vm9, %v1887_v61, %v1621_v1  ;;  %v1495_v8 = vpop.permute.xlu0 %1494 }
 0x283   : > { %4680 = vmatmul.mubr.msk.f32.gmra.mrb[10].mxu1 %vm1934_vm10, %v1920_v16  ;;  %v1888_v0 = vsel %vm1859_vm8, %v1855_v22, %v1495_v8 }
 0x285   : > { %v1369_v56 = vpop.permute.xlu1 %1368 }
 0x286   : > { %v1623_v13 = vpop.permute.xlu0 %1622  ;;  %v1856_v7 = vsel %vm1826_vm7, %v1823_v14, %v1369_v56 }
 0x287   : > { %v1921_v43 = vsel %vm1892_vm9, %v1888_v0, %v1623_v13 }
 0x288   : > { %4682 = vmatprep.mubr.msk.f32.mxu1 %vm1934_vm10, %v1921_v43 }
 0x289   : > { %v1497_v18 = vpop.permute.xlu1 %1496 }
 0x28a   : > { %v1371_v10 = vpop.permute.xlu0 %1370  ;;  %v1889_v36 = vsel %vm1859_vm8, %v1856_v7, %v1497_v18 }
 0x28b   : > { %v1857_v27 = vsel %vm1826_vm7, %v1824_v2, %v1371_v10 }
 0x28d   : > { %v1625_v59 = vpop.permute.xlu1 %1624 }
 0x28e   : > { %v1922_v24 = vsel %vm1892_vm9, %v1889_v36, %v1625_v59  ;;  %v1499_v9 = vpop.permute.xlu0 %1498 }
 0x28f   : > { %4683 = vmatmul.mubr.msk.f32.gmra.mrb[12].mxu1 %vm1934_vm10, %v1922_v24  ;;  %v1890_v49 = vsel %vm1859_vm8, %v1857_v27, %v1499_v9 }
 0x291   : > { %v1373_v15 = vpop.permute.xlu1 %1372 }
 0x292   : > { %v1627_v26 = vpop.permute.xlu0 %1626  ;;  %v1858_v53 = vsel %vm1826_vm7, %v1825_v25, %v1373_v15 }
 0x293   : > { %v1923_v39 = vsel %vm1892_vm9, %v1890_v49, %v1627_v26 }
 0x294   : > { %4685 = vmatprep.mubr.msk.f32.mxu1 %vm1934_vm10, %v1923_v39 }
 0x295   : > { %v1501_v35 = vpop.permute.xlu1 %1500 }
 0x296   : > { %v1891_v61 = vsel %vm1859_vm8, %v1858_v53, %v1501_v35 }
 0x299   : > { %v1629_v1 = vpop.permute.xlu1 %1628 }
 0x29a   : > { %v1924_v48 = vsel %vm1892_vm9, %v1891_v61, %v1629_v1 }
 0x29b   : > { %4686 = vmatmul.mubr.msk.f32.gmra.mrb[14].mxu1 %vm1934_vm10, %v1924_v48 }
 0x2cb   : > { %v6350_v20 = vpop.f32.mrb[0].mxu0 }
 0x2cc   : > { %v2257_v16 = vsel %vm1760_vm5, %v6350_v20, 0.0  ;;  %v6354_v52 = vpop.f32.mrb[1].mxu0 }
 0x2cd   : > { %v2256_v38 = vsel %vm1760_vm5, %v6354_v52, 0.0 }
 0x2ce   : > { %v2258_v8 = vadd.f32 %v2257_v16, %v2256_v38 }
 0x2d3   : > { %v6358_v46 = vpop.f32.mrb[2].mxu0 }
 0x2d4   : > { %v6360_v45 = vpop.f32.mrb[3].mxu0  ;;  %v2261_v56 = vsel %vm1760_vm5, %v6358_v46, 0.0 }
 0x2d5   : > { %v2259_v28 = vsel %vm1760_vm5, %v6360_v45, 0.0 }
 0x2d6   : > { %v2260_v55 = vadd.f32 %v2259_v28, %v2258_v8 }
 0x2d8   : > { %v2262_v22 = vadd.f32 %v2261_v56, %v2260_v55 }
 0x2db   : > { %v6366_v19 = vpop.f32.mrb[4].mxu0 }
 0x2dc   : > { %v6368_v21 = vpop.f32.mrb[5].mxu0  ;;  %v2265_v13 = vsel %vm1760_vm5, %v6366_v19, 0.0 }
 0x2dd   : > { %v2263_v58 = vsel %vm1760_vm5, %v6368_v21, 0.0 }
 0x2de   : > { %v2264_v0 = vadd.f32 %v2263_v58, %v2262_v22 }
 0x2e0   : > { %v2266_v6 = vadd.f32 %v2265_v13, %v2264_v0 }
 0x2e3   : > { %v6374_v54 = vpop.f32.mrb[6].mxu0 }
 0x2e4   : > { %v6376_v43 = vpop.f32.mrb[7].mxu0  ;;  %v2269_v18 = vsel %vm1760_vm5, %v6374_v54, 0.0 }
 0x2e5   : > { %v2267_v29 = vsel %vm1760_vm5, %v6376_v43, 0.0 }
 0x2e6   : > { %v2268_v57 = vadd.f32 %v2267_v29, %v2266_v6 }
 0x2e8   : > { %v2270_v44 = vadd.f32 %v2269_v18, %v2268_v57 }
 0x2eb   : > { %v6382_v23 = vpop.f32.mrb[8].mxu0 }
 0x2ec   : > { %v6384_v32 = vpop.f32.mrb[9].mxu0  ;;  %v2273_v7 = vsel %vm1760_vm5, %v6382_v23, 0.0 }
 0x2ed   : > { %v2271_v14 = vsel %vm1760_vm5, %v6384_v32, 0.0 }
 0x2ee   : > { %v2272_v10 = vadd.f32 %v2271_v14, %v2270_v44 }
 0x2f0   : > { %v2274_v41 = vadd.f32 %v2273_v7, %v2272_v10 }
 0x2f6   : > { %v6390_v37 = vpop.f32.mrb[10].mxu0 }
 0x2f7   : > { %v6392_v11 = vpop.f32.mrb[11].mxu0  ;;  %v2277_v5 = vsel %vm1760_vm5, %v6390_v37, 0.0 }
 0x2f8   : > { %v2275_v36 = vsel %vm1760_vm5, %v6392_v11, 0.0 }
 0x2f9   : > { %v2276_v59 = vadd.f32 %v2275_v36, %v2274_v41 }
 0x2fb   : > { %v2278_v63 = vadd.f32 %v2277_v5, %v2276_v59 }
 0x302   : > { %v6398_v24 = vpop.f32.mrb[12].mxu0 }
 0x303   : > { %v6400_v40 = vpop.f32.mrb[13].mxu0  ;;  %v2281_v60 = vsel %vm1760_vm5, %v6398_v24, 0.0 }
 0x304   : > { %v2279_v47 = vsel %vm1760_vm5, %v6400_v40, 0.0 }
 0x305   : > { %v2280_v9 = vadd.f32 %v2279_v47, %v2278_v63 }
 0x307   : > { %v2282_v34 = vadd.f32 %v2281_v60, %v2280_v9 }
 0x30e   : > { %v6406_v31 = vpop.f32.mrb[14].mxu0 }
 0x30f   : > { %v6408_v2 = vpop.f32.mrb[15].mxu0  ;;  %v2285_v4 = vsel %vm1760_vm5, %v6406_v31, 0.0 }
 0x310   : > { %v2283_v15 = vsel %vm1760_vm5, %v6408_v2, 0.0 }
 0x311   : > { %v2284_v27 = vadd.f32 %v2283_v15, %v2282_v34 }
 0x313   : > { %v2286_v42 = vadd.f32 %v2285_v4, %v2284_v27 }
 0x31a   : > { %v6414_v12 = vpop.f32.mrb[0].mxu1 }
 0x31b   : > { %v6416_v49 = vpop.f32.mrb[1].mxu1  ;;  %v2289_v33 = vsel %vm1760_vm5, %v6414_v12, 0.0 }
 0x31c   : > { %v2287_v26 = vsel %vm1760_vm5, %v6416_v49, 0.0 }
 0x31d   : > { %v2288_v51 = vadd.f32 %v2287_v26, %v2286_v42 }
 0x31f   : > { %v2290_v39 = vadd.f32 %v2289_v33, %v2288_v51 }
 0x326   : > { %v6422_v62 = vpop.f32.mrb[2].mxu1 }
 0x327   : > { %v6424_v17 = vpop.f32.mrb[3].mxu1  ;;  %v2293_v50 = vsel %vm1760_vm5, %v6422_v62, 0.0 }
 0x328   : > { %v2291_v35 = vsel %vm1760_vm5, %v6424_v17, 0.0 }
 0x329   : > { %v2292_v3 = vadd.f32 %v2291_v35, %v2290_v39 }
 0x32b   : > { %v2294_v30 = vadd.f32 %v2293_v50, %v2292_v3  ;;  %v6489_v50 = vld [vmem:[%s6484_s5 + $0x8] sm:$0xff] }
 0x332   : > { %v6430_v25 = vpop.f32.mrb[4].mxu1 }
 0x333   : > { %v6432_v53 = vpop.f32.mrb[5].mxu1  ;;  %v2297_v48 = vsel %vm1760_vm5, %v6430_v25, 0.0 }
 0x334   : > { %v2295_v61 = vsel %vm1760_vm5, %v6432_v53, 0.0 }
 0x335   : > { %v2296_v1 = vadd.f32 %v2295_v61, %v2294_v30  ;;  %v6495_v30 = vld [vmem:[%s6484_s5] sm:$0xff]  ;;  %v6498_v61 = vld [vmem:[%s6484_s5 + $0x28] sm:$0xff] }
 0x337   : > { %v2298_v16 = vadd.f32 %v2297_v48, %v2296_v1  ;;  %v6505_v1 = vld [vmem:[%s6484_s5 + $0x20] sm:$0xff]  ;;  %v6508_v48 = vld [vmem:[%s6484_s5 + $0x48] sm:$0xff] }
 0x33e   : > { %v6438_v38 = vpop.f32.mrb[6].mxu1 }
 0x33f   : > { %v6440_v8 = vpop.f32.mrb[7].mxu1  ;;  %v2301_v56 = vsel %vm1760_vm5, %v6438_v38, 0.0 }
 0x340   : > { %v2299_v28 = vsel %vm1760_vm5, %v6440_v8, 0.0 }
 0x341   : > { %v2300_v55 = vadd.f32 %v2299_v28, %v2298_v16  ;;  %v6515_v16 = vld [vmem:[%s6484_s5 + $0x40] sm:$0xff]  ;;  %v6518_v28 = vld [vmem:[%s6484_s5 + $0x68] sm:$0xff] }
 0x343   : > { %v2302_v22 = vadd.f32 %v2301_v56, %v2300_v55  ;;  %v6525_v55 = vld [vmem:[%s6484_s5 + $0x60] sm:$0xff]  ;;  %v6528_v56 = vld [vmem:[%s6484_s5 + $0x88] sm:$0xff] }
 0x34a   : > { %v6446_v58 = vpop.f32.mrb[8].mxu1 }
 0x34b   : > { %v6448_v0 = vpop.f32.mrb[9].mxu1  ;;  %v2305_v29 = vsel %vm1760_vm5, %v6446_v58, 0.0 }
 0x34c   : > { %v2303_v13 = vsel %vm1760_vm5, %v6448_v0, 0.0 }
 0x34d   : > { %v2304_v6 = vadd.f32 %v2303_v13, %v2302_v22  ;;  %v6535_v22 = vld [vmem:[%s6484_s5 + $0x80] sm:$0xff]  ;;  %v6538_v13 = vld [vmem:[%s6484_s5 + $0xa8] sm:$0xff] }
 0x34f   : > { %v2306_v57 = vadd.f32 %v2305_v29, %v2304_v6  ;;  %v3048_v6 = vld [vmem:[%s6484_s5 + $0xa0] sm:$0xff]  ;;  %v6546_v29 = vld [vmem:[%s6484_s5 + $0xc8] sm:$0xff] }
 0x356   : > { %v6454_v18 = vpop.f32.mrb[10].mxu1 }
 0x357   : > { %v6456_v44 = vpop.f32.mrb[11].mxu1  ;;  %v2309_v7 = vsel %vm1760_vm5, %v6454_v18, 0.0 }
 0x358   : > { %v2307_v14 = vsel %vm1760_vm5, %v6456_v44, 0.0 }
 0x359   : > { %v2308_v10 = vadd.f32 %v2307_v14, %v2306_v57  ;;  %v3050_v57 = vld [vmem:[%s6484_s5 + $0xc0] sm:$0xff] }
 0x35b   : > { %v2310_v41 = vadd.f32 %v2309_v7, %v2308_v10 }
 0x362   : > { %v6462_v36 = vpop.f32.mrb[12].mxu1 }
 0x363   : > { %v6464_v59 = vpop.f32.mrb[13].mxu1  ;;  %v2313_v47 = vsel %vm1760_vm5, %v6462_v36, 0.0 }
 0x364   : > { %v2311_v5 = vsel %vm1760_vm5, %v6464_v59, 0.0 }
 0x365   : > { %v2312_v63 = vadd.f32 %v2311_v5, %v2310_v41 }
 0x367   : > { %v2314_v9 = vadd.f32 %v2313_v47, %v2312_v63 }
 0x36e   : > { %v6470_v60 = vpop.f32.mrb[14].mxu1 }
 0x36f   : > { %9172 = vst [vmem:[#allocation3_spill] sm:$0xff] %v6470_v60  ;;  %v6472_v34 = vpop.f32.mrb[15].mxu1  ;;  %v2317_v4 = vsel %vm1760_vm5, %v6470_v60, 0.0  ;;  %v3069_v60 = vld [vmem:[%s6484_s5 + $0x1e8] sm:$0xff] }
 0x370   : > { %v2315_v15 = vsel %vm1760_vm5, %v6472_v34, 0.0 }
 0x371   : > { %v2316_v27 = vadd.f32 %v2315_v15, %v2314_v9  ;;  %v3052_v9 = vld [vmem:[%s6484_s5 + $0xe0] sm:$0xff]  ;;  %v3053_v15 = vld [vmem:[%s6484_s5 + $0xe8] sm:$0xff] }
 0x373   : > { %v2318_v42 = vadd.f32 %v2317_v4, %v2316_v27  ;;  %v3054_v27 = vld [vmem:[%s6484_s5 + $0x100] sm:$0xff]  ;;  %v3055_v4 = vld [vmem:[%s6484_s5 + $0x108] sm:$0xff] }
 0x375   : > { %v2319_v26 = vrot.slane %v2318_v42, 4 }
 0x377   : > { %v2320_v51 = vadd.f32 %v2319_v26, %v2318_v42  ;;  %v3056_v42 = vld [vmem:[%s6484_s5 + $0x120] sm:$0xff]  ;;  %v3057_v26 = vld [vmem:[%s6484_s5 + $0x128] sm:$0xff] }
 0x379   : > { %v2321_v33 = vrot.slane %v2320_v51, 2 }
 0x37b   : > { %v2322_v39 = vadd.f32 %v2321_v33, %v2320_v51  ;;  %v3058_v51 = vld [vmem:[%s6484_s5 + $0x140] sm:$0xff]  ;;  %v3059_v33 = vld [vmem:[%s6484_s5 + $0x148] sm:$0xff] }
 0x37d   : > { %v2323_v35 = vrot.slane %v2322_v39, 1 }
 0x37f   : > { %v2324_v3 = vadd.f32 %v2323_v35, %v2322_v39  ;;  %v3060_v39 = vld [vmem:[%s6484_s5 + $0x160] sm:$0xff]  ;;  %v3061_v35 = vld [vmem:[%s6484_s5 + $0x168] sm:$0xff] }
 0x381   : > { %2330 = vrot.lane.b32.xlu1 %v2324_v3, %s4800_s6  ;;  %2326 = vrot.lane.b32.xlu0 %v2324_v3, %s4801_s7 }
 0x385   : > { %2334 = vrot.lane.b32.xlu0 %v2324_v3, %s4802_s8  ;;  %3104 = vrot.lane.b32.xlu1 %v6489_v50, %s4792_s22 }
 0x389   : > { %3102 = vrot.lane.b32.xlu0 %v6495_v30, %s4792_s22  ;;  %3108 = vrot.lane.b32.xlu1 %v6498_v61, %s4792_s22 }
 0x38d   : > { %3106 = vrot.lane.b32.xlu0 %v6505_v1, %s4792_s22  ;;  %3112 = vrot.lane.b32.xlu1 %v6508_v48, %s4792_s22 }
 0x391   : > { %3110 = vrot.lane.b32.xlu0 %v6515_v16, %s4792_s22  ;;  %3116 = vrot.lane.b32.xlu1 %v6518_v28, %s4792_s22 }
 0x395   : > { %3114 = vrot.lane.b32.xlu0 %v6525_v55, %s4792_s22  ;;  %3120 = vrot.lane.b32.xlu1 %v6528_v56, %s4792_s22 }
 0x399   : > { %3118 = vrot.lane.b32.xlu0 %v6535_v22, %s4792_s22  ;;  %3124 = vrot.lane.b32.xlu1 %v6538_v13, %s4792_s22 }
 0x39d   : > { %3122 = vrot.lane.b32.xlu0 %v3048_v6, %s4792_s22  ;;  %3128 = vrot.lane.b32.xlu1 %v6546_v29, %s4792_s22 }
 0x3a1   : > { %3126 = vrot.lane.b32.xlu0 %v3050_v57, %s4792_s22 }
 0x3f3   : > { %v2327_v14 = vpop.permute.xlu0 %2326  ;;  %v2331_v7 = vpop.permute.xlu1 %2330 }
 0x3f4   : > { %v2329_v10 = vadd.f32 %v2327_v14, %v2324_v3  ;;  %v3062_v3 = vld [vmem:[%s6484_s5 + $0x180] sm:$0xff]  ;;  %v3063_v14 = vld [vmem:[%s6484_s5 + $0x188] sm:$0xff] }
 0x3f6   : > { %v2333_v41 = vadd.f32 %v2331_v7, %v2329_v10  ;;  %v3064_v10 = vld [vmem:[%s6484_s5 + $0x1a0] sm:$0xff]  ;;  %v3065_v7 = vld [vmem:[%s6484_s5 + $0x1a8] sm:$0xff] }
 0x3f7   : > { %v2335_v5 = vpop.permute.xlu0 %2334 }
 0x3f8   : > { %v2337_v63 = vadd.f32 %v2335_v5, %v2333_v41  ;;  %v3066_v41 = vld [vmem:[%s6484_s5 + $0x1c0] sm:$0xff]  ;;  %v3067_v5 = vld [vmem:[%s6484_s5 + $0x1c8] sm:$0xff] }
 0x3fa   : > { %v6553_v47 = vmul.f32 0.0009765625, %v2337_v63  ;;  %v3068_v63 = vld [vmem:[%s6484_s5 + $0x1e0] sm:$0xff] }
 0x3fc   : > { %2344 = vrot.lane.b32.xlu0 %v6553_v47, %s4793_s23  ;;  %2341 = vrot.lane.b32.xlu1 %v6553_v47, %s4792_s22 }
 0x400   : > { %2347 = vrot.lane.b32.xlu1 %v6553_v47, %s4794_s24  ;;  %3130 = vrot.lane.b32.xlu0 %v3052_v9, %s4792_s22 }
 0x404   : > { %3132 = vrot.lane.b32.xlu1 %v3053_v15, %s4792_s22  ;;  %3134 = vrot.lane.b32.xlu0 %v3054_v27, %s4792_s22 }
 0x408   : > { %3136 = vrot.lane.b32.xlu1 %v3055_v4, %s4792_s22  ;;  %3138 = vrot.lane.b32.xlu0 %v3056_v42, %s4792_s22 }
 0x40c   : > { %3140 = vrot.lane.b32.xlu1 %v3057_v26, %s4792_s22  ;;  %3142 = vrot.lane.b32.xlu0 %v3058_v51, %s4792_s22 }
 0x410   : > { %3144 = vrot.lane.b32.xlu1 %v3059_v33, %s4792_s22  ;;  %3146 = vrot.lane.b32.xlu0 %v3060_v39, %s4792_s22 }
 0x414   : > { %3148 = vrot.lane.b32.xlu1 %v3061_v35, %s4792_s22  ;;  %3150 = vrot.lane.b32.xlu0 %v3062_v3, %s4792_s22 }
 0x418   : > { %3152 = vrot.lane.b32.xlu1 %v3063_v14, %s4792_s22  ;;  %3154 = vrot.lane.b32.xlu0 %v3064_v10, %s4792_s22 }
 0x41c   : > { %3156 = vrot.lane.b32.xlu1 %v3065_v7, %s4792_s22  ;;  %3158 = vrot.lane.b32.xlu0 %v3066_v41, %s4792_s22 }
 0x420   : > { %3160 = vrot.lane.b32.xlu1 %v3067_v5, %s4792_s22  ;;  %3162 = vrot.lane.b32.xlu0 %v3068_v63, %s4792_s22 }
 0x424   : > { %3164 = vrot.lane.b32.xlu1 %v3069_v60, %s4792_s22  ;;  %3295 = vrot.lane.b32.xlu0 %v6495_v30, %s4803_s9  ;;  %v6628_v30 = vpop.permute.xlu0 %3102 }
 0x425   : > { %9174 = vst [vmem:[#allocation54_spill] sm:$0xff] %v6628_v30 }
 0x428   : > { %3297 = vrot.lane.b32.xlu1 %v6489_v50, %s4803_s9  ;;  %3299 = vrot.lane.b32.xlu0 %v6505_v1, %s4803_s9  ;;  %v6626_v50 = vpop.permute.xlu1 %3104  ;;  %v6634_v1 = vpop.permute.xlu0 %3106 }
 0x429   : > { %9173 = vst [vmem:[#allocation6_spill] sm:$0xff] %v6626_v50  ;;  %9176 = vst [vmem:[#allocation14_spill] sm:$0xff] %v6634_v1  ;;  %v6853_v50 = vld [vmem:[%s6484_s5 + $0x170] sm:$0xff] }
 0x42c   : > { %3301 = vrot.lane.b32.xlu1 %v6498_v61, %s4803_s9  ;;  %3303 = vrot.lane.b32.xlu0 %v6515_v16, %s4803_s9  ;;  %v6632_v61 = vpop.permute.xlu1 %3108  ;;  %v6642_v16 = vpop.permute.xlu0 %3110 }
 0x42d   : > { %9175 = vst [vmem:[#allocation8_spill] sm:$0xff] %v6632_v61  ;;  %9178 = vst [vmem:[#allocation20_spill] sm:$0xff] %v6642_v16  ;;  %v6825_v16 = vld [vmem:[%s6484_s5 + $0x150] sm:$0xff] }
 0x430   : > { %3305 = vrot.lane.b32.xlu1 %v6508_v48, %s4803_s9  ;;  %3307 = vrot.lane.b32.xlu0 %v6525_v55, %s4803_s9  ;;  %v6640_v48 = vpop.permute.xlu1 %3112  ;;  %v6648_v55 = vpop.permute.xlu0 %3114 }
 0x431   : > { %9177 = vst [vmem:[#allocation12_spill] sm:$0xff] %v6640_v48  ;;  %9180 = vst [vmem:[#allocation10_spill] sm:$0xff] %v6648_v55 }
 0x434   : > { %3309 = vrot.lane.b32.xlu1 %v6518_v28, %s4803_s9  ;;  %3311 = vrot.lane.b32.xlu0 %v6535_v22, %s4803_s9  ;;  %v6646_v28 = vpop.permute.xlu1 %3116  ;;  %v6656_v22 = vpop.permute.xlu0 %3118 }
 0x435   : > { %9179 = vst [vmem:[#allocation56_spill] sm:$0xff] %v6646_v28  ;;  %9182 = vst [vmem:[#allocation13_spill] sm:$0xff] %v6656_v22  ;;  %v6759_v22 = vld [vmem:[%s6484_s5 + $0xf0] sm:$0xff] }
 0x438   : > { %3313 = vrot.lane.b32.xlu1 %v6528_v56, %s4803_s9  ;;  %3315 = vrot.lane.b32.xlu0 %v3048_v6, %s4803_s9  ;;  %v6654_v56 = vpop.permute.xlu1 %3120 }
 0x439   : > { %9181 = vst [vmem:[#allocation16_spill] sm:$0xff] %v6654_v56  ;;  %v6799_v56 = vld [vmem:[%s6484_s5 + $0x130] sm:$0xff] }
 0x43c   : > { %3317 = vrot.lane.b32.xlu1 %v6538_v13, %s4803_s9  ;;  %3319 = vrot.lane.b32.xlu0 %v3050_v57, %s4803_s9  ;;  %v6661_v13 = vld [vmem:[%s6484_s5 + $0x10] sm:$0xff]  ;;  %v6663_v6 = vpop.permute.xlu1 %3124  ;;  %v6671_v57 = vld [vmem:[%s6484_s5 + $0x18] sm:$0xff] }
 0x43d   : > { %9183 = vst [vmem:[#allocation19_spill] sm:$0xff] %v6663_v6  ;;  %v6752_v6 = vld [vmem:[%s6484_s5 + $0xd8] sm:$0xff] }
 0x440   : > { %3321 = vrot.lane.b32.xlu1 %v6546_v29, %s4803_s9  ;;  %3323 = vrot.lane.b32.xlu0 %v3052_v9, %s4803_s9  ;;  %v6665_v29 = vpop.permute.xlu0 %3122  ;;  %v6674_v9 = vld [vmem:[%s6484_s5 + $0x30] sm:$0xff] }
 0x441   : > { %9184 = vst [vmem:[#allocation17_spill] sm:$0xff] %v6665_v29  ;;  %v6742_v29 = vld [vmem:[%s6484_s5 + $0xd0] sm:$0xff] }
 0x444   : > { %3325 = vrot.lane.b32.xlu1 %v3053_v15, %s4803_s9  ;;  %3327 = vrot.lane.b32.xlu0 %v3054_v27, %s4803_s9  ;;  %v6678_v15 = vpop.permute.xlu1 %3128  ;;  %v6680_v27 = vpop.permute.xlu0 %3126 }
 0x445   : > { %9185 = vst [vmem:[#allocation23_spill] sm:$0xff] %v6678_v15  ;;  %9186 = vst [vmem:[#allocation21_spill] sm:$0xff] %v6680_v27  ;;  %v6735_v15 = vld [vmem:[%s6484_s5 + $0xb8] sm:$0xff] }
 0x448   : > { %3329 = vrot.lane.b32.xlu1 %v3055_v4, %s4803_s9  ;;  %3331 = vrot.lane.b32.xlu0 %v3056_v42, %s4803_s9  ;;  %v6688_v4 = vld [vmem:[%s6484_s5 + $0x50] sm:$0xff]  ;;  %v6695_v42 = vld [vmem:[%s6484_s5 + $0x58] sm:$0xff] }
 0x44c   : > { %3333 = vrot.lane.b32.xlu1 %v3057_v26, %s4803_s9  ;;  %3335 = vrot.lane.b32.xlu0 %v3058_v51, %s4803_s9  ;;  %v6698_v26 = vld [vmem:[%s6484_s5 + $0x70] sm:$0xff] }
 0x450   : > { %3337 = vrot.lane.b32.xlu1 %v3059_v33, %s4803_s9  ;;  %3339 = vrot.lane.b32.xlu0 %v3060_v39, %s4803_s9  ;;  %v6705_v39 = vld [vmem:[%s6484_s5 + $0x78] sm:$0xff] }
 0x454   : > { %3341 = vrot.lane.b32.xlu1 %v3061_v35, %s4803_s9  ;;  %3343 = vrot.lane.b32.xlu0 %v3062_v3, %s4803_s9  ;;  %v6708_v35 = vld [vmem:[%s6484_s5 + $0x90] sm:$0xff] }
 0x458   : > { %3345 = vrot.lane.b32.xlu1 %v3063_v14, %s4803_s9  ;;  %3347 = vrot.lane.b32.xlu0 %v3064_v10, %s4803_s9  ;;  %v2353_v10 = vlaneseq }
 0x45a   : > { %v6726_v27 = vshrl.u32 %v2353_v10, 7 }
 0x45c   : > { %3349 = vrot.lane.b32.xlu1 %v3065_v7, %s4803_s9  ;;  %3351 = vrot.lane.b32.xlu0 %v3066_v41, %s4803_s9  ;;  %v6717_v7 = vld [vmem:[%s6484_s5 + $0x98] sm:$0xff] }
 0x460   : > { %3353 = vrot.lane.b32.xlu1 %v3067_v5, %s4803_s9  ;;  %3355 = vrot.lane.b32.xlu0 %v3068_v63, %s4803_s9  ;;  %v6724_v63 = vld [vmem:[%s6484_s5 + $0xb0] sm:$0xff] }
 0x464   : > { %3357 = vrot.lane.b32.xlu1 %v3069_v60, %s4803_s9  ;;  %3489 = vrot.lane.b32.xlu0 %v6661_v13, %s4792_s22  ;;  %v6685_v60 = vld [vmem:[%s6484_s5 + $0x38] sm:$0xff] }
 0x468   : > { %3491 = vrot.lane.b32.xlu1 %v6671_v57, %s4792_s22  ;;  %3493 = vrot.lane.b32.xlu0 %v6674_v9, %s4792_s22 }
 0x46c   : > { %3495 = vrot.lane.b32.xlu1 %v6685_v60, %s4792_s22  ;;  %3497 = vrot.lane.b32.xlu0 %v6688_v4, %s4792_s22 }
 0x46e   : > { %v2342_v51 = vpop.permute.xlu1 %2341  ;;  %v2345_v33 = vpop.permute.xlu0 %2344 }
 0x470   : > { %3499 = vrot.lane.b32.xlu1 %v6695_v42, %s4792_s22  ;;  %3501 = vrot.lane.b32.xlu0 %v6698_v26, %s4792_s22 }
 0x472   : > { %v2348_v3 = vpop.permute.xlu1 %2347  ;;  %v6710_v14 = vpop.permute.xlu0 %3130 }
 0x473   : > { %9187 = vst [vmem:[#allocation78_spill] sm:$0xff] %v6710_v14  ;;  %v2350_v14 = vsel %vm238_vm0, %v6553_v47, %v2342_v51  ;;  %v8871_v47 = vsub.s32 0, %v6726_v27 }
 0x474   : > { %3503 = vrot.lane.b32.xlu1 %v6705_v39, %s4792_s22  ;;  %3505 = vrot.lane.b32.xlu0 %v6708_v35, %s4792_s22  ;;  %v2351_v10 = vsel %vm1694_vm3, %v2350_v14, %v2345_v33 }
 0x475   : > { %v2352_v51 = vsel %vm1727_vm4, %v2351_v10, %v2348_v3  ;;  %v6770_v3 = vld [vmem:[%s6484_s5 + $0xf8] sm:$0xff] }
 0x476   : > { %v6719_v41 = vpop.permute.xlu1 %3132  ;;  %v6721_v5 = vpop.permute.xlu0 %3134  ;;  %v6763_v33 = vrot.slane %v2352_v51, %v8871_v47  ;;  %v6792_v47 = vld [vmem:[%s6484_s5 + $0x118] sm:$0xff] }
 0x477   : > { %9188 = vst [vmem:[#allocation7_spill] sm:$0xff] %v6719_v41  ;;  %9189 = vst [vmem:[#allocation43_spill] sm:$0xff] %v6721_v5 }
 0x478   : > { %3507 = vrot.lane.b32.xlu1 %v6717_v7, %s4792_s22  ;;  %3509 = vrot.lane.b32.xlu0 %v6724_v63, %s4792_s22  ;;  %v6785_v51 = vsub.f32 %v6350_v20, %v6763_v33  ;;  %v6829_v48 = vsub.f32 %v6368_v21, %v6763_v33  ;;  %v6846_v21 = vld [vmem:[%s6484_s5 + $0x158] sm:$0xff] }
 0x47a   : > { %v6737_v41 = vpop.permute.xlu1 %3136  ;;  %v6739_v5 = vpop.permute.xlu0 %3138  ;;  %9196 = vst [vmem:[#allocation107_spill] sm:$0xff] %v6785_v51  ;;  %v2390_v55 = vmul.f32 %v6785_v51, %v6785_v51  ;;  %9203 = vst [vmem:[#allocation60_spill] sm:$0xff] %v6829_v48 }
 0x47b   : > { %9190 = vst [vmem:[#allocation127_spill] sm:$0xff] %v6737_v41  ;;  %9191 = vst [vmem:[#allocation27_spill] sm:$0xff] %v6739_v5 }
 0x47c   : > { %3511 = vrot.lane.b32.xlu1 %v6735_v15, %s4792_s22  ;;  %3513 = vrot.lane.b32.xlu0 %v6742_v29, %s4792_s22  ;;  %v2422_v61 = vsel %vm1760_vm5, %v2390_v55, 0.0 }
 0x47e   : > { %v6754_v41 = vpop.permute.xlu1 %3140  ;;  %v6756_v5 = vpop.permute.xlu0 %3142 }
 0x47f   : > { %9192 = vst [vmem:[#allocation5_spill] sm:$0xff] %v6754_v41  ;;  %9193 = vst [vmem:[#allocation58_spill] sm:$0xff] %v6756_v5  ;;  %v6777_v5 = vld [vmem:[%s6484_s5 + $0x110] sm:$0xff]  ;;  %v6781_v41 = vsub.f32 %v6354_v52, %v6763_v33  ;;  %v6803_v52 = vsub.f32 %v6360_v45, %v6763_v33 }
 0x480   : > { %3515 = vrot.lane.b32.xlu1 %v6752_v6, %s4792_s22  ;;  %3517 = vrot.lane.b32.xlu0 %v6759_v22, %s4792_s22 }
 0x481   : > { %9199 = vst [vmem:[#allocation79_spill] sm:$0xff] %v6803_v52  ;;  %v2389_v20 = vmul.f32 %v6781_v41, %v6781_v41 }
 0x482   : > { %v6772_v14 = vpop.permute.xlu1 %3144  ;;  %v6774_v10 = vpop.permute.xlu0 %3146 }
 0x483   : > { %9194 = vst [vmem:[#allocation80_spill] sm:$0xff] %v6772_v14  ;;  %9195 = vst [vmem:[#allocation11_spill] sm:$0xff] %v6774_v10  ;;  %v2421_v1 = vsel %vm1760_vm5, %v2389_v20, 0.0 }
 0x484   : > { %3519 = vrot.lane.b32.xlu1 %v6770_v3, %s4792_s22  ;;  %3521 = vrot.lane.b32.xlu0 %v6777_v5, %s4792_s22  ;;  %v2423_v30 = vadd.f32 %v2422_v61, %v2421_v1  ;;  %v6866_v61 = vsub.f32 %v6374_v54, %v6763_v33  ;;  %v6885_v54 = vsub.f32 %v6384_v32, %v6763_v33  ;;  %v6902_v32 = vld [vmem:[%s6484_s5 + $0x198] sm:$0xff] }
 0x486   : > { %v6794_v10 = vpop.permute.xlu1 %3148  ;;  %v6796_v14 = vpop.permute.xlu0 %3150  ;;  %9208 = vst [vmem:[#allocation59_spill] sm:$0xff] %v6866_v61  ;;  %9211 = vst [vmem:[#allocation108_spill] sm:$0xff] %v6885_v54 }
 0x487   : > { %9197 = vst [vmem:[#allocation25_spill] sm:$0xff] %v6794_v10  ;;  %9198 = vst [vmem:[#allocation57_spill] sm:$0xff] %v6796_v14  ;;  %v6813_v10 = vsub.f32 %v6358_v46, %v6763_v33  ;;  %v6818_v14 = vld [vmem:[%s6484_s5 + $0x138] sm:$0xff]  ;;  %v2391_v46 = vmul.f32 %v6803_v52, %v6803_v52 }
 0x488   : > { %3523 = vrot.lane.b32.xlu1 %v6792_v47, %s4792_s22  ;;  %3525 = vrot.lane.b32.xlu0 %v6799_v56, %s4792_s22 }
 0x489   : > { %9200 = vst [vmem:[#allocation9_spill] sm:$0xff] %v6813_v10  ;;  %v2424_v52 = vsel %vm1760_vm5, %v2391_v46, 0.0 }
 0x48a   : > { %v6820_v45 = vpop.permute.xlu1 %3152  ;;  %v6822_v28 = vpop.permute.xlu0 %3154  ;;  %v2425_v51 = vadd.f32 %v2424_v52, %v2423_v30 }
 0x48b   : > { %9201 = vst [vmem:[#allocation106_spill] sm:$0xff] %v6820_v45  ;;  %9202 = vst [vmem:[#allocation31_spill] sm:$0xff] %v6822_v28  ;;  %v6839_v45 = vsub.f32 %v6366_v19, %v6763_v33  ;;  %v2392_v28 = vmul.f32 %v6813_v10, %v6813_v10  ;;  %v6857_v19 = vsub.f32 %v6376_v43, %v6763_v33  ;;  %v6874_v43 = vld [vmem:[%s6484_s5 + $0x178] sm:$0xff] }
 0x48c   : > { %3527 = vrot.lane.b32.xlu1 %v6818_v14, %s4792_s22  ;;  %3529 = vrot.lane.b32.xlu0 %v6825_v16, %s4792_s22  ;;  %v2393_v10 = vmul.f32 %v6829_v48, %v6829_v48 }
 0x48d   : > { %9204 = vst [vmem:[#allocation82_spill] sm:$0xff] %v6839_v45  ;;  %9207 = vst [vmem:[#allocation29_spill] sm:$0xff] %v6857_v19  ;;  %v2394_v1 = vmul.f32 %v6839_v45, %v6839_v45 }
 0x48e   : > { %v6848_v20 = vpop.permute.xlu1 %3156  ;;  %v6850_v55 = vpop.permute.xlu0 %3158  ;;  %v2428_v45 = vsel %vm1760_vm5, %v2393_v10, 0.0 }
 0x48f   : > { %9205 = vst [vmem:[#allocation18_spill] sm:$0xff] %v6848_v20  ;;  %9206 = vst [vmem:[#allocation109_spill] sm:$0xff] %v6850_v55  ;;  %v2426_v55 = vsel %vm1760_vm5, %v2392_v28, 0.0  ;;  %v6881_v20 = vld [vmem:[%s6484_s5 + $0x190] sm:$0xff]  ;;  %v2395_v28 = vmul.f32 %v6857_v19, %v6857_v19 }
 0x490   : > { %3531 = vrot.lane.b32.xlu1 %v6846_v21, %s4792_s22  ;;  %3533 = vrot.lane.b32.xlu0 %v6853_v50, %s4792_s22  ;;  %v2427_v46 = vadd.f32 %v2426_v55, %v2425_v51  ;;  %v6894_v51 = vsub.f32 %v6382_v23, %v6763_v33  ;;  %v2396_v55 = vmul.f32 %v6866_v61, %v6866_v61 }
 0x491   : > { %v6913_v23 = vsub.f32 %v6392_v11, %v6763_v33  ;;  %v2432_v61 = vsel %vm1760_vm5, %v2395_v28, 0.0  ;;  %v6930_v11 = vld [vmem:[%s6484_s5 + $0x1b8] sm:$0xff] }
 0x492   : > { %v6876_v30 = vpop.permute.xlu1 %3160  ;;  %v6878_v52 = vpop.permute.xlu0 %3162  ;;  %v2429_v48 = vadd.f32 %v2428_v45, %v2427_v46  ;;  %9212 = vst [vmem:[#allocation35_spill] sm:$0xff] %v6894_v51 }
 0x493   : > { %9209 = vst [vmem:[#allocation81_spill] sm:$0xff] %v6876_v30  ;;  %9210 = vst [vmem:[#allocation15_spill] sm:$0xff] %v6878_v52  ;;  %v2430_v52 = vsel %vm1760_vm5, %v2394_v1, 0.0  ;;  %v6909_v30 = vld [vmem:[%s6484_s5 + $0x1b0] sm:$0xff]  ;;  %v2397_v1 = vmul.f32 %v6885_v54, %v6885_v54 }
 0x494   : > { %3535 = vrot.lane.b32.xlu1 %v6874_v43, %s4792_s22  ;;  %3537 = vrot.lane.b32.xlu0 %v6881_v20, %s4792_s22  ;;  %v2431_v10 = vadd.f32 %v2430_v52, %v2429_v48  ;;  %9215 = vst [vmem:[#allocation24_spill] sm:$0xff] %v6913_v23  ;;  %v6922_v48 = vsub.f32 %v6390_v37, %v6763_v33 }
 0x495   : > { %v2398_v52 = vmul.f32 %v6894_v51, %v6894_v51  ;;  %v6941_v37 = vsub.f32 %v6400_v40, %v6763_v33  ;;  %v2436_v51 = vsel %vm1760_vm5, %v2397_v1, 0.0  ;;  %v6958_v40 = vld [vmem:[%s6484_s5 + $0x1d8] sm:$0xff] }
 0x496   : > { %v6904_v45 = vpop.permute.xlu1 %3164  ;;  %v6906_v46 = vpop.permute.xlu0 %3295  ;;  %v2433_v19 = vadd.f32 %v2432_v61, %v2431_v10  ;;  %9216 = vst [vmem:[#allocation111_spill] sm:$0xff] %v6922_v48 }
 0x497   : > { %9213 = vst [vmem:[#allocation62_spill] sm:$0xff] %v6904_v45  ;;  %9214 = vst [vmem:[#allocation84_spill] sm:$0xff] %v6906_v46  ;;  %v2434_v45 = vsel %vm1760_vm5, %v2396_v55, 0.0  ;;  %v6937_v46 = vld [vmem:[%s6484_s5 + $0x1d0] sm:$0xff]  ;;  %v2399_v55 = vmul.f32 %v6913_v23, %v6913_v23 }
 0x498   : > { %3539 = vrot.lane.b32.xlu1 %v6902_v32, %s4792_s22  ;;  %3541 = vrot.lane.b32.xlu0 %v6909_v30, %s4792_s22  ;;  %v2435_v28 = vadd.f32 %v2434_v45, %v2433_v19  ;;  %v6950_v19 = vsub.f32 %v6398_v24, %v6763_v33  ;;  %v2400_v45 = vmul.f32 %v6922_v48, %v6922_v48 }
 0x499   : > { %v6969_v24 = vsub.f32 %v6408_v2, %v6763_v33  ;;  %v2440_v48 = vsel %vm1760_vm5, %v2399_v55, 0.0  ;;  %v6986_v2 = vld [vmem:[%s6484_s5 + $0x1f8] sm:$0xff] }
 0x49a   : > { %v6932_v61 = vpop.permute.xlu1 %3297  ;;  %v6934_v10 = vpop.permute.xlu0 %3299  ;;  %v2437_v54 = vadd.f32 %v2436_v51, %v2435_v28  ;;  %9219 = vst [vmem:[#allocation83_spill] sm:$0xff] %v6950_v19 }
 0x49b   : > { %9217 = vst [vmem:[#allocation33_spill] sm:$0xff] %v6932_v61  ;;  %9218 = vst [vmem:[#allocation61_spill] sm:$0xff] %v6934_v10  ;;  %v2438_v10 = vsel %vm1760_vm5, %v2398_v52, 0.0  ;;  %v6965_v61 = vld [vmem:[%s6484_s5 + $0x1f0] sm:$0xff]  ;;  %v2401_v52 = vmul.f32 %v6941_v37, %v6941_v37 }
 0x49c   : > { %3543 = vrot.lane.b32.xlu1 %v6930_v11, %s4792_s22  ;;  %3545 = vrot.lane.b32.xlu0 %v6937_v46, %s4792_s22  ;;  %v2439_v1 = vadd.f32 %v2438_v10, %v2437_v54  ;;  %v6978_v54 = vsub.f32 %v6406_v31, %v6763_v33  ;;  %v2402_v10 = vmul.f32 %v6950_v19, %v6950_v19 }
 0x49d   : > { %v2403_v31 = vmul.f32 %v6969_v24, %v6969_v24  ;;  %v2444_v19 = vsel %vm1760_vm5, %v2401_v52, 0.0 }
 0x49e   : > { %v6960_v51 = vpop.permute.xlu1 %3301  ;;  %v6962_v28 = vpop.permute.xlu0 %3303  ;;  %v2441_v23 = vadd.f32 %v2440_v48, %v2439_v1  ;;  %9222 = vst [vmem:[#allocation39_spill] sm:$0xff] %v6978_v54  ;;  %v6994_v1 = vsub.f32 %v6416_v49, %v6763_v33 }
 0x49f   : > { %9220 = vst [vmem:[#allocation22_spill] sm:$0xff] %v6960_v51  ;;  %9221 = vst [vmem:[#allocation110_spill] sm:$0xff] %v6962_v28  ;;  %v2442_v28 = vsel %vm1760_vm5, %v2400_v45, 0.0 }
 0x4a0   : > { %3547 = vrot.lane.b32.xlu1 %v6958_v40, %s4792_s22  ;;  %3549 = vrot.lane.b32.xlu0 %v6965_v61, %s4792_s22  ;;  %v2443_v51 = vadd.f32 %v2442_v28, %v2441_v23  ;;  %v7003_v23 = vsub.f32 %v6414_v12, %v6763_v33  ;;  %v2404_v28 = vmul.f32 %v6978_v54, %v6978_v54 }
 0x4a1   : > { %v2405_v12 = vmul.f32 %v6994_v1, %v6994_v1 }
 0x4a2   : > { %v6988_v55 = vpop.permute.xlu1 %3305  ;;  %v6990_v48 = vpop.permute.xlu0 %3307  ;;  %v2445_v45 = vadd.f32 %v2444_v19, %v2443_v51  ;;  %v7016_v19 = vsub.f32 %v6424_v17, %v6763_v33  ;;  %v2448_v51 = vsel %vm1760_vm5, %v2403_v31, 0.0 }
 0x4a3   : > { %9223 = vst [vmem:[#allocation64_spill] sm:$0xff] %v6988_v55  ;;  %9224 = vst [vmem:[#allocation86_spill] sm:$0xff] %v6990_v48  ;;  %v2446_v48 = vsel %vm1760_vm5, %v2402_v10, 0.0  ;;  %v2406_v10 = vmul.f32 %v7003_v23, %v7003_v23 }
 0x4a4   : > { %3551 = vrot.lane.b32.xlu1 %v6986_v2, %s4792_s22  ;;  %3681 = vrot.lane.b32.xlu0 %v6661_v13, %s4803_s9  ;;  %v2447_v49 = vadd.f32 %v2446_v48, %v2445_v45  ;;  %v7025_v13 = vsub.f32 %v6422_v62, %v6763_v33  ;;  %v2450_v48 = vsel %vm1760_vm5, %v2404_v28, 0.0  ;;  %v2407_v62 = vmul.f32 %v7016_v19, %v7016_v19 }
 0x4a5   : > { %v2454_v28 = vsel %vm1760_vm5, %v2406_v10, 0.0 }
 0x4a6   : > { %v7010_v55 = vpop.permute.xlu1 %3309  ;;  %v7012_v52 = vpop.permute.xlu0 %3311  ;;  %v2449_v54 = vadd.f32 %v2448_v51, %v2447_v49  ;;  %v2452_v49 = vsel %vm1760_vm5, %v2405_v12, 0.0 }
 0x4a8   : > { %3683 = vrot.lane.b32.xlu1 %v6671_v57, %s4803_s9  ;;  %3685 = vrot.lane.b32.xlu0 %v6674_v9, %s4803_s9  ;;  %v2451_v17 = vadd.f32 %v2450_v48, %v2449_v54  ;;  %v7038_v57 = vsub.f32 %v6432_v53, %v6763_v33  ;;  %v7047_v9 = vsub.f32 %v6430_v25, %v6763_v33 }
 0x4a9   : > { %v2408_v54 = vmul.f32 %v7025_v13, %v7025_v13 }
 0x4aa   : > { %v7032_v45 = vpop.permute.xlu1 %3313  ;;  %v7034_v31 = vpop.permute.xlu0 %3315  ;;  %v2453_v51 = vadd.f32 %v2452_v49, %v2451_v17  ;;  %v2409_v25 = vmul.f32 %v7038_v57, %v7038_v57  ;;  %v2456_v17 = vsel %vm1760_vm5, %v2407_v62, 0.0  ;;  %v2410_v10 = vmul.f32 %v7047_v9, %v7047_v9 }
 0x4ac   : > { %3687 = vrot.lane.b32.xlu1 %v6685_v60, %s4803_s9  ;;  %3689 = vrot.lane.b32.xlu0 %v6688_v4, %s4803_s9  ;;  %v2455_v53 = vadd.f32 %v2454_v28, %v2453_v51  ;;  %v7060_v60 = vsub.f32 %v6440_v8, %v6763_v33  ;;  %v7069_v4 = vsub.f32 %v6438_v38, %v6763_v33  ;;  %v2458_v51 = vsel %vm1760_vm5, %v2408_v54, 0.0 }
 0x4ae   : > { %v7054_v48 = vpop.permute.xlu1 %3317  ;;  %v7056_v12 = vpop.permute.xlu0 %3319  ;;  %v2457_v49 = vadd.f32 %v2456_v17, %v2455_v53  ;;  %v2411_v38 = vmul.f32 %v7060_v60, %v7060_v60  ;;  %v2460_v53 = vsel %vm1760_vm5, %v2409_v25, 0.0  ;;  %v2412_v54 = vmul.f32 %v7069_v4, %v7069_v4 }
 0x4b0   : > { %3691 = vrot.lane.b32.xlu1 %v6695_v42, %s4803_s9  ;;  %3693 = vrot.lane.b32.xlu0 %v6698_v26, %s4803_s9  ;;  %v2459_v8 = vadd.f32 %v2458_v51, %v2457_v49  ;;  %v7082_v42 = vsub.f32 %v6448_v0, %v6763_v33  ;;  %v7091_v26 = vsub.f32 %v6446_v58, %v6763_v33  ;;  %v2462_v49 = vsel %vm1760_vm5, %v2410_v10, 0.0 }
 0x4b2   : > { %v7076_v28 = vpop.permute.xlu1 %3321  ;;  %v7078_v62 = vpop.permute.xlu0 %3323  ;;  %v2461_v17 = vadd.f32 %v2460_v53, %v2459_v8  ;;  %v2413_v58 = vmul.f32 %v7082_v42, %v7082_v42  ;;  %v2464_v8 = vsel %vm1760_vm5, %v2411_v38, 0.0  ;;  %v2414_v10 = vmul.f32 %v7091_v26, %v7091_v26 }
 0x4b3   : > { %9225 = vst [vmem:[#allocation28_spill] sm:$0xff] %v7078_v62  ;;  %v9320_v62 = vld [vmem:[#allocation83_spill] sm:$0xff] }
 0x4b4   : > { %3695 = vrot.lane.b32.xlu1 %v6705_v39, %s4803_s9  ;;  %3697 = vrot.lane.b32.xlu0 %v6708_v35, %s4803_s9  ;;  %v2463_v0 = vadd.f32 %v2462_v49, %v2461_v17  ;;  %v7104_v39 = vsub.f32 %v6456_v44, %v6763_v33  ;;  %v7113_v35 = vsub.f32 %v6454_v18, %v6763_v33  ;;  %v2466_v17 = vsel %vm1760_vm5, %v2412_v54, 0.0 }
 0x4b6   : > { %v7098_v51 = vpop.permute.xlu1 %3325  ;;  %v7100_v25 = vpop.permute.xlu0 %3327  ;;  %v2465_v53 = vadd.f32 %v2464_v8, %v2463_v0  ;;  %v2415_v18 = vmul.f32 %v7104_v39, %v7104_v39  ;;  %v2468_v0 = vsel %vm1760_vm5, %v2413_v58, 0.0  ;;  %v2416_v54 = vmul.f32 %v7113_v35, %v7113_v35 }
 0x4b7   : > { %9226 = vst [vmem:[#allocation113_spill] sm:$0xff] %v7098_v51  ;;  %9227 = vst [vmem:[#allocation37_spill] sm:$0xff] %v7100_v25 }
 0x4b8   : > { %3699 = vrot.lane.b32.xlu1 %v6717_v7, %s4803_s9  ;;  %3701 = vrot.lane.b32.xlu0 %v6724_v63, %s4803_s9  ;;  %v2467_v44 = vadd.f32 %v2466_v17, %v2465_v53  ;;  %v7126_v7 = vsub.f32 %v6464_v59, %v6763_v33  ;;  %v7135_v63 = vsub.f32 %v6462_v36, %v6763_v33  ;;  %v2470_v53 = vsel %vm1760_vm5, %v2414_v10, 0.0 }
 0x4ba   : > { %v7120_v49 = vpop.permute.xlu1 %3329  ;;  %v7122_v38 = vpop.permute.xlu0 %3331  ;;  %v2469_v8 = vadd.f32 %v2468_v0, %v2467_v44  ;;  %v2417_v36 = vmul.f32 %v7126_v7, %v7126_v7  ;;  %v2472_v44 = vsel %vm1760_vm5, %v2415_v18, 0.0 }
 0x4bb   : > { %9228 = vst [vmem:[#allocation63_spill] sm:$0xff] %v7120_v49  ;;  %9229 = vst [vmem:[#allocation85_spill] sm:$0xff] %v7122_v38 }
 0x4bc   : > { %3703 = vrot.lane.b32.xlu1 %v6735_v15, %s4803_s9  ;;  %3705 = vrot.lane.b32.xlu0 %v6742_v29, %s4803_s9  ;;  %v2471_v59 = vadd.f32 %v2470_v53, %v2469_v8  ;;  %v7148_v15 = vsub.f32 %v6472_v34, %v6763_v33  ;;  %v9232_v29 = vld [vmem:[#allocation3_spill] sm:$0xff]  ;;  %v2418_v8 = vmul.f32 %v7135_v63, %v7135_v63  ;;  %v2474_v53 = vsel %vm1760_vm5, %v2416_v54, 0.0 }
 0x4bd   : > { %v7157_v10 = vsub.f32 %v9232_v29, %v6763_v33 }
 0x4be   : > { %v7142_v17 = vpop.permute.xlu1 %3333  ;;  %v7144_v58 = vpop.permute.xlu0 %3335  ;;  %v2473_v0 = vadd.f32 %v2472_v44, %v2471_v59  ;;  %v2419_v18 = vmul.f32 %v7148_v15, %v7148_v15  ;;  %v2476_v59 = vsel %vm1760_vm5, %v2417_v36, 0.0  ;;  %v2478_v44 = vsel %vm1760_vm5, %v2418_v8, 0.0 }
 0x4bf   : > { %9230 = vst [vmem:[#allocation26_spill] sm:$0xff] %v7142_v17  ;;  %9231 = vst [vmem:[#allocation112_spill] sm:$0xff] %v7144_v58  ;;  %v2420_v33 = vmul.f32 %v7157_v10, %v7157_v10 }
 0x4c0   : > { %3707 = vrot.lane.b32.xlu1 %v6752_v6, %s4803_s9  ;;  %v2475_v34 = vadd.f32 %v2474_v53, %v2473_v0  ;;  %v2480_v0 = vsel %vm1760_vm5, %v2419_v18, 0.0 }
 0x4c2   : > { %v7162_v58 = vpop.permute.xlu1 %3337  ;;  %v7164_v17 = vpop.permute.xlu0 %3339  ;;  %v2477_v6 = vadd.f32 %v2476_v59, %v2475_v34 }
 0x4c3   : > { %9233 = vst [vmem:[#allocation42_spill] sm:$0xff] %v7162_v58  ;;  %9234 = vst [vmem:[#allocation66_spill] sm:$0xff] %v7164_v17  ;;  %v2482_v17 = vsel %vm1760_vm5, %v2420_v33, 0.0 }
 0x4c4   : > { %v2479_v29 = vadd.f32 %v2478_v44, %v2477_v6 }
 0x4c6   : > { %v7172_v38 = vpop.permute.xlu1 %3341  ;;  %v7174_v54 = vpop.permute.xlu0 %3343  ;;  %v2481_v53 = vadd.f32 %v2480_v0, %v2479_v29 }
 0x4c7   : > { %9235 = vst [vmem:[#allocation88_spill] sm:$0xff] %v7172_v38  ;;  %9236 = vst [vmem:[#allocation32_spill] sm:$0xff] %v7174_v54 }
 0x4c8   : > { %v2483_v58 = vadd.f32 %v2482_v17, %v2481_v53 }
 0x4ca   : > { %v7178_v49 = vpop.permute.xlu1 %3345  ;;  %v7180_v36 = vpop.permute.xlu0 %3347  ;;  %v2484_v34 = vrot.slane %v2483_v58, 4 }
 0x4cb   : > { %9237 = vst [vmem:[#allocation115_spill] sm:$0xff] %v7178_v49  ;;  %9238 = vst [vmem:[#allocation41_spill] sm:$0xff] %v7180_v36  ;;  %v9319_v49 = vld [vmem:[#allocation111_spill] sm:$0xff] }
 0x4cc   : > { %v2485_v59 = vadd.f32 %v2484_v34, %v2483_v58 }
 0x4ce   : > { %v7182_v25 = vpop.permute.xlu1 %3349  ;;  %v7184_v8 = vpop.permute.xlu0 %3351  ;;  %v2486_v6 = vrot.slane %v2485_v59, 2 }
 0x4cf   : > { %9239 = vst [vmem:[#allocation65_spill] sm:$0xff] %v7182_v25  ;;  %9240 = vst [vmem:[#allocation87_spill] sm:$0xff] %v7184_v8  ;;  %v9314_v25 = vld [vmem:[#allocation29_spill] sm:$0xff] }
 0x4d0   : > { %v2487_v44 = vadd.f32 %v2486_v6, %v2485_v59 }
 0x4d2   : > { %v7186_v38 = vpop.permute.xlu1 %3353  ;;  %v7188_v54 = vpop.permute.xlu0 %3355  ;;  %v2488_v18 = vrot.slane %v2487_v44, 1 }
 0x4d3   : > { %9241 = vst [vmem:[#allocation30_spill] sm:$0xff] %v7186_v38  ;;  %9242 = vst [vmem:[#allocation114_spill] sm:$0xff] %v7188_v54  ;;  %v9312_v38 = vld [vmem:[#allocation60_spill] sm:$0xff] }
 0x4d4   : > { %v7190_v29 = vadd.f32 %v2488_v18, %v2487_v44  ;;  %v3812_v18 = vld [vmem:[%s7271_s12 + $0x18] sm:$0xff] }
 0x4d6   : > { %v7192_v17 = vpop.permute.xlu1 %3357  ;;  %v7194_v33 = vpop.permute.xlu0 %3489  ;;  %2495 = vrot.lane.b32.xlu1 %v7190_v29, %s4800_s6  ;;  %2491 = vrot.lane.b32.xlu0 %v7190_v29, %s4801_s7 }
 0x4d7   : > { %9243 = vst [vmem:[#allocation45_spill] sm:$0xff] %v7192_v17  ;;  %9244 = vst [vmem:[#allocation68_spill] sm:$0xff] %v7194_v33  ;;  %v9310_v33 = vld [vmem:[#allocation79_spill] sm:$0xff]  ;;  %v9311_v17 = vld [vmem:[#allocation9_spill] sm:$0xff] }
 0x4da   : > { %v7200_v58 = vpop.permute.xlu1 %3491  ;;  %v7202_v0 = vpop.permute.xlu0 %3493  ;;  %2499 = vrot.lane.b32.xlu0 %v7190_v29, %s4802_s8  ;;  %3711 = vrot.lane.b32.xlu1 %v6770_v3, %s4803_s9 }
 0x4db   : > { %9245 = vst [vmem:[#allocation90_spill] sm:$0xff] %v7200_v58  ;;  %9246 = vst [vmem:[#allocation36_spill] sm:$0xff] %v7202_v0 }
 0x4de   : > { %v7208_v53 = vpop.permute.xlu1 %3495  ;;  %v7210_v34 = vpop.permute.xlu0 %3497  ;;  %3709 = vrot.lane.b32.xlu0 %v6759_v22, %s4803_s9  ;;  %3715 = vrot.lane.b32.xlu1 %v6792_v47, %s4803_s9 }
 0x4df   : > { %9247 = vst [vmem:[#allocation117_spill] sm:$0xff] %v7208_v53  ;;  %9248 = vst [vmem:[#allocation44_spill] sm:$0xff] %v7210_v34 }
 0x4e2   : > { %v7216_v59 = vpop.permute.xlu1 %3499  ;;  %v7218_v6 = vpop.permute.xlu0 %3501  ;;  %3713 = vrot.lane.b32.xlu0 %v6777_v5, %s4803_s9  ;;  %3719 = vrot.lane.b32.xlu1 %v6818_v14, %s4803_s9 }
 0x4e3   : > { %9249 = vst [vmem:[#allocation67_spill] sm:$0xff] %v7216_v59  ;;  %9250 = vst [vmem:[#allocation89_spill] sm:$0xff] %v7218_v6 }
 0x4e6   : > { %v7224_v3 = vpop.permute.xlu1 %3503  ;;  %v7226_v44 = vpop.permute.xlu0 %3505  ;;  %3717 = vrot.lane.b32.xlu0 %v6799_v56, %s4803_s9  ;;  %3723 = vrot.lane.b32.xlu1 %v6846_v21, %s4803_s9 }
 0x4e7   : > { %9251 = vst [vmem:[#allocation34_spill] sm:$0xff] %v7224_v3  ;;  %9252 = vst [vmem:[#allocation116_spill] sm:$0xff] %v7226_v44 }
 0x4ea   : > { %v7232_v22 = vpop.permute.xlu1 %3507  ;;  %v7234_v47 = vpop.permute.xlu0 %3509  ;;  %3721 = vrot.lane.b32.xlu0 %v6825_v16, %s4803_s9  ;;  %3727 = vrot.lane.b32.xlu1 %v6874_v43, %s4803_s9 }
 0x4eb   : > { %9253 = vst [vmem:[#allocation47_spill] sm:$0xff] %v7232_v22  ;;  %9254 = vst [vmem:[#allocation70_spill] sm:$0xff] %v7234_v47 }
 0x4ee   : > { %v7240_v5 = vpop.permute.xlu1 %3511  ;;  %v7242_v14 = vpop.permute.xlu0 %3513  ;;  %3725 = vrot.lane.b32.xlu0 %v6853_v50, %s4803_s9  ;;  %3731 = vrot.lane.b32.xlu1 %v6902_v32, %s4803_s9 }
 0x4ef   : > { %9255 = vst [vmem:[#allocation92_spill] sm:$0xff] %v7240_v5  ;;  %9256 = vst [vmem:[#allocation40_spill] sm:$0xff] %v7242_v14 }
 0x4f2   : > { %v7248_v56 = vpop.permute.xlu1 %3515  ;;  %v7250_v21 = vpop.permute.xlu0 %3517  ;;  %3729 = vrot.lane.b32.xlu0 %v6881_v20, %s4803_s9  ;;  %3735 = vrot.lane.b32.xlu1 %v6930_v11, %s4803_s9 }
 0x4f3   : > { %9257 = vst [vmem:[#allocation119_spill] sm:$0xff] %v7248_v56  ;;  %9258 = vst [vmem:[#allocation46_spill] sm:$0xff] %v7250_v21 }
 0x4f6   : > { %v7256_v16 = vpop.permute.xlu1 %3519  ;;  %v7258_v43 = vpop.permute.xlu0 %3521  ;;  %3733 = vrot.lane.b32.xlu0 %v6909_v30, %s4803_s9  ;;  %3739 = vrot.lane.b32.xlu1 %v6958_v40, %s4803_s9  ;;  %v3810_v30 = vld [vmem:[%s7271_s12 + $0x8] sm:$0xff]  ;;  %v3809_v40 = vld [vmem:[%s7271_s12] sm:$0xff] }
 0x4f7   : > { %9259 = vst [vmem:[#allocation69_spill] sm:$0xff] %v7256_v16  ;;  %9260 = vst [vmem:[#allocation91_spill] sm:$0xff] %v7258_v43 }
 0x4fa   : > { %v7264_v50 = vpop.permute.xlu1 %3523  ;;  %v7273_v20 = vpop.permute.xlu0 %3525  ;;  %3737 = vrot.lane.b32.xlu0 %v6937_v46, %s4803_s9  ;;  %3743 = vrot.lane.b32.xlu1 %v6986_v2, %s4803_s9 }
 0x4fb   : > { %9261 = vst [vmem:[#allocation38_spill] sm:$0xff] %v7264_v50  ;;  %9262 = vst [vmem:[#allocation118_spill] sm:$0xff] %v7273_v20  ;;  %v3814_v20 = vld [vmem:[%s7271_s12 + $0x28] sm:$0xff] }
 0x4fe   : > { %v7280_v32 = vpop.permute.xlu1 %3527  ;;  %v7282_v11 = vpop.permute.xlu0 %3529  ;;  %3741 = vrot.lane.b32.xlu0 %v6965_v61, %s4803_s9  ;;  %3875 = vrot.lane.b32.xlu1 %v3810_v30, %s4804_s18  ;;  %v3813_v30 = vld [vmem:[%s7271_s12 + $0x20] sm:$0xff] }
 0x4ff   : > { %9263 = vst [vmem:[#allocation49_spill] sm:$0xff] %v7280_v32  ;;  %9264 = vst [vmem:[#allocation72_spill] sm:$0xff] %v7282_v11  ;;  %v3811_v11 = vld [vmem:[%s7271_s12 + $0x10] sm:$0xff] }
 0x502   : > { %v7289_v46 = vpop.permute.xlu1 %3531  ;;  %v7291_v2 = vpop.permute.xlu0 %3533  ;;  %3873 = vrot.lane.b32.xlu0 %v3809_v40, %s4804_s18  ;;  %3879 = vrot.lane.b32.xlu1 %v3812_v18, %s4804_s18  ;;  %v3815_v40 = vld [vmem:[%s7271_s12 + $0x30] sm:$0xff]  ;;  %v3818_v18 = vld [vmem:[%s7271_s12 + $0x48] sm:$0xff] }
 0x503   : > { %9265 = vst [vmem:[#allocation94_spill] sm:$0xff] %v7289_v46  ;;  %9266 = vst [vmem:[#allocation100_spill] sm:$0xff] %v7291_v2  ;;  %v3816_v46 = vld [vmem:[%s7271_s12 + $0x38] sm:$0xff] }
 0x506   : > { %v7297_v61 = vpop.permute.xlu1 %3535  ;;  %v7299_v32 = vpop.permute.xlu0 %3537  ;;  %3877 = vrot.lane.b32.xlu0 %v3811_v11, %s4804_s18  ;;  %3883 = vrot.lane.b32.xlu1 %v3814_v20, %s4804_s18  ;;  %v3817_v20 = vld [vmem:[%s7271_s12 + $0x40] sm:$0xff]  ;;  %v3820_v11 = vld [vmem:[%s7271_s12 + $0x58] sm:$0xff] }
 0x507   : > { %9267 = vst [vmem:[#allocation121_spill] sm:$0xff] %v7297_v61  ;;  %9268 = vst [vmem:[#allocation48_spill] sm:$0xff] %v7299_v32 }
 0x50a   : > { %v7305_v2 = vpop.permute.xlu1 %3539  ;;  %3881 = vrot.lane.b32.xlu0 %v3813_v30, %s4804_s18  ;;  %3887 = vrot.lane.b32.xlu1 %v3816_v46, %s4804_s18  ;;  %v7311_v61 = vpop.permute.xlu0 %3541  ;;  %v3819_v46 = vld [vmem:[%s7271_s12 + $0x50] sm:$0xff]  ;;  %v3822_v30 = vld [vmem:[%s7271_s12 + $0x68] sm:$0xff] }
 0x50b   : > { %9269 = vst [vmem:[#allocation71_spill] sm:$0xff] %v7305_v2  ;;  %9270 = vst [vmem:[#allocation93_spill] sm:$0xff] %v7311_v61  ;;  %v3821_v61 = vld [vmem:[%s7271_s12 + $0x60] sm:$0xff] }
 0x50e   : > { %v7313_v32 = vpop.permute.xlu1 %3543  ;;  %3885 = vrot.lane.b32.xlu0 %v3815_v40, %s4804_s18  ;;  %3891 = vrot.lane.b32.xlu1 %v3818_v18, %s4804_s18  ;;  %v7319_v43 = vpop.permute.xlu0 %3545 }
 0x50f   : > { %9271 = vst [vmem:[#allocation99_spill] sm:$0xff] %v7313_v32  ;;  %9272 = vst [vmem:[#allocation120_spill] sm:$0xff] %v7319_v43 }
 0x512   : > { %3889 = vrot.lane.b32.xlu0 %v3817_v20, %s4804_s18  ;;  %3895 = vrot.lane.b32.xlu1 %v3820_v11, %s4804_s18  ;;  %v7325_v2 = vpop.permute.xlu1 %3547  ;;  %v7330_v40 = vpop.permute.xlu0 %3549 }
 0x513   : > { %9273 = vst [vmem:[#allocation51_spill] sm:$0xff] %v7325_v2  ;;  %9274 = vst [vmem:[#allocation74_spill] sm:$0xff] %v7330_v40 }
 0x516   : > { %3893 = vrot.lane.b32.xlu0 %v3819_v46, %s4804_s18  ;;  %3899 = vrot.lane.b32.xlu1 %v3822_v30, %s4804_s18  ;;  %v7332_v18 = vpop.permute.xlu1 %3551  ;;  %v7335_v43 = vpop.permute.xlu0 %3681 }
 0x517   : > { %9275 = vst [vmem:[#allocation96_spill] sm:$0xff] %v7332_v18  ;;  %9276 = vst [vmem:[#allocation102_spill] sm:$0xff] %v7335_v43 }
 0x51a   : > { %3897 = vrot.lane.b32.xlu0 %v3821_v61, %s4804_s18  ;;  %v7337_v20 = vpop.permute.xlu1 %3683  ;;  %v7339_v11 = vpop.permute.xlu0 %3685 }
 0x51b   : > { %9277 = vst [vmem:[#allocation123_spill] sm:$0xff] %v7337_v20  ;;  %9278 = vst [vmem:[#allocation50_spill] sm:$0xff] %v7339_v11  ;;  %v9308_v11 = vsub.s32 0, %v6726_v27  ;;  %v9309_v20 = vld [vmem:[#allocation107_spill] sm:$0xff] }
 0x51c   : > { %v9317_v27 = vld [vmem:[#allocation35_spill] sm:$0xff] }
 0x51e   : > { %v7341_v32 = vpop.permute.xlu1 %3687  ;;  %v7343_v2 = vpop.permute.xlu0 %3689 }
 0x51f   : > { %9279 = vst [vmem:[#allocation73_spill] sm:$0xff] %v7341_v32  ;;  %9280 = vst [vmem:[#allocation95_spill] sm:$0xff] %v7343_v2 }
 0x522   : > { %v7345_v46 = vpop.permute.xlu1 %3691  ;;  %v7347_v30 = vpop.permute.xlu0 %3693 }
 0x523   : > { %9281 = vst [vmem:[#allocation101_spill] sm:$0xff] %v7345_v46  ;;  %9282 = vst [vmem:[#allocation122_spill] sm:$0xff] %v7347_v30 }
 0x526   : > { %v7349_v50 = vpop.permute.xlu1 %3695  ;;  %v7351_v40 = vpop.permute.xlu0 %3697 }
 0x527   : > { %9283 = vst [vmem:[#allocation53_spill] sm:$0xff] %v7349_v50  ;;  %9284 = vst [vmem:[#allocation76_spill] sm:$0xff] %v7351_v40 }
 0x52a   : > { %v7353_v18 = vpop.permute.xlu1 %3699  ;;  %v7355_v61 = vpop.permute.xlu0 %3701 }
 0x52b   : > { %9285 = vst [vmem:[#allocation98_spill] sm:$0xff] %v7353_v18  ;;  %9286 = vst [vmem:[#allocation104_spill] sm:$0xff] %v7355_v61 }
 0x52e   : > { %v7357_v21 = vpop.permute.xlu1 %3703  ;;  %v7359_v16 = vpop.permute.xlu0 %3705 }
 0x52f   : > { %9287 = vst [vmem:[#allocation125_spill] sm:$0xff] %v7357_v21  ;;  %9288 = vst [vmem:[#allocation52_spill] sm:$0xff] %v7359_v16 }
 0x532   : > { %v7361_v14 = vpop.permute.xlu1 %3707 }
 0x533   : > { %9289 = vst [vmem:[#allocation75_spill] sm:$0xff] %v7361_v14 }
 0x548   : > { %v2492_v56 = vpop.permute.xlu0 %2491  ;;  %v2496_v5 = vpop.permute.xlu1 %2495 }
 0x549   : > { %v2494_v47 = vadd.f32 %v2492_v56, %v7190_v29 }
 0x54b   : > { %v2498_v44 = vadd.f32 %v2496_v5, %v2494_v47 }
 0x54c   : > { %v2500_v22 = vpop.permute.xlu0 %2499  ;;  %v7367_v16 = vpop.permute.xlu1 %3711 }
 0x54d   : > { %v2502_v30 = vadd.f32 %v2500_v22, %v2498_v44  ;;  %9290 = vst [vmem:[#allocation97_spill] sm:$0xff] %v7367_v16 }
 0x54f   : > { %v2503_v50 = vmul.f32 0.0009765625, %v2502_v30 }
 0x550   : > { %v7369_v14 = vpop.permute.xlu0 %3709  ;;  %v7371_v29 = vpop.permute.xlu1 %3715 }
 0x551   : > { %v2504_v6 = vmax.f32 %v2503_v50, 0.0  ;;  %9291 = vst [vmem:[#allocation103_spill] sm:$0xff] %v7369_v14  ;;  %9292 = vst [vmem:[#allocation124_spill] sm:$0xff] %v7371_v29 }
 0x553   : > { %v2505_v40 = vadd.f32 1e-05, %v2504_v6 }
 0x554   : > { %v7373_v47 = vpop.permute.xlu0 %3713  ;;  %v7375_v44 = vpop.permute.xlu1 %3719 }
 0x555   : > { %4739 = vrsqrt.f32 %v2505_v40  ;;  %9293 = vst [vmem:[#allocation55_spill] sm:$0xff] %v7373_v47  ;;  %9294 = vst [vmem:[#allocation77_spill] sm:$0xff] %v7375_v44 }
 0x558   : > { %v7377_v22 = vpop.permute.xlu0 %3717  ;;  %v7379_v6 = vpop.permute.xlu1 %3723 }
 0x559   : > { %9295 = vst [vmem:[#allocation4_spill] sm:$0xff] %v7377_v22  ;;  %9296 = vst [vmem:[#allocation105_spill] sm:$0xff] %v7379_v6 }
 0x55c   : > { %v7381_v5 = vpop.permute.xlu0 %3721  ;;  %v7383_v56 = vpop.permute.xlu1 %3727 }
 0x55d   : > { %9297 = vst [vmem:[#allocation126_spill] sm:$0xff] %v7381_v5  ;;  %9298 = vst [vmem:[#allocation3_spill] sm:$0xff] %v7383_v56 }
 0x55f   : > { %v4740_v18 = vpop.eup %4739 }
 0x560   : > { %2511 = vrot.lane.b32.xlu0 %v4740_v18, %s4793_s23  ;;  %2508 = vrot.lane.b32.xlu1 %v4740_v18, %s4792_s22  ;;  %v7385_v50 = vpop.permute.xlu0 %3725  ;;  %v7387_v40 = vpop.permute.xlu1 %3731 }
 0x561   : > { %9299 = vst [vmem:[#allocation128_spill] sm:$0xff] %v7385_v50  ;;  %9300 = vst [vmem:[#allocation129_spill] sm:$0xff] %v7387_v40 }
 0x564   : > { %2514 = vrot.lane.b32.xlu1 %v4740_v18, %s4794_s24  ;;  %v7389_v30 = vpop.permute.xlu0 %3729  ;;  %v7391_v14 = vpop.permute.xlu1 %3735  ;;  %s7469_s24 = scalar_lea.vmem %s8848_s4, %s4578_s28 }
 0x565   : > { %9301 = vst [vmem:[#allocation130_spill] sm:$0xff] %v7389_v30  ;;  %9302 = vst [vmem:[#allocation131_spill] sm:$0xff] %v7391_v14 }
 0x568   : > { %v7393_v29 = vpop.permute.xlu0 %3733  ;;  %v7395_v47 = vpop.permute.xlu1 %3739 }
 0x569   : > { %9303 = vst [vmem:[#allocation132_spill] sm:$0xff] %v7393_v29  ;;  %9304 = vst [vmem:[#allocation133_spill] sm:$0xff] %v7395_v47 }
 0x56c   : > { %v7397_v44 = vpop.permute.xlu0 %3737  ;;  %v7399_v22 = vpop.permute.xlu1 %3743 }
 0x56d   : > { %9305 = vst [vmem:[#allocation134_spill] sm:$0xff] %v7397_v44  ;;  %9306 = vst [vmem:[#allocation135_spill] sm:$0xff] %v7399_v22 }
 0x570   : > { %v7401_v6 = vpop.permute.xlu0 %3741  ;;  %v7403_v5 = vpop.permute.xlu1 %3875 }
 0x571   : > { %9307 = vst [vmem:[#allocation136_spill] sm:$0xff] %v7401_v6 }
 0x574   : > { %v7405_v56 = vpop.permute.xlu0 %3873  ;;  %v7407_v50 = vpop.permute.xlu1 %3879 }
 0x578   : > { %v7409_v40 = vpop.permute.xlu0 %3877  ;;  %v7411_v30 = vpop.permute.xlu1 %3883 }
 0x57c   : > { %v7413_v14 = vpop.permute.xlu0 %3881  ;;  %v7415_v29 = vpop.permute.xlu1 %3887 }
 0x580   : > { %v7417_v47 = vpop.permute.xlu0 %3885  ;;  %v7419_v44 = vpop.permute.xlu1 %3891 }
 0x584   : > { %v7421_v22 = vpop.permute.xlu0 %3889  ;;  %v7423_v6 = vpop.permute.xlu1 %3895 }
 0x588   : > { %v7425_v16 = vpop.permute.xlu0 %3893  ;;  %v7427_v21 = vpop.permute.xlu1 %3899 }
 0x58c   : > { %v7429_v61 = vpop.permute.xlu0 %3897 }
 0x5d2   : > { %v2509_v3 = vpop.permute.xlu1 %2508  ;;  %v2512_v2 = vpop.permute.xlu0 %2511 }
 0x5d3   : > { %v2517_v46 = vsel %vm238_vm0, %v4740_v18, %v2509_v3  ;;  %v9313_v3 = vld [vmem:[#allocation82_spill] sm:$0xff] }
 0x5d4   : > { %v2518_v34 = vsel %vm1694_vm3, %v2517_v46, %v2512_v2  ;;  %v9315_v46 = vld [vmem:[#allocation59_spill] sm:$0xff] }
 0x5d6   : > { %v2515_v59 = vpop.permute.xlu1 %2514 }
 0x5d7   : > { %v2519_v32 = vsel %vm1727_vm4, %v2518_v34, %v2515_v59  ;;  %v9316_v34 = vld [vmem:[#allocation108_spill] sm:$0xff] }
 0x5d8   : > { %v2523_v0 = vrot.slane %v2519_v32, %v9308_v11  ;;  %v9318_v11 = vld [vmem:[#allocation24_spill] sm:$0xff] }
 0x5da   : > { %v2524_v53 = vmul.f32 %v2523_v0, %v6781_v41  ;;  %v2525_v43 = vmul.f32 %v2523_v0, %v9309_v20  ;;  %v2526_v58 = vmul.f32 %v2523_v0, %v9310_v33  ;;  %v2527_v54 = vmul.f32 %v2523_v0, %v9311_v17 }
 0x5db   : > { %v2528_v8 = vmul.f32 %v2523_v0, %v9312_v38  ;;  %v2529_v18 = vmul.f32 %v2523_v0, %v9313_v3  ;;  %v2530_v2 = vmul.f32 %v2523_v0, %v9314_v25  ;;  %v2531_v36 = vmul.f32 %v2523_v0, %v9315_v46  ;;  %v9321_v3 = vld [vmem:[#allocation39_spill] sm:$0xff] }
 0x5dc   : > { %v2532_v59 = vmul.f32 %v2523_v0, %v9316_v34  ;;  %v2533_v32 = vmul.f32 %v2523_v0, %v9317_v27  ;;  %v2534_v41 = vmul.f32 %v2523_v0, %v9318_v11  ;;  %v2535_v20 = vmul.f32 %v2523_v0, %v9319_v49 }
 0x5dd   : > { %v2536_v33 = vmul.f32 %v2523_v0, %v6941_v37  ;;  %v2537_v17 = vmul.f32 %v2523_v0, %v9320_v62  ;;  %v2538_v38 = vmul.f32 %v2523_v0, %v6969_v24  ;;  %v2539_v51 = vmul.f32 %v2523_v0, %v9321_v3 }
 0x5de   : > { %v2540_v25 = vmul.f32 %v2523_v0, %v6994_v1  ;;  %v2541_v46 = vmul.f32 %v2523_v0, %v7003_v23  ;;  %v2542_v34 = vmul.f32 %v2523_v0, %v7016_v19  ;;  %v2543_v27 = vmul.f32 %v2523_v0, %v7025_v13 }
 0x5df   : > { %v2544_v11 = vmul.f32 %v2523_v0, %v7038_v57  ;;  %v2545_v49 = vmul.f32 %v2523_v0, %v7047_v9  ;;  %v2546_v37 = vmul.f32 %v2523_v0, %v7060_v60  ;;  %v2547_v62 = vmul.f32 %v2523_v0, %v7069_v4 }
 0x5e0   : > { %v2548_v24 = vmul.f32 %v2523_v0, %v7082_v42  ;;  %v2549_v3 = vmul.f32 %v2523_v0, %v7091_v26  ;;  %v2550_v1 = vmul.f32 %v2523_v0, %v7104_v39  ;;  %v2551_v23 = vmul.f32 %v2523_v0, %v7113_v35 }
 0x5e1   : > { %v2552_v19 = vmul.f32 %v2523_v0, %v7126_v7  ;;  %v2553_v13 = vmul.f32 %v2523_v0, %v7135_v63  ;;  %v2554_v57 = vmul.f32 %v2523_v0, %v7148_v15  ;;  %v2555_v9 = vmul.f32 %v2523_v0, %v7157_v10 }
 0x5e2   : > { %v7475_v60 = vmax.f32 %v2525_v43, 0.0  ;;  %v7477_v4 = vmax.f32 %v2524_v53, 0.0  ;;  %v7479_v42 = vmax.f32 %v2526_v58, 0.0  ;;  %v7481_v26 = vmax.f32 %v2527_v54, 0.0 }
 0x5e3   : > { %v7483_v39 = vmax.f32 %v2528_v8, 0.0  ;;  %v7485_v35 = vmax.f32 %v2529_v18, 0.0  ;;  %v7487_v7 = vmax.f32 %v2530_v2, 0.0  ;;  %v7489_v63 = vmax.f32 %v2531_v36, 0.0 }
 0x5e4   : > { %2654 = vrot.lane.b32.xlu1 %v7475_v60, %s4805_s16  ;;  %v7493_v15 = vmax.f32 %v2532_v59, 0.0  ;;  %v7495_v10 = vmax.f32 %v2533_v32, 0.0  ;;  %v7497_v54 = vmax.f32 %v2534_v41, 0.0  ;;  %v7499_v8 = vmax.f32 %v2535_v20, 0.0  ;;  %2589 = vst.msk [vmem:[%s7469_s24 + $0x8] sm:$0xff] %vm238_vm0, %v7475_v60  ;;  %2652 = vrot.lane.b32.xlu0 %v7477_v4, %s4805_s16  ;;  %2588 = vst.msk [vmem:[%s7469_s24] sm:$0xff] %vm238_vm0, %v7477_v4 }
 0x5e5   : > { %2590 = vst.msk [vmem:[%s7469_s24 + $0x20] sm:$0xff] %vm238_vm0, %v7479_v42  ;;  %2591 = vst.msk [vmem:[%s7469_s24 + $0x28] sm:$0xff] %vm238_vm0, %v7481_v26  ;;  %v7515_v36 = vmax.f32 %v2536_v33, 0.0  ;;  %v7517_v58 = vmax.f32 %v2537_v17, 0.0  ;;  %v7519_v0 = vmax.f32 %v2538_v38, 0.0  ;;  %v7521_v53 = vmax.f32 %v2539_v51, 0.0 }
 0x5e6   : > { %2592 = vst.msk [vmem:[%s7469_s24 + $0x40] sm:$0xff] %vm238_vm0, %v7483_v39  ;;  %2593 = vst.msk [vmem:[%s7469_s24 + $0x48] sm:$0xff] %vm238_vm0, %v7485_v35  ;;  %v7535_v43 = vmax.f32 %v2540_v25, 0.0  ;;  %v7537_v51 = vmax.f32 %v2541_v46, 0.0  ;;  %v7539_v18 = vmax.f32 %v2542_v34, 0.0  ;;  %v7541_v2 = vmax.f32 %v2543_v27, 0.0 }
 0x5e7   : > { %2594 = vst.msk [vmem:[%s7469_s24 + $0x60] sm:$0xff] %vm238_vm0, %v7487_v7  ;;  %2595 = vst.msk [vmem:[%s7469_s24 + $0x68] sm:$0xff] %vm238_vm0, %v7489_v63  ;;  %v7555_v59 = vmax.f32 %v2544_v11, 0.0  ;;  %v7557_v32 = vmax.f32 %v2545_v49, 0.0  ;;  %v7559_v41 = vmax.f32 %v2546_v37, 0.0  ;;  %v7561_v20 = vmax.f32 %v2547_v62, 0.0 }
 0x5e8   : > { %2596 = vst.msk [vmem:[%s7469_s24 + $0x80] sm:$0xff] %vm238_vm0, %v7493_v15  ;;  %2597 = vst.msk [vmem:[%s7469_s24 + $0x88] sm:$0xff] %vm238_vm0, %v7495_v10  ;;  %v7575_v33 = vmax.f32 %v2548_v24, 0.0  ;;  %v7577_v17 = vmax.f32 %v2549_v3, 0.0  ;;  %v7579_v38 = vmax.f32 %v2550_v1, 0.0  ;;  %v7581_v25 = vmax.f32 %v2551_v23, 0.0  ;;  %2658 = vrot.lane.b32.xlu1 %v7481_v26, %s4805_s16  ;;  %2656 = vrot.lane.b32.xlu0 %v7479_v42, %s4805_s16 }
 0x5e9   : > { %2598 = vst.msk [vmem:[%s7469_s24 + $0xa0] sm:$0xff] %vm238_vm0, %v7497_v54  ;;  %2599 = vst.msk [vmem:[%s7469_s24 + $0xa8] sm:$0xff] %vm238_vm0, %v7499_v8  ;;  %v7599_v46 = vmax.f32 %v2552_v19, 0.0  ;;  %v7601_v34 = vmax.f32 %v2553_v13, 0.0  ;;  %v7603_v27 = vmax.f32 %v2554_v57, 0.0  ;;  %v7605_v11 = vmax.f32 %v2555_v9, 0.0 }
 0x5ea   : > { %2600 = vst.msk [vmem:[%s7469_s24 + $0xc0] sm:$0xff] %vm238_vm0, %v7515_v36  ;;  %2601 = vst.msk [vmem:[%s7469_s24 + $0xc8] sm:$0xff] %vm238_vm0, %v7517_v58  ;;  %v9322_v62 = vld [vmem:[#allocation6_spill] sm:$0xff]  ;;  %v9324_v3 = vld [vmem:[#allocation84_spill] sm:$0xff] }
 0x5eb   : > { %2602 = vst.msk [vmem:[%s7469_s24 + $0xe0] sm:$0xff] %vm238_vm0, %v7519_v0  ;;  %2603 = vst.msk [vmem:[%s7469_s24 + $0xe8] sm:$0xff] %vm238_vm0, %v7521_v53  ;;  %v9323_v24 = vld [vmem:[#allocation54_spill] sm:$0xff]  ;;  %v9325_v1 = vld [vmem:[#allocation33_spill] sm:$0xff] }
 0x5ec   : > { %2604 = vst.msk [vmem:[%s7469_s24 + $0x100] sm:$0xff] %vm238_vm0, %v7535_v43  ;;  %2605 = vst.msk [vmem:[%s7469_s24 + $0x108] sm:$0xff] %vm238_vm0, %v7537_v51  ;;  %2662 = vrot.lane.b32.xlu1 %v7485_v35, %s4805_s16  ;;  %2660 = vrot.lane.b32.xlu0 %v7483_v39, %s4805_s16  ;;  %v9326_v13 = vld [vmem:[#allocation8_spill] sm:$0xff]  ;;  %v9327_v57 = vld [vmem:[#allocation14_spill] sm:$0xff] }
 0x5ed   : > { %2606 = vst.msk [vmem:[%s7469_s24 + $0x120] sm:$0xff] %vm238_vm0, %v7539_v18  ;;  %2607 = vst.msk [vmem:[%s7469_s24 + $0x128] sm:$0xff] %vm238_vm0, %v7541_v2  ;;  %v9328_v9 = vld [vmem:[#allocation61_spill] sm:$0xff] }
 0x5ee   : > { %2608 = vst.msk [vmem:[%s7469_s24 + $0x140] sm:$0xff] %vm238_vm0, %v7555_v59  ;;  %2609 = vst.msk [vmem:[%s7469_s24 + $0x148] sm:$0xff] %vm238_vm0, %v7557_v32 }
 0x5ef   : > { %2610 = vst.msk [vmem:[%s7469_s24 + $0x160] sm:$0xff] %vm238_vm0, %v7559_v41  ;;  %2611 = vst.msk [vmem:[%s7469_s24 + $0x168] sm:$0xff] %vm238_vm0, %v7561_v20 }
 0x5f0   : > { %2612 = vst.msk [vmem:[%s7469_s24 + $0x180] sm:$0xff] %vm238_vm0, %v7575_v33  ;;  %2613 = vst.msk [vmem:[%s7469_s24 + $0x188] sm:$0xff] %vm238_vm0, %v7577_v17  ;;  %2666 = vrot.lane.b32.xlu1 %v7489_v63, %s4805_s16  ;;  %2664 = vrot.lane.b32.xlu0 %v7487_v7, %s4805_s16 }
 0x5f1   : > { %2614 = vst.msk [vmem:[%s7469_s24 + $0x1a0] sm:$0xff] %vm238_vm0, %v7579_v38  ;;  %2615 = vst.msk [vmem:[%s7469_s24 + $0x1a8] sm:$0xff] %vm238_vm0, %v7581_v25 }
 0x5f2   : > { %2616 = vst.msk [vmem:[%s7469_s24 + $0x1c0] sm:$0xff] %vm238_vm0, %v7599_v46  ;;  %2617 = vst.msk [vmem:[%s7469_s24 + $0x1c8] sm:$0xff] %vm238_vm0, %v7601_v34 }
 0x5f3   : > { %2618 = vst.msk [vmem:[%s7469_s24 + $0x1e0] sm:$0xff] %vm238_vm0, %v7603_v27  ;;  %2619 = vst.msk [vmem:[%s7469_s24 + $0x1e8] sm:$0xff] %vm238_vm0, %v7605_v11 }
 0x5f4   : > { %2670 = vrot.lane.b32.xlu1 %v7495_v10, %s4805_s16  ;;  %2668 = vrot.lane.b32.xlu0 %v7493_v15, %s4805_s16 }
 0x5f8   : > { %2674 = vrot.lane.b32.xlu1 %v7499_v8, %s4805_s16  ;;  %2672 = vrot.lane.b32.xlu0 %v7497_v54, %s4805_s16 }
 0x5fc   : > { %2678 = vrot.lane.b32.xlu1 %v7517_v58, %s4805_s16  ;;  %2676 = vrot.lane.b32.xlu0 %v7515_v36, %s4805_s16 }
 0x600   : > { %2682 = vrot.lane.b32.xlu1 %v7521_v53, %s4805_s16  ;;  %2680 = vrot.lane.b32.xlu0 %v7519_v0, %s4805_s16 }
 0x604   : > { %2686 = vrot.lane.b32.xlu1 %v7537_v51, %s4805_s16  ;;  %2684 = vrot.lane.b32.xlu0 %v7535_v43, %s4805_s16 }
 0x608   : > { %2690 = vrot.lane.b32.xlu1 %v7541_v2, %s4805_s16  ;;  %2688 = vrot.lane.b32.xlu0 %v7539_v18, %s4805_s16 }
 0x60c   : > { %2694 = vrot.lane.b32.xlu1 %v7557_v32, %s4805_s16  ;;  %2692 = vrot.lane.b32.xlu0 %v7555_v59, %s4805_s16 }
 0x610   : > { %2698 = vrot.lane.b32.xlu1 %v7561_v20, %s4805_s16  ;;  %2696 = vrot.lane.b32.xlu0 %v7559_v41, %s4805_s16 }
 0x614   : > { %2702 = vrot.lane.b32.xlu1 %v7577_v17, %s4805_s16  ;;  %2700 = vrot.lane.b32.xlu0 %v7575_v33, %s4805_s16 }
 0x618   : > { %2706 = vrot.lane.b32.xlu1 %v7581_v25, %s4805_s16  ;;  %2704 = vrot.lane.b32.xlu0 %v7579_v38, %s4805_s16 }
 0x61c   : > { %2710 = vrot.lane.b32.xlu1 %v7601_v34, %s4805_s16  ;;  %2708 = vrot.lane.b32.xlu0 %v7599_v46, %s4805_s16 }
 0x620   : > { %2714 = vrot.lane.b32.xlu1 %v7605_v11, %s4805_s16  ;;  %2712 = vrot.lane.b32.xlu0 %v7603_v27, %s4805_s16 }
 0x624   : > { %2783 = vrot.lane.b32.xlu1 %v7475_v60, %s4800_s6  ;;  %2781 = vrot.lane.b32.xlu0 %v7477_v4, %s4800_s6 }
 0x628   : > { %2787 = vrot.lane.b32.xlu1 %v7481_v26, %s4800_s6  ;;  %2785 = vrot.lane.b32.xlu0 %v7479_v42, %s4800_s6 }
 0x62c   : > { %2791 = vrot.lane.b32.xlu1 %v7485_v35, %s4800_s6  ;;  %2789 = vrot.lane.b32.xlu0 %v7483_v39, %s4800_s6 }
 0x630   : > { %2795 = vrot.lane.b32.xlu1 %v7489_v63, %s4800_s6  ;;  %2793 = vrot.lane.b32.xlu0 %v7487_v7, %s4800_s6 }
 0x634   : > { %2799 = vrot.lane.b32.xlu1 %v7495_v10, %s4800_s6  ;;  %2797 = vrot.lane.b32.xlu0 %v7493_v15, %s4800_s6 }
 0x638   : > { %2803 = vrot.lane.b32.xlu1 %v7499_v8, %s4800_s6  ;;  %2801 = vrot.lane.b32.xlu0 %v7497_v54, %s4800_s6 }
 0x63c   : > { %2807 = vrot.lane.b32.xlu1 %v7517_v58, %s4800_s6  ;;  %2805 = vrot.lane.b32.xlu0 %v7515_v36, %s4800_s6 }
 0x640   : > { %2811 = vrot.lane.b32.xlu1 %v7521_v53, %s4800_s6  ;;  %2809 = vrot.lane.b32.xlu0 %v7519_v0, %s4800_s6 }
 0x644   : > { %2815 = vrot.lane.b32.xlu1 %v7537_v51, %s4800_s6  ;;  %2813 = vrot.lane.b32.xlu0 %v7535_v43, %s4800_s6 }
 0x648   : > { %2819 = vrot.lane.b32.xlu1 %v7541_v2, %s4800_s6  ;;  %2817 = vrot.lane.b32.xlu0 %v7539_v18, %s4800_s6 }
 0x64c   : > { %2823 = vrot.lane.b32.xlu1 %v7557_v32, %s4800_s6  ;;  %2821 = vrot.lane.b32.xlu0 %v7555_v59, %s4800_s6 }
 0x650   : > { %2827 = vrot.lane.b32.xlu1 %v7561_v20, %s4800_s6  ;;  %2825 = vrot.lane.b32.xlu0 %v7559_v41, %s4800_s6 }
 0x654   : > { %2831 = vrot.lane.b32.xlu1 %v7577_v17, %s4800_s6  ;;  %2829 = vrot.lane.b32.xlu0 %v7575_v33, %s4800_s6 }
 0x656   : > { %v2655_v49 = vpop.permute.xlu1 %2654  ;;  %v2653_v37 = vpop.permute.xlu0 %2652 }
 0x657   : > { %2750 = vst.msk [vmem:[%s7469_s24 + $0x8] sm:$0xff] %vm2748_vm11, %v2655_v49  ;;  %2749 = vst.msk [vmem:[%s7469_s24] sm:$0xff] %vm2748_vm11, %v2653_v37  ;;  %v9329_v49 = vld [vmem:[#allocation22_spill] sm:$0xff] }
 0x658   : > { %3200 = vst.msk [vmem:[%s7469_s24 + $0x8] sm:$0xff] %vm3198_vm12, %v9322_v62  ;;  %3199 = vst.msk [vmem:[%s7469_s24] sm:$0xff] %vm3198_vm12, %v9323_v24  ;;  %2835 = vrot.lane.b32.xlu1 %v7581_v25, %s4800_s6  ;;  %2833 = vrot.lane.b32.xlu0 %v7579_v38, %s4800_s6  ;;  %v9330_v24 = vld [vmem:[#allocation12_spill] sm:$0xff] }
 0x659   : > { %3392 = vst.msk [vmem:[%s7469_s24] sm:$0xff] %vm3391_vm13, %v9324_v3  ;;  %3393 = vst.msk [vmem:[%s7469_s24 + $0x8] sm:$0xff] %vm3391_vm13, %v9325_v1  ;;  %v9331_v3 = vld [vmem:[#allocation20_spill] sm:$0xff]  ;;  %v9332_v1 = vld [vmem:[#allocation110_spill] sm:$0xff] }
 0x65a   : > { %v2659_v23 = vpop.permute.xlu1 %2658  ;;  %v2657_v19 = vpop.permute.xlu0 %2656  ;;  %3970 = vst.msk [vmem:[%s7469_s24] sm:$0xff] %vm3969_vm14, %v7405_v56  ;;  %3971 = vst.msk [vmem:[%s7469_s24 + $0x8] sm:$0xff] %vm3969_vm14, %v7403_v5 }
 0x65b   : > { %2752 = vst.msk [vmem:[%s7469_s24 + $0x28] sm:$0xff] %vm2748_vm11, %v2659_v23  ;;  %2751 = vst.msk [vmem:[%s7469_s24 + $0x20] sm:$0xff] %vm2748_vm11, %v2657_v19  ;;  %v9333_v23 = vld [vmem:[#allocation64_spill] sm:$0xff] }
 0x65c   : > { %3202 = vst.msk [vmem:[%s7469_s24 + $0x28] sm:$0xff] %vm3198_vm12, %v9326_v13  ;;  %3201 = vst.msk [vmem:[%s7469_s24 + $0x20] sm:$0xff] %vm3198_vm12, %v9327_v57  ;;  %2839 = vrot.lane.b32.xlu1 %v7601_v34, %s4800_s6  ;;  %2837 = vrot.lane.b32.xlu0 %v7599_v46, %s4800_s6  ;;  %v9334_v57 = vld [vmem:[#allocation56_spill] sm:$0xff] }
 0x65d   : > { %3394 = vst.msk [vmem:[%s7469_s24 + $0x20] sm:$0xff] %vm3391_vm13, %v9328_v9  ;;  %3395 = vst.msk [vmem:[%s7469_s24 + $0x28] sm:$0xff] %vm3391_vm13, %v9329_v49  ;;  %v9335_v9 = vld [vmem:[#allocation10_spill] sm:$0xff] }
 0x65e   : > { %v2663_v37 = vpop.permute.xlu1 %2662  ;;  %v2661_v62 = vpop.permute.xlu0 %2660  ;;  %3972 = vst.msk [vmem:[%s7469_s24 + $0x20] sm:$0xff] %vm3969_vm14, %v7409_v40  ;;  %3973 = vst.msk [vmem:[%s7469_s24 + $0x28] sm:$0xff] %vm3969_vm14, %v7407_v50  ;;  %v9336_v49 = vld [vmem:[#allocation86_spill] sm:$0xff] }
 0x65f   : > { %2754 = vst.msk [vmem:[%s7469_s24 + $0x48] sm:$0xff] %vm2748_vm11, %v2663_v37  ;;  %2753 = vst.msk [vmem:[%s7469_s24 + $0x40] sm:$0xff] %vm2748_vm11, %v2661_v62 }
 0x660   : > { %3204 = vst.msk [vmem:[%s7469_s24 + $0x48] sm:$0xff] %vm3198_vm12, %v9330_v24  ;;  %3203 = vst.msk [vmem:[%s7469_s24 + $0x40] sm:$0xff] %vm3198_vm12, %v9331_v3  ;;  %2843 = vrot.lane.b32.xlu1 %v7605_v11, %s4800_s6  ;;  %2841 = vrot.lane.b32.xlu0 %v7603_v27, %s4800_s6 }
 0x661   : > { %3396 = vst.msk [vmem:[%s7469_s24 + $0x40] sm:$0xff] %vm3391_vm13, %v9332_v1  ;;  %3397 = vst.msk [vmem:[%s7469_s24 + $0x48] sm:$0xff] %vm3391_vm13, %v9333_v23  ;;  %v9349_v23 = vld [vmem:[#allocation37_spill] sm:$0xff] }
 0x662   : > { %v2667_v19 = vpop.permute.xlu1 %2666  ;;  %v2665_v13 = vpop.permute.xlu0 %2664  ;;  %3974 = vst.msk [vmem:[%s7469_s24 + $0x40] sm:$0xff] %vm3969_vm14, %v7413_v14  ;;  %3975 = vst.msk [vmem:[%s7469_s24 + $0x48] sm:$0xff] %vm3969_vm14, %v7411_v30 }
 0x663   : > { %2756 = vst.msk [vmem:[%s7469_s24 + $0x68] sm:$0xff] %vm2748_vm11, %v2667_v19  ;;  %2755 = vst.msk [vmem:[%s7469_s24 + $0x60] sm:$0xff] %vm2748_vm11, %v2665_v13  ;;  %v9350_v19 = vld [vmem:[#allocation63_spill] sm:$0xff] }
 0x664   : > { %3206 = vst.msk [vmem:[%s7469_s24 + $0x68] sm:$0xff] %vm3198_vm12, %v9334_v57  ;;  %3205 = vst.msk [vmem:[%s7469_s24 + $0x60] sm:$0xff] %vm3198_vm12, %v9335_v9  ;;  %2912 = vrot.lane.b32.xlu1 %v7475_v60, %s4806_s13  ;;  %2910 = vrot.lane.b32.xlu0 %v7477_v4, %s4806_s13  ;;  %v9337_v60 = vld [vmem:[#allocation16_spill] sm:$0xff]  ;;  %v9353_v9 = vld [vmem:[#allocation85_spill] sm:$0xff] }
 0x665   : > { %3398 = vst.msk [vmem:[%s7469_s24 + $0x60] sm:$0xff] %vm3391_vm13, %v9336_v49  ;;  %3399 = vst.msk [vmem:[%s7469_s24 + $0x68] sm:$0xff] %vm3391_vm13, %v7010_v55  ;;  %v9338_v55 = vld [vmem:[#allocation13_spill] sm:$0xff]  ;;  %v9354_v49 = vld [vmem:[#allocation26_spill] sm:$0xff] }
 0x666   : > { %v2671_v37 = vpop.permute.xlu1 %2670  ;;  %v2669_v62 = vpop.permute.xlu0 %2668  ;;  %3976 = vst.msk [vmem:[%s7469_s24 + $0x60] sm:$0xff] %vm3969_vm14, %v7417_v47  ;;  %3977 = vst.msk [vmem:[%s7469_s24 + $0x68] sm:$0xff] %vm3969_vm14, %v7415_v29 }
 0x667   : > { %2758 = vst.msk [vmem:[%s7469_s24 + $0x88] sm:$0xff] %vm2748_vm11, %v2671_v37  ;;  %2757 = vst.msk [vmem:[%s7469_s24 + $0x80] sm:$0xff] %vm2748_vm11, %v2669_v62 }
 0x668   : > { %3208 = vst.msk [vmem:[%s7469_s24 + $0x88] sm:$0xff] %vm3198_vm12, %v9337_v60  ;;  %3207 = vst.msk [vmem:[%s7469_s24 + $0x80] sm:$0xff] %vm3198_vm12, %v9338_v55  ;;  %2916 = vrot.lane.b32.xlu1 %v7481_v26, %s4806_s13  ;;  %2914 = vrot.lane.b32.xlu0 %v7479_v42, %s4806_s13  ;;  %v9357_v60 = vld [vmem:[#allocation112_spill] sm:$0xff]  ;;  %v9358_v55 = vld [vmem:[#allocation42_spill] sm:$0xff] }
 0x669   : > { %3400 = vst.msk [vmem:[%s7469_s24 + $0x80] sm:$0xff] %vm3391_vm13, %v7012_v52  ;;  %3401 = vst.msk [vmem:[%s7469_s24 + $0x88] sm:$0xff] %vm3391_vm13, %v7032_v45  ;;  %v9339_v52 = vld [vmem:[#allocation19_spill] sm:$0xff]  ;;  %v9340_v45 = vld [vmem:[#allocation17_spill] sm:$0xff] }
 0x66a   : > { %v2675_v4 = vpop.permute.xlu1 %2674  ;;  %v2673_v24 = vpop.permute.xlu0 %2672  ;;  %3978 = vst.msk [vmem:[%s7469_s24 + $0x80] sm:$0xff] %vm3969_vm14, %v7421_v22  ;;  %3979 = vst.msk [vmem:[%s7469_s24 + $0x88] sm:$0xff] %vm3969_vm14, %v7419_v44 }
 0x66b   : > { %2760 = vst.msk [vmem:[%s7469_s24 + $0xa8] sm:$0xff] %vm2748_vm11, %v2675_v4  ;;  %2759 = vst.msk [vmem:[%s7469_s24 + $0xa0] sm:$0xff] %vm2748_vm11, %v2673_v24 }
 0x66c   : > { %3210 = vst.msk [vmem:[%s7469_s24 + $0xa8] sm:$0xff] %vm3198_vm12, %v9339_v52  ;;  %3209 = vst.msk [vmem:[%s7469_s24 + $0xa0] sm:$0xff] %vm3198_vm12, %v9340_v45  ;;  %2920 = vrot.lane.b32.xlu1 %v7485_v35, %s4806_s13  ;;  %2918 = vrot.lane.b32.xlu0 %v7483_v39, %s4806_s13  ;;  %v9361_v52 = vld [vmem:[#allocation66_spill] sm:$0xff]  ;;  %v9362_v45 = vld [vmem:[#allocation88_spill] sm:$0xff] }
 0x66d   : > { %3402 = vst.msk [vmem:[%s7469_s24 + $0xa0] sm:$0xff] %vm3391_vm13, %v7034_v31  ;;  %3403 = vst.msk [vmem:[%s7469_s24 + $0xa8] sm:$0xff] %vm3391_vm13, %v7054_v48  ;;  %v9341_v31 = vld [vmem:[#allocation23_spill] sm:$0xff]  ;;  %v9342_v48 = vld [vmem:[#allocation21_spill] sm:$0xff] }
 0x66e   : > { %v2679_v42 = vpop.permute.xlu1 %2678  ;;  %v2677_v26 = vpop.permute.xlu0 %2676  ;;  %3980 = vst.msk [vmem:[%s7469_s24 + $0xa0] sm:$0xff] %vm3969_vm14, %v7425_v16  ;;  %3981 = vst.msk [vmem:[%s7469_s24 + $0xa8] sm:$0xff] %vm3969_vm14, %v7423_v6 }
 0x66f   : > { %2762 = vst.msk [vmem:[%s7469_s24 + $0xc8] sm:$0xff] %vm2748_vm11, %v2679_v42  ;;  %2761 = vst.msk [vmem:[%s7469_s24 + $0xc0] sm:$0xff] %vm2748_vm11, %v2677_v26 }
 0x670   : > { %3212 = vst.msk [vmem:[%s7469_s24 + $0xc8] sm:$0xff] %vm3198_vm12, %v9341_v31  ;;  %3211 = vst.msk [vmem:[%s7469_s24 + $0xc0] sm:$0xff] %vm3198_vm12, %v9342_v48  ;;  %2924 = vrot.lane.b32.xlu1 %v7489_v63, %s4806_s13  ;;  %2922 = vrot.lane.b32.xlu0 %v7487_v7, %s4806_s13  ;;  %v9345_v7 = vld [vmem:[#allocation113_spill] sm:$0xff]  ;;  %v9346_v63 = vld [vmem:[#allocation28_spill] sm:$0xff] }
 0x671   : > { %3404 = vst.msk [vmem:[%s7469_s24 + $0xc0] sm:$0xff] %vm3391_vm13, %v7056_v12  ;;  %3405 = vst.msk [vmem:[%s7469_s24 + $0xc8] sm:$0xff] %vm3391_vm13, %v7076_v28  ;;  %v9343_v12 = vld [vmem:[#allocation7_spill] sm:$0xff]  ;;  %v9344_v28 = vld [vmem:[#allocation78_spill] sm:$0xff] }
 0x672   : > { %v2683_v39 = vpop.permute.xlu1 %2682  ;;  %v2681_v35 = vpop.permute.xlu0 %2680  ;;  %3982 = vst.msk [vmem:[%s7469_s24 + $0xc0] sm:$0xff] %vm3969_vm14, %v7429_v61  ;;  %3983 = vst.msk [vmem:[%s7469_s24 + $0xc8] sm:$0xff] %vm3969_vm14, %v7427_v21  ;;  %v9365_v31 = vld [vmem:[#allocation32_spill] sm:$0xff]  ;;  %v9366_v48 = vld [vmem:[#allocation115_spill] sm:$0xff] }
 0x673   : > { %2764 = vst.msk [vmem:[%s7469_s24 + $0xe8] sm:$0xff] %vm2748_vm11, %v2683_v39  ;;  %2763 = vst.msk [vmem:[%s7469_s24 + $0xe0] sm:$0xff] %vm2748_vm11, %v2681_v35 }
 0x674   : > { %3214 = vst.msk [vmem:[%s7469_s24 + $0xe8] sm:$0xff] %vm3198_vm12, %v9343_v12  ;;  %3213 = vst.msk [vmem:[%s7469_s24 + $0xe0] sm:$0xff] %vm3198_vm12, %v9344_v28  ;;  %2928 = vrot.lane.b32.xlu1 %v7495_v10, %s4806_s13  ;;  %2926 = vrot.lane.b32.xlu0 %v7493_v15, %s4806_s13  ;;  %v9347_v10 = vld [vmem:[#allocation127_spill] sm:$0xff]  ;;  %v9369_v12 = vld [vmem:[#allocation41_spill] sm:$0xff] }
 0x675   : > { %3407 = vst.msk [vmem:[%s7469_s24 + $0xe8] sm:$0xff] %vm3391_vm13, %v9345_v7  ;;  %3406 = vst.msk [vmem:[%s7469_s24 + $0xe0] sm:$0xff] %vm3391_vm13, %v9346_v63  ;;  %v9348_v15 = vld [vmem:[#allocation43_spill] sm:$0xff]  ;;  %v9370_v28 = vld [vmem:[#allocation65_spill] sm:$0xff] }
 0x676   : > { %v2687_v3 = vpop.permute.xlu1 %2686  ;;  %v2685_v1 = vpop.permute.xlu0 %2684 }
 0x677   : > { %2766 = vst.msk [vmem:[%s7469_s24 + $0x108] sm:$0xff] %vm2748_vm11, %v2687_v3  ;;  %2765 = vst.msk [vmem:[%s7469_s24 + $0x100] sm:$0xff] %vm2748_vm11, %v2685_v1  ;;  %v9373_v3 = vld [vmem:[#allocation87_spill] sm:$0xff]  ;;  %v9374_v1 = vld [vmem:[#allocation30_spill] sm:$0xff] }
 0x678   : > { %3216 = vst.msk [vmem:[%s7469_s24 + $0x108] sm:$0xff] %vm3198_vm12, %v9347_v10  ;;  %3215 = vst.msk [vmem:[%s7469_s24 + $0x100] sm:$0xff] %vm3198_vm12, %v9348_v15  ;;  %2932 = vrot.lane.b32.xlu1 %v7499_v8, %s4806_s13  ;;  %2930 = vrot.lane.b32.xlu0 %v7497_v54, %s4806_s13  ;;  %v9351_v8 = vld [vmem:[#allocation5_spill] sm:$0xff]  ;;  %v9352_v54 = vld [vmem:[#allocation27_spill] sm:$0xff] }
 0x679   : > { %3408 = vst.msk [vmem:[%s7469_s24 + $0x100] sm:$0xff] %vm3391_vm13, %v9349_v23  ;;  %3409 = vst.msk [vmem:[%s7469_s24 + $0x108] sm:$0xff] %vm3391_vm13, %v9350_v19  ;;  %v9375_v23 = vld [vmem:[#allocation62_spill] sm:$0xff]  ;;  %v9378_v19 = vld [vmem:[#allocation45_spill] sm:$0xff] }
 0x67a   : > { %v2691_v13 = vpop.permute.xlu1 %2690  ;;  %v2689_v57 = vpop.permute.xlu0 %2688 }
 0x67b   : > { %2768 = vst.msk [vmem:[%s7469_s24 + $0x128] sm:$0xff] %vm2748_vm11, %v2691_v13  ;;  %2767 = vst.msk [vmem:[%s7469_s24 + $0x120] sm:$0xff] %vm2748_vm11, %v2689_v57 }
 0x67c   : > { %3218 = vst.msk [vmem:[%s7469_s24 + $0x128] sm:$0xff] %vm3198_vm12, %v9351_v8  ;;  %3217 = vst.msk [vmem:[%s7469_s24 + $0x120] sm:$0xff] %vm3198_vm12, %v9352_v54  ;;  %2936 = vrot.lane.b32.xlu1 %v7517_v58, %s4806_s13  ;;  %2934 = vrot.lane.b32.xlu0 %v7515_v36, %s4806_s13  ;;  %v9355_v58 = vld [vmem:[#allocation80_spill] sm:$0xff]  ;;  %v9356_v36 = vld [vmem:[#allocation58_spill] sm:$0xff] }
 0x67d   : > { %3410 = vst.msk [vmem:[%s7469_s24 + $0x120] sm:$0xff] %vm3391_vm13, %v9353_v9  ;;  %3411 = vst.msk [vmem:[%s7469_s24 + $0x128] sm:$0xff] %vm3391_vm13, %v9354_v49 }
 0x67e   : > { %v2695_v37 = vpop.permute.xlu1 %2694  ;;  %v2693_v62 = vpop.permute.xlu0 %2692 }
 0x67f   : > { %2770 = vst.msk [vmem:[%s7469_s24 + $0x148] sm:$0xff] %vm2748_vm11, %v2695_v37  ;;  %2769 = vst.msk [vmem:[%s7469_s24 + $0x140] sm:$0xff] %vm2748_vm11, %v2693_v62  ;;  %v8166_v37 = vld [vmem:[%s7271_s12 + $0x98] sm:$0xff]  ;;  %v8169_v62 = vld [vmem:[%s7271_s12 + $0x90] sm:$0xff] }
 0x680   : > { %3220 = vst.msk [vmem:[%s7469_s24 + $0x148] sm:$0xff] %vm3198_vm12, %v9355_v58  ;;  %3219 = vst.msk [vmem:[%s7469_s24 + $0x140] sm:$0xff] %vm3198_vm12, %v9356_v36  ;;  %2940 = vrot.lane.b32.xlu1 %v7521_v53, %s4806_s13  ;;  %2938 = vrot.lane.b32.xlu0 %v7519_v0, %s4806_s13  ;;  %v9359_v53 = vld [vmem:[#allocation25_spill] sm:$0xff]  ;;  %v9360_v0 = vld [vmem:[#allocation11_spill] sm:$0xff] }
 0x681   : > { %3412 = vst.msk [vmem:[%s7469_s24 + $0x140] sm:$0xff] %vm3391_vm13, %v9357_v60  ;;  %3413 = vst.msk [vmem:[%s7469_s24 + $0x148] sm:$0xff] %vm3391_vm13, %v9358_v55  ;;  %v8180_v60 = vld [vmem:[%s7271_s12 + $0xa8] sm:$0xff]  ;;  %v8183_v55 = vld [vmem:[%s7271_s12 + $0xa0] sm:$0xff] }
 0x682   : > { %v2699_v4 = vpop.permute.xlu1 %2698  ;;  %v2697_v24 = vpop.permute.xlu0 %2696 }
 0x683   : > { %2772 = vst.msk [vmem:[%s7469_s24 + $0x168] sm:$0xff] %vm2748_vm11, %v2699_v4  ;;  %2771 = vst.msk [vmem:[%s7469_s24 + $0x160] sm:$0xff] %vm2748_vm11, %v2697_v24 }
 0x684   : > { %3222 = vst.msk [vmem:[%s7469_s24 + $0x168] sm:$0xff] %vm3198_vm12, %v9359_v53  ;;  %3221 = vst.msk [vmem:[%s7469_s24 + $0x160] sm:$0xff] %vm3198_vm12, %v9360_v0  ;;  %2944 = vrot.lane.b32.xlu1 %v7537_v51, %s4806_s13  ;;  %2942 = vrot.lane.b32.xlu0 %v7535_v43, %s4806_s13  ;;  %v9363_v51 = vld [vmem:[#allocation106_spill] sm:$0xff]  ;;  %v9364_v43 = vld [vmem:[#allocation57_spill] sm:$0xff] }
 0x685   : > { %3414 = vst.msk [vmem:[%s7469_s24 + $0x160] sm:$0xff] %vm3391_vm13, %v9361_v52  ;;  %3415 = vst.msk [vmem:[%s7469_s24 + $0x168] sm:$0xff] %vm3391_vm13, %v9362_v45  ;;  %v8194_v53 = vld [vmem:[%s7271_s12 + $0xb8] sm:$0xff]  ;;  %v8197_v0 = vld [vmem:[%s7271_s12 + $0xb0] sm:$0xff] }
 0x686   : > { %v2703_v42 = vpop.permute.xlu1 %2702  ;;  %v2701_v26 = vpop.permute.xlu0 %2700 }
 0x687   : > { %2774 = vst.msk [vmem:[%s7469_s24 + $0x188] sm:$0xff] %vm2748_vm11, %v2703_v42  ;;  %2773 = vst.msk [vmem:[%s7469_s24 + $0x180] sm:$0xff] %vm2748_vm11, %v2701_v26  ;;  %v8208_v42 = vld [vmem:[%s7271_s12 + $0xc8] sm:$0xff]  ;;  %v8211_v26 = vld [vmem:[%s7271_s12 + $0xc0] sm:$0xff] }
 0x688   : > { %3224 = vst.msk [vmem:[%s7469_s24 + $0x188] sm:$0xff] %vm3198_vm12, %v9363_v51  ;;  %3223 = vst.msk [vmem:[%s7469_s24 + $0x180] sm:$0xff] %vm3198_vm12, %v9364_v43  ;;  %2948 = vrot.lane.b32.xlu1 %v7541_v2, %s4806_s13  ;;  %2946 = vrot.lane.b32.xlu0 %v7539_v18, %s4806_s13  ;;  %v9367_v2 = vld [vmem:[#allocation18_spill] sm:$0xff]  ;;  %v9368_v18 = vld [vmem:[#allocation31_spill] sm:$0xff] }
 0x689   : > { %3416 = vst.msk [vmem:[%s7469_s24 + $0x180] sm:$0xff] %vm3391_vm13, %v9365_v31  ;;  %3417 = vst.msk [vmem:[%s7469_s24 + $0x188] sm:$0xff] %vm3391_vm13, %v9366_v48  ;;  %v8222_v31 = vld [vmem:[%s7271_s12 + $0xd8] sm:$0xff]  ;;  %v8225_v48 = vld [vmem:[%s7271_s12 + $0xd0] sm:$0xff] }
 0x68a   : > { %v2707_v39 = vpop.permute.xlu1 %2706  ;;  %v2705_v35 = vpop.permute.xlu0 %2704 }
 0x68b   : > { %2776 = vst.msk [vmem:[%s7469_s24 + $0x1a8] sm:$0xff] %vm2748_vm11, %v2707_v39  ;;  %2775 = vst.msk [vmem:[%s7469_s24 + $0x1a0] sm:$0xff] %vm2748_vm11, %v2705_v35 }
 0x68c   : > { %3226 = vst.msk [vmem:[%s7469_s24 + $0x1a8] sm:$0xff] %vm3198_vm12, %v9367_v2  ;;  %3225 = vst.msk [vmem:[%s7469_s24 + $0x1a0] sm:$0xff] %vm3198_vm12, %v9368_v18  ;;  %2952 = vrot.lane.b32.xlu1 %v7557_v32, %s4806_s13  ;;  %2950 = vrot.lane.b32.xlu0 %v7555_v59, %s4806_s13  ;;  %v9371_v32 = vld [vmem:[#allocation81_spill] sm:$0xff] }
 0x68d   : > { %3418 = vst.msk [vmem:[%s7469_s24 + $0x1a0] sm:$0xff] %vm3391_vm13, %v9369_v12  ;;  %3419 = vst.msk [vmem:[%s7469_s24 + $0x1a8] sm:$0xff] %vm3391_vm13, %v9370_v28  ;;  %v9372_v59 = vld [vmem:[#allocation109_spill] sm:$0xff]  ;;  %v8236_v2 = vld [vmem:[%s7271_s12 + $0xe8] sm:$0xff] }
 0x68e   : > { %v2711_v7 = vpop.permute.xlu1 %2710  ;;  %v2709_v63 = vpop.permute.xlu0 %2708  ;;  %v8239_v18 = vld [vmem:[%s7271_s12 + $0xe0] sm:$0xff] }
 0x68f   : > { %2778 = vst.msk [vmem:[%s7469_s24 + $0x1c8] sm:$0xff] %vm2748_vm11, %v2711_v7  ;;  %2777 = vst.msk [vmem:[%s7469_s24 + $0x1c0] sm:$0xff] %vm2748_vm11, %v2709_v63  ;;  %v8250_v7 = vld [vmem:[%s7271_s12 + $0xf8] sm:$0xff]  ;;  %v8253_v63 = vld [vmem:[%s7271_s12 + $0xf0] sm:$0xff] }
 0x690   : > { %3228 = vst.msk [vmem:[%s7469_s24 + $0x1c8] sm:$0xff] %vm3198_vm12, %v9371_v32  ;;  %3227 = vst.msk [vmem:[%s7469_s24 + $0x1c0] sm:$0xff] %vm3198_vm12, %v9372_v59  ;;  %2956 = vrot.lane.b32.xlu1 %v7561_v20, %s4806_s13  ;;  %2954 = vrot.lane.b32.xlu0 %v7559_v41, %s4806_s13  ;;  %v9376_v20 = vld [vmem:[#allocation15_spill] sm:$0xff]  ;;  %v9377_v41 = vld [vmem:[#allocation114_spill] sm:$0xff] }
 0x691   : > { %3420 = vst.msk [vmem:[%s7469_s24 + $0x1c0] sm:$0xff] %vm3391_vm13, %v9373_v3  ;;  %3421 = vst.msk [vmem:[%s7469_s24 + $0x1c8] sm:$0xff] %vm3391_vm13, %v9374_v1 }
 0x692   : > { %v2715_v10 = vpop.permute.xlu1 %2714  ;;  %v2713_v15 = vpop.permute.xlu0 %2712 }
 0x693   : > { %2780 = vst.msk [vmem:[%s7469_s24 + $0x1e8] sm:$0xff] %vm2748_vm11, %v2715_v10  ;;  %2779 = vst.msk [vmem:[%s7469_s24 + $0x1e0] sm:$0xff] %vm2748_vm11, %v2713_v15  ;;  %v4769_v10 = vld [vmem:[%s7271_s12 + $0x8] sm:$0xff]  ;;  %v4770_v15 = vld [vmem:[%s7271_s12] sm:$0xff] }
 0x694   : > { %3230 = vst.msk [vmem:[%s7469_s24 + $0x1e8] sm:$0xff] %vm3198_vm12, %v9375_v23  ;;  %3229 = vst.msk [vmem:[%s7469_s24 + $0x1e0] sm:$0xff] %vm3198_vm12, %v9376_v20  ;;  %2960 = vrot.lane.b32.xlu1 %v7577_v17, %s4806_s13  ;;  %2958 = vrot.lane.b32.xlu0 %v7575_v33, %s4806_s13 }
 0x695   : > { %3422 = vst.msk [vmem:[%s7469_s24 + $0x1e0] sm:$0xff] %vm3391_vm13, %v9377_v41  ;;  %3423 = vst.msk [vmem:[%s7469_s24 + $0x1e8] sm:$0xff] %vm3391_vm13, %v9378_v19  ;;  %v4771_v41 = vld [vmem:[%s7271_s12 + $0x18] sm:$0xff]  ;;  %v4772_v19 = vld [vmem:[%s7271_s12 + $0x10] sm:$0xff] }
 0x696   : > { %v2784_v13 = vpop.permute.xlu1 %2783  ;;  %v2782_v57 = vpop.permute.xlu0 %2781 }
 0x697   : > { %4320 = vst.msk [vmem:[%s7469_s24 + $0x18] sm:$0xff] %vm238_vm0, %v2784_v13  ;;  %4319 = vst.msk [vmem:[%s7469_s24 + $0x10] sm:$0xff] %vm238_vm0, %v2782_v57 }
 0x698   : > { %2964 = vrot.lane.b32.xlu1 %v7581_v25, %s4806_s13  ;;  %2962 = vrot.lane.b32.xlu0 %v7579_v38, %s4806_s13  ;;  %v8138_v38 = vld [vmem:[%s7271_s12 + $0x78] sm:$0xff] }
 0x69a   : > { %v2788_v33 = vpop.permute.xlu1 %2787  ;;  %v2786_v17 = vpop.permute.xlu0 %2785 }
 0x69b   : > { %4322 = vst.msk [vmem:[%s7469_s24 + $0x38] sm:$0xff] %vm238_vm0, %v2788_v33  ;;  %4321 = vst.msk [vmem:[%s7469_s24 + $0x30] sm:$0xff] %vm238_vm0, %v2786_v17  ;;  %v4773_v33 = vld [vmem:[%s7271_s12 + $0x28] sm:$0xff]  ;;  %v4774_v17 = vld [vmem:[%s7271_s12 + $0x20] sm:$0xff] }
 0x69c   : > { %2968 = vrot.lane.b32.xlu1 %v7601_v34, %s4806_s13  ;;  %2966 = vrot.lane.b32.xlu0 %v7599_v46, %s4806_s13  ;;  %v8141_v34 = vld [vmem:[%s7271_s12 + $0x70] sm:$0xff] }
 0x69e   : > { %v2792_v25 = vpop.permute.xlu1 %2791  ;;  %v2790_v8 = vpop.permute.xlu0 %2789 }
 0x69f   : > { %4324 = vst.msk [vmem:[%s7469_s24 + $0x58] sm:$0xff] %vm238_vm0, %v2792_v25  ;;  %4323 = vst.msk [vmem:[%s7469_s24 + $0x50] sm:$0xff] %vm238_vm0, %v2790_v8 }
 0x6a0   : > { %2972 = vrot.lane.b32.xlu1 %v7605_v11, %s4806_s13  ;;  %2970 = vrot.lane.b32.xlu0 %v7603_v27, %s4806_s13  ;;  %v8152_v27 = vld [vmem:[%s7271_s12 + $0x88] sm:$0xff]  ;;  %v8155_v11 = vld [vmem:[%s7271_s12 + $0x80] sm:$0xff] }
 0x6a2   : > { %v2796_v46 = vpop.permute.xlu1 %2795  ;;  %v2794_v54 = vpop.permute.xlu0 %2793 }
 0x6a3   : > { %4326 = vst.msk [vmem:[%s7469_s24 + $0x78] sm:$0xff] %vm238_vm0, %v2796_v46  ;;  %4325 = vst.msk [vmem:[%s7469_s24 + $0x70] sm:$0xff] %vm238_vm0, %v2794_v54  ;;  %v4775_v46 = vld [vmem:[%s7271_s12 + $0x38] sm:$0xff]  ;;  %v4776_v54 = vld [vmem:[%s7271_s12 + $0x30] sm:$0xff] }
 0x6a4   : > { %3903 = vrot.lane.b32.xlu1 %v8138_v38, %s4804_s18  ;;  %3901 = vrot.lane.b32.xlu0 %v8141_v34, %s4804_s18 }
 0x6a6   : > { %v2800_v9 = vpop.permute.xlu1 %2799  ;;  %v2798_v49 = vpop.permute.xlu0 %2797 }
 0x6a7   : > { %4328 = vst.msk [vmem:[%s7469_s24 + $0x98] sm:$0xff] %vm238_vm0, %v2800_v9  ;;  %4327 = vst.msk [vmem:[%s7469_s24 + $0x90] sm:$0xff] %vm238_vm0, %v2798_v49 }
 0x6a8   : > { %3907 = vrot.lane.b32.xlu1 %v8152_v27, %s4804_s18  ;;  %3905 = vrot.lane.b32.xlu0 %v8155_v11, %s4804_s18 }
 0x6aa   : > { %v2804_v58 = vpop.permute.xlu1 %2803  ;;  %v2802_v36 = vpop.permute.xlu0 %2801 }
 0x6ab   : > { %4330 = vst.msk [vmem:[%s7469_s24 + $0xb8] sm:$0xff] %vm238_vm0, %v2804_v58  ;;  %4329 = vst.msk [vmem:[%s7469_s24 + $0xb0] sm:$0xff] %vm238_vm0, %v2802_v36  ;;  %v9379_v58 = vld [vmem:[#allocation90_spill] sm:$0xff]  ;;  %v9380_v36 = vld [vmem:[#allocation68_spill] sm:$0xff] }
 0x6ac   : > { %3911 = vrot.lane.b32.xlu1 %v8166_v37, %s4804_s18  ;;  %3909 = vrot.lane.b32.xlu0 %v8169_v62, %s4804_s18 }
 0x6ae   : > { %v2808_v4 = vpop.permute.xlu1 %2807  ;;  %v2806_v24 = vpop.permute.xlu0 %2805 }
 0x6af   : > { %4332 = vst.msk [vmem:[%s7469_s24 + $0xd8] sm:$0xff] %vm238_vm0, %v2808_v4  ;;  %4331 = vst.msk [vmem:[%s7469_s24 + $0xd0] sm:$0xff] %vm238_vm0, %v2806_v24  ;;  %v4777_v4 = vld [vmem:[%s7271_s12 + $0x48] sm:$0xff]  ;;  %v4778_v24 = vld [vmem:[%s7271_s12 + $0x40] sm:$0xff] }
 0x6b0   : > { %3915 = vrot.lane.b32.xlu1 %v8180_v60, %s4804_s18  ;;  %3913 = vrot.lane.b32.xlu0 %v8183_v55, %s4804_s18 }
 0x6b2   : > { %v2812_v52 = vpop.permute.xlu1 %2811  ;;  %v2810_v45 = vpop.permute.xlu0 %2809 }
 0x6b3   : > { %4334 = vst.msk [vmem:[%s7469_s24 + $0xf8] sm:$0xff] %vm238_vm0, %v2812_v52  ;;  %4333 = vst.msk [vmem:[%s7469_s24 + $0xf0] sm:$0xff] %vm238_vm0, %v2810_v45  ;;  %v9381_v52 = vld [vmem:[#allocation102_spill] sm:$0xff]  ;;  %v9382_v45 = vld [vmem:[#allocation123_spill] sm:$0xff] }
 0x6b4   : > { %3919 = vrot.lane.b32.xlu1 %v8194_v53, %s4804_s18  ;;  %3917 = vrot.lane.b32.xlu0 %v8197_v0, %s4804_s18 }
 0x6b6   : > { %v2816_v51 = vpop.permute.xlu1 %2815  ;;  %v2814_v43 = vpop.permute.xlu0 %2813 }
 0x6b7   : > { %4336 = vst.msk [vmem:[%s7469_s24 + $0x118] sm:$0xff] %vm238_vm0, %v2816_v51  ;;  %4335 = vst.msk [vmem:[%s7469_s24 + $0x110] sm:$0xff] %vm238_vm0, %v2814_v43 }
 0x6b8   : > { %3923 = vrot.lane.b32.xlu1 %v8208_v42, %s4804_s18  ;;  %3921 = vrot.lane.b32.xlu0 %v8211_v26, %s4804_s18 }
 0x6ba   : > { %v2820_v39 = vpop.permute.xlu1 %2819  ;;  %v2818_v35 = vpop.permute.xlu0 %2817 }
 0x6bb   : > { %4338 = vst.msk [vmem:[%s7469_s24 + $0x138] sm:$0xff] %vm238_vm0, %v2820_v39  ;;  %4337 = vst.msk [vmem:[%s7469_s24 + $0x130] sm:$0xff] %vm238_vm0, %v2818_v35  ;;  %v9383_v39 = vld [vmem:[#allocation117_spill] sm:$0xff]  ;;  %v9384_v35 = vld [vmem:[#allocation36_spill] sm:$0xff] }
 0x6bc   : > { %3927 = vrot.lane.b32.xlu1 %v8222_v31, %s4804_s18  ;;  %3925 = vrot.lane.b32.xlu0 %v8225_v48, %s4804_s18 }
 0x6be   : > { %v2824_v12 = vpop.permute.xlu1 %2823  ;;  %v2822_v28 = vpop.permute.xlu0 %2821 }
 0x6bf   : > { %4340 = vst.msk [vmem:[%s7469_s24 + $0x158] sm:$0xff] %vm238_vm0, %v2824_v12  ;;  %4339 = vst.msk [vmem:[%s7469_s24 + $0x150] sm:$0xff] %vm238_vm0, %v2822_v28  ;;  %v4779_v12 = vld [vmem:[%s7271_s12 + $0x58] sm:$0xff]  ;;  %v9386_v28 = vld [vmem:[#allocation73_spill] sm:$0xff] }
 0x6c0   : > { %3931 = vrot.lane.b32.xlu1 %v8236_v2, %s4804_s18  ;;  %3929 = vrot.lane.b32.xlu0 %v8239_v18, %s4804_s18 }
 0x6c2   : > { %v2828_v32 = vpop.permute.xlu1 %2827  ;;  %v2826_v59 = vpop.permute.xlu0 %2825 }
 0x6c3   : > { %4342 = vst.msk [vmem:[%s7469_s24 + $0x178] sm:$0xff] %vm238_vm0, %v2828_v32  ;;  %4341 = vst.msk [vmem:[%s7469_s24 + $0x170] sm:$0xff] %vm238_vm0, %v2826_v59 }
 0x6c4   : > { %3935 = vrot.lane.b32.xlu1 %v8250_v7, %s4804_s18  ;;  %3933 = vrot.lane.b32.xlu0 %v8253_v63, %s4804_s18 }
 0x6c6   : > { %v2832_v3 = vpop.permute.xlu1 %2831  ;;  %v2830_v1 = vpop.permute.xlu0 %2829 }
 0x6c7   : > { %4344 = vst.msk [vmem:[%s7469_s24 + $0x198] sm:$0xff] %vm238_vm0, %v2832_v3  ;;  %4343 = vst.msk [vmem:[%s7469_s24 + $0x190] sm:$0xff] %vm238_vm0, %v2830_v1  ;;  %v9387_v3 = vld [vmem:[#allocation67_spill] sm:$0xff]  ;;  %v9388_v1 = vld [vmem:[#allocation44_spill] sm:$0xff] }
 0x6c8   : > { %4004 = vrot.lane.b32.xlu1 %v4769_v10, %s4807_s14  ;;  %4002 = vrot.lane.b32.xlu0 %v4770_v15, %s4807_s14  ;;  %v4781_v10 = vld [vmem:[%s7271_s12 + $0x68] sm:$0xff]  ;;  %v9390_v15 = vld [vmem:[#allocation101_spill] sm:$0xff] }
 0x6ca   : > { %v2836_v23 = vpop.permute.xlu1 %2835  ;;  %v2834_v20 = vpop.permute.xlu0 %2833 }
 0x6cb   : > { %4346 = vst.msk [vmem:[%s7469_s24 + $0x1b8] sm:$0xff] %vm238_vm0, %v2836_v23  ;;  %4345 = vst.msk [vmem:[%s7469_s24 + $0x1b0] sm:$0xff] %vm238_vm0, %v2834_v20 }
 0x6cc   : > { %4008 = vrot.lane.b32.xlu1 %v4771_v41, %s4807_s14  ;;  %4006 = vrot.lane.b32.xlu0 %v4772_v19, %s4807_s14  ;;  %v9391_v41 = vld [vmem:[#allocation34_spill] sm:$0xff]  ;;  %v9392_v19 = vld [vmem:[#allocation89_spill] sm:$0xff] }
 0x6ce   : > { %v2840_v13 = vpop.permute.xlu1 %2839  ;;  %v2838_v57 = vpop.permute.xlu0 %2837 }
 0x6cf   : > { %4348 = vst.msk [vmem:[%s7469_s24 + $0x1d8] sm:$0xff] %vm238_vm0, %v2840_v13  ;;  %4347 = vst.msk [vmem:[%s7469_s24 + $0x1d0] sm:$0xff] %vm238_vm0, %v2838_v57 }
 0x6d0   : > { %4012 = vrot.lane.b32.xlu1 %v4773_v33, %s4807_s14  ;;  %4010 = vrot.lane.b32.xlu0 %v4774_v17, %s4807_s14 }
 0x6d2   : > { %v2844_v25 = vpop.permute.xlu1 %2843  ;;  %v2842_v8 = vpop.permute.xlu0 %2841 }
 0x6d3   : > { %4350 = vst.msk [vmem:[%s7469_s24 + $0x1f8] sm:$0xff] %vm238_vm0, %v2844_v25  ;;  %4349 = vst.msk [vmem:[%s7469_s24 + $0x1f0] sm:$0xff] %vm238_vm0, %v2842_v8 }
 0x6d4   : > { %4016 = vrot.lane.b32.xlu1 %v4775_v46, %s4807_s14  ;;  %4014 = vrot.lane.b32.xlu0 %v4776_v54, %s4807_s14 }
 0x6d6   : > { %v2913_v9 = vpop.permute.xlu1 %2912  ;;  %v2911_v49 = vpop.permute.xlu0 %2910 }
 0x6d7   : > { %4352 = vst.msk [vmem:[%s7469_s24 + $0x18] sm:$0xff] %vm2748_vm11, %v2913_v9  ;;  %4351 = vst.msk [vmem:[%s7469_s24 + $0x10] sm:$0xff] %vm2748_vm11, %v2911_v49 }
 0x6d8   : > { %4416 = vst.msk [vmem:[%s7469_s24 + $0x18] sm:$0xff] %vm3198_vm12, %v9379_v58  ;;  %4415 = vst.msk [vmem:[%s7469_s24 + $0x10] sm:$0xff] %vm3198_vm12, %v9380_v36  ;;  %4020 = vrot.lane.b32.xlu1 %v4777_v4, %s4807_s14  ;;  %4018 = vrot.lane.b32.xlu0 %v4778_v24, %s4807_s14  ;;  %v9413_v58 = vld [vmem:[#allocation55_spill] sm:$0xff]  ;;  %v9414_v36 = vld [vmem:[#allocation124_spill] sm:$0xff] }
 0x6d9   : > { %4479 = vst.msk [vmem:[%s7469_s24 + $0x10] sm:$0xff] %vm3391_vm13, %v9381_v52  ;;  %4480 = vst.msk [vmem:[%s7469_s24 + $0x18] sm:$0xff] %vm3391_vm13, %v9382_v45  ;;  %v9417_v52 = vld [vmem:[#allocation4_spill] sm:$0xff]  ;;  %v9418_v45 = vld [vmem:[#allocation77_spill] sm:$0xff] }
 0x6da   : > { %v2917_v51 = vpop.permute.xlu1 %2916  ;;  %v2915_v43 = vpop.permute.xlu0 %2914  ;;  %4511 = vst.msk [vmem:[%s7469_s24 + $0x10] sm:$0xff] %vm3969_vm14, %v7405_v56  ;;  %4512 = vst.msk [vmem:[%s7469_s24 + $0x18] sm:$0xff] %vm3969_vm14, %v7403_v5  ;;  %v4780_v56 = vld [vmem:[%s7271_s12 + $0x50] sm:$0xff]  ;;  %v9385_v5 = vld [vmem:[#allocation50_spill] sm:$0xff] }
 0x6db   : > { %4354 = vst.msk [vmem:[%s7469_s24 + $0x38] sm:$0xff] %vm2748_vm11, %v2917_v51  ;;  %4353 = vst.msk [vmem:[%s7469_s24 + $0x30] sm:$0xff] %vm2748_vm11, %v2915_v43 }
 0x6dc   : > { %4418 = vst.msk [vmem:[%s7469_s24 + $0x38] sm:$0xff] %vm3198_vm12, %v9383_v39  ;;  %4417 = vst.msk [vmem:[%s7469_s24 + $0x30] sm:$0xff] %vm3198_vm12, %v9384_v35  ;;  %4024 = vrot.lane.b32.xlu1 %v4779_v12, %s4807_s14  ;;  %4022 = vrot.lane.b32.xlu0 %v4780_v56, %s4807_s14  ;;  %v9421_v39 = vld [vmem:[#allocation126_spill] sm:$0xff]  ;;  %v9422_v35 = vld [vmem:[#allocation105_spill] sm:$0xff] }
 0x6dd   : > { %4481 = vst.msk [vmem:[%s7469_s24 + $0x30] sm:$0xff] %vm3391_vm13, %v9385_v5  ;;  %4482 = vst.msk [vmem:[%s7469_s24 + $0x38] sm:$0xff] %vm3391_vm13, %v9386_v28  ;;  %v9425_v5 = vld [vmem:[#allocation128_spill] sm:$0xff]  ;;  %v9426_v28 = vld [vmem:[#allocation3_spill] sm:$0xff] }
 0x6de   : > { %v2921_v32 = vpop.permute.xlu1 %2920  ;;  %v2919_v59 = vpop.permute.xlu0 %2918  ;;  %4513 = vst.msk [vmem:[%s7469_s24 + $0x30] sm:$0xff] %vm3969_vm14, %v7409_v40  ;;  %4514 = vst.msk [vmem:[%s7469_s24 + $0x38] sm:$0xff] %vm3969_vm14, %v7407_v50  ;;  %v4782_v40 = vld [vmem:[%s7271_s12 + $0x60] sm:$0xff]  ;;  %v9389_v50 = vld [vmem:[#allocation95_spill] sm:$0xff] }
 0x6df   : > { %4356 = vst.msk [vmem:[%s7469_s24 + $0x58] sm:$0xff] %vm2748_vm11, %v2921_v32  ;;  %4355 = vst.msk [vmem:[%s7469_s24 + $0x50] sm:$0xff] %vm2748_vm11, %v2919_v59 }
 0x6e0   : > { %4420 = vst.msk [vmem:[%s7469_s24 + $0x58] sm:$0xff] %vm3198_vm12, %v9387_v3  ;;  %4419 = vst.msk [vmem:[%s7469_s24 + $0x50] sm:$0xff] %vm3198_vm12, %v9388_v1  ;;  %4028 = vrot.lane.b32.xlu1 %v4781_v10, %s4807_s14  ;;  %4026 = vrot.lane.b32.xlu0 %v4782_v40, %s4807_s14  ;;  %v9429_v3 = vld [vmem:[#allocation130_spill] sm:$0xff]  ;;  %v9430_v1 = vld [vmem:[#allocation129_spill] sm:$0xff] }
 0x6e1   : > { %4483 = vst.msk [vmem:[%s7469_s24 + $0x50] sm:$0xff] %vm3391_vm13, %v9389_v50  ;;  %4484 = vst.msk [vmem:[%s7469_s24 + $0x58] sm:$0xff] %vm3391_vm13, %v9390_v15  ;;  %v9431_v50 = vld [vmem:[#allocation99_spill] sm:$0xff]  ;;  %v9432_v15 = vld [vmem:[#allocation93_spill] sm:$0xff] }
 0x6e2   : > { %v2925_v23 = vpop.permute.xlu1 %2924  ;;  %v2923_v20 = vpop.permute.xlu0 %2922  ;;  %4515 = vst.msk [vmem:[%s7469_s24 + $0x50] sm:$0xff] %vm3969_vm14, %v7413_v14  ;;  %4516 = vst.msk [vmem:[%s7469_s24 + $0x58] sm:$0xff] %vm3969_vm14, %v7411_v30  ;;  %v9393_v14 = vld [vmem:[#allocation122_spill] sm:$0xff]  ;;  %v9394_v30 = vld [vmem:[#allocation53_spill] sm:$0xff] }
 0x6e3   : > { %4358 = vst.msk [vmem:[%s7469_s24 + $0x78] sm:$0xff] %vm2748_vm11, %v2925_v23  ;;  %4357 = vst.msk [vmem:[%s7469_s24 + $0x70] sm:$0xff] %vm2748_vm11, %v2923_v20  ;;  %v9433_v23 = vld [vmem:[#allocation132_spill] sm:$0xff]  ;;  %v9434_v20 = vld [vmem:[#allocation131_spill] sm:$0xff] }
 0x6e4   : > { %4422 = vst.msk [vmem:[%s7469_s24 + $0x78] sm:$0xff] %vm3198_vm12, %v9391_v41  ;;  %4421 = vst.msk [vmem:[%s7469_s24 + $0x70] sm:$0xff] %vm3198_vm12, %v9392_v19  ;;  %4032 = vrot.lane.b32.xlu1 %v8138_v38, %s4807_s14  ;;  %4030 = vrot.lane.b32.xlu0 %v8141_v34, %s4807_s14  ;;  %v9395_v38 = vld [vmem:[#allocation47_spill] sm:$0xff]  ;;  %v9396_v34 = vld [vmem:[#allocation116_spill] sm:$0xff] }
 0x6e5   : > { %4485 = vst.msk [vmem:[%s7469_s24 + $0x70] sm:$0xff] %vm3391_vm13, %v9393_v14  ;;  %4486 = vst.msk [vmem:[%s7469_s24 + $0x78] sm:$0xff] %vm3391_vm13, %v9394_v30  ;;  %v9435_v14 = vld [vmem:[#allocation51_spill] sm:$0xff]  ;;  %v9436_v30 = vld [vmem:[#allocation120_spill] sm:$0xff] }
 0x6e6   : > { %v2929_v13 = vpop.permute.xlu1 %2928  ;;  %v2927_v57 = vpop.permute.xlu0 %2926  ;;  %4517 = vst.msk [vmem:[%s7469_s24 + $0x70] sm:$0xff] %vm3969_vm14, %v7417_v47  ;;  %4518 = vst.msk [vmem:[%s7469_s24 + $0x78] sm:$0xff] %vm3969_vm14, %v7415_v29  ;;  %v9397_v29 = vld [vmem:[#allocation76_spill] sm:$0xff]  ;;  %v9398_v47 = vld [vmem:[#allocation98_spill] sm:$0xff] }
 0x6e7   : > { %4360 = vst.msk [vmem:[%s7469_s24 + $0x98] sm:$0xff] %vm2748_vm11, %v2929_v13  ;;  %4359 = vst.msk [vmem:[%s7469_s24 + $0x90] sm:$0xff] %vm2748_vm11, %v2927_v57  ;;  %v9437_v13 = vld [vmem:[#allocation134_spill] sm:$0xff]  ;;  %v9438_v57 = vld [vmem:[#allocation133_spill] sm:$0xff] }
 0x6e8   : > { %4424 = vst.msk [vmem:[%s7469_s24 + $0x98] sm:$0xff] %vm3198_vm12, %v9395_v38  ;;  %4423 = vst.msk [vmem:[%s7469_s24 + $0x90] sm:$0xff] %vm3198_vm12, %v9396_v34  ;;  %4036 = vrot.lane.b32.xlu1 %v8152_v27, %s4807_s14  ;;  %4034 = vrot.lane.b32.xlu0 %v8155_v11, %s4807_s14  ;;  %v9399_v27 = vld [vmem:[#allocation92_spill] sm:$0xff]  ;;  %v9400_v11 = vld [vmem:[#allocation70_spill] sm:$0xff] }
 0x6e9   : > { %4487 = vst.msk [vmem:[%s7469_s24 + $0x90] sm:$0xff] %vm3391_vm13, %v9397_v29  ;;  %4488 = vst.msk [vmem:[%s7469_s24 + $0x98] sm:$0xff] %vm3391_vm13, %v9398_v47  ;;  %v9439_v29 = vld [vmem:[#allocation96_spill] sm:$0xff]  ;;  %v9440_v47 = vld [vmem:[#allocation74_spill] sm:$0xff] }
 0x6ea   : > { %v2933_v33 = vpop.permute.xlu1 %2932  ;;  %v2931_v17 = vpop.permute.xlu0 %2930  ;;  %4519 = vst.msk [vmem:[%s7469_s24 + $0x90] sm:$0xff] %vm3969_vm14, %v7421_v22  ;;  %4520 = vst.msk [vmem:[%s7469_s24 + $0x98] sm:$0xff] %vm3969_vm14, %v7419_v44  ;;  %v9401_v44 = vld [vmem:[#allocation104_spill] sm:$0xff]  ;;  %v9402_v22 = vld [vmem:[#allocation125_spill] sm:$0xff] }
 0x6eb   : > { %4362 = vst.msk [vmem:[%s7469_s24 + $0xb8] sm:$0xff] %vm2748_vm11, %v2933_v33  ;;  %4361 = vst.msk [vmem:[%s7469_s24 + $0xb0] sm:$0xff] %vm2748_vm11, %v2931_v17  ;;  %v9441_v33 = vld [vmem:[#allocation136_spill] sm:$0xff]  ;;  %v9442_v17 = vld [vmem:[#allocation135_spill] sm:$0xff] }
 0x6ec   : > { %4426 = vst.msk [vmem:[%s7469_s24 + $0xb8] sm:$0xff] %vm3198_vm12, %v9399_v27  ;;  %4425 = vst.msk [vmem:[%s7469_s24 + $0xb0] sm:$0xff] %vm3198_vm12, %v9400_v11  ;;  %4040 = vrot.lane.b32.xlu1 %v8166_v37, %s4807_s14  ;;  %4038 = vrot.lane.b32.xlu0 %v8169_v62, %s4807_s14  ;;  %v9403_v37 = vld [vmem:[#allocation119_spill] sm:$0xff]  ;;  %v9404_v62 = vld [vmem:[#allocation40_spill] sm:$0xff] }
 0x6ed   : > { %4489 = vst.msk [vmem:[%s7469_s24 + $0xb0] sm:$0xff] %vm3391_vm13, %v9401_v44  ;;  %4490 = vst.msk [vmem:[%s7469_s24 + $0xb8] sm:$0xff] %vm3391_vm13, %v9402_v22 }
 0x6ee   : > { %v2937_v25 = vpop.permute.xlu1 %2936  ;;  %v2935_v8 = vpop.permute.xlu0 %2934  ;;  %4521 = vst.msk [vmem:[%s7469_s24 + $0xb0] sm:$0xff] %vm3969_vm14, %v7425_v16  ;;  %4522 = vst.msk [vmem:[%s7469_s24 + $0xb8] sm:$0xff] %vm3969_vm14, %v7423_v6  ;;  %v9405_v16 = vld [vmem:[#allocation52_spill] sm:$0xff]  ;;  %v9406_v6 = vld [vmem:[#allocation75_spill] sm:$0xff] }
 0x6ef   : > { %4364 = vst.msk [vmem:[%s7469_s24 + $0xd8] sm:$0xff] %vm2748_vm11, %v2937_v25  ;;  %4363 = vst.msk [vmem:[%s7469_s24 + $0xd0] sm:$0xff] %vm2748_vm11, %v2935_v8 }
 0x6f0   : > { %4428 = vst.msk [vmem:[%s7469_s24 + $0xd8] sm:$0xff] %vm3198_vm12, %v9403_v37  ;;  %4427 = vst.msk [vmem:[%s7469_s24 + $0xd0] sm:$0xff] %vm3198_vm12, %v9404_v62  ;;  %4044 = vrot.lane.b32.xlu1 %v8180_v60, %s4807_s14  ;;  %4042 = vrot.lane.b32.xlu0 %v8183_v55, %s4807_s14  ;;  %v9407_v60 = vld [vmem:[#allocation69_spill] sm:$0xff]  ;;  %v9408_v55 = vld [vmem:[#allocation46_spill] sm:$0xff] }
 0x6f1   : > { %4491 = vst.msk [vmem:[%s7469_s24 + $0xd0] sm:$0xff] %vm3391_vm13, %v9405_v16  ;;  %4492 = vst.msk [vmem:[%s7469_s24 + $0xd8] sm:$0xff] %vm3391_vm13, %v9406_v6 }
 0x6f2   : > { %v2941_v46 = vpop.permute.xlu1 %2940  ;;  %v2939_v54 = vpop.permute.xlu0 %2938  ;;  %4523 = vst.msk [vmem:[%s7469_s24 + $0xd0] sm:$0xff] %vm3969_vm14, %v7429_v61  ;;  %4524 = vst.msk [vmem:[%s7469_s24 + $0xd8] sm:$0xff] %vm3969_vm14, %v7427_v21  ;;  %v9409_v21 = vld [vmem:[#allocation97_spill] sm:$0xff]  ;;  %v9410_v61 = vld [vmem:[#allocation103_spill] sm:$0xff] }
 0x6f3   : > { %4366 = vst.msk [vmem:[%s7469_s24 + $0xf8] sm:$0xff] %vm2748_vm11, %v2941_v46  ;;  %4365 = vst.msk [vmem:[%s7469_s24 + $0xf0] sm:$0xff] %vm2748_vm11, %v2939_v54 }
 0x6f4   : > { %4430 = vst.msk [vmem:[%s7469_s24 + $0xf8] sm:$0xff] %vm3198_vm12, %v9407_v60  ;;  %4429 = vst.msk [vmem:[%s7469_s24 + $0xf0] sm:$0xff] %vm3198_vm12, %v9408_v55  ;;  %4048 = vrot.lane.b32.xlu1 %v8194_v53, %s4807_s14  ;;  %4046 = vrot.lane.b32.xlu0 %v8197_v0, %s4807_s14  ;;  %v9411_v53 = vld [vmem:[#allocation38_spill] sm:$0xff]  ;;  %v9412_v0 = vld [vmem:[#allocation91_spill] sm:$0xff] }
 0x6f5   : > { %4494 = vst.msk [vmem:[%s7469_s24 + $0xf8] sm:$0xff] %vm3391_vm13, %v9409_v21  ;;  %4493 = vst.msk [vmem:[%s7469_s24 + $0xf0] sm:$0xff] %vm3391_vm13, %v9410_v61 }
 0x6f6   : > { %v2945_v9 = vpop.permute.xlu1 %2944  ;;  %v2943_v49 = vpop.permute.xlu0 %2942 }
 0x6f7   : > { %4368 = vst.msk [vmem:[%s7469_s24 + $0x118] sm:$0xff] %vm2748_vm11, %v2945_v9  ;;  %4367 = vst.msk [vmem:[%s7469_s24 + $0x110] sm:$0xff] %vm2748_vm11, %v2943_v49 }
 0x6f8   : > { %4432 = vst.msk [vmem:[%s7469_s24 + $0x118] sm:$0xff] %vm3198_vm12, %v9411_v53  ;;  %4431 = vst.msk [vmem:[%s7469_s24 + $0x110] sm:$0xff] %vm3198_vm12, %v9412_v0  ;;  %4052 = vrot.lane.b32.xlu1 %v8208_v42, %s4807_s14  ;;  %4050 = vrot.lane.b32.xlu0 %v8211_v26, %s4807_s14  ;;  %v9415_v42 = vld [vmem:[#allocation49_spill] sm:$0xff]  ;;  %v9416_v26 = vld [vmem:[#allocation118_spill] sm:$0xff] }
 0x6f9   : > { %4495 = vst.msk [vmem:[%s7469_s24 + $0x110] sm:$0xff] %vm3391_vm13, %v9413_v58  ;;  %4496 = vst.msk [vmem:[%s7469_s24 + $0x118] sm:$0xff] %vm3391_vm13, %v9414_v36 }
 0x6fa   : > { %v2949_v4 = vpop.permute.xlu1 %2948  ;;  %v2947_v24 = vpop.permute.xlu0 %2946 }
 0x6fb   : > { %4370 = vst.msk [vmem:[%s7469_s24 + $0x138] sm:$0xff] %vm2748_vm11, %v2949_v4  ;;  %4369 = vst.msk [vmem:[%s7469_s24 + $0x130] sm:$0xff] %vm2748_vm11, %v2947_v24 }
 0x6fc   : > { %4434 = vst.msk [vmem:[%s7469_s24 + $0x138] sm:$0xff] %vm3198_vm12, %v9415_v42  ;;  %4433 = vst.msk [vmem:[%s7469_s24 + $0x130] sm:$0xff] %vm3198_vm12, %v9416_v26  ;;  %4056 = vrot.lane.b32.xlu1 %v8222_v31, %s4807_s14  ;;  %4054 = vrot.lane.b32.xlu0 %v8225_v48, %s4807_s14  ;;  %v9419_v31 = vld [vmem:[#allocation94_spill] sm:$0xff]  ;;  %v9420_v48 = vld [vmem:[#allocation72_spill] sm:$0xff] }
 0x6fd   : > { %4497 = vst.msk [vmem:[%s7469_s24 + $0x130] sm:$0xff] %vm3391_vm13, %v9417_v52  ;;  %4498 = vst.msk [vmem:[%s7469_s24 + $0x138] sm:$0xff] %vm3391_vm13, %v9418_v45 }
 0x6fe   : > { %v2953_v51 = vpop.permute.xlu1 %2952  ;;  %v2951_v43 = vpop.permute.xlu0 %2950 }
 0x6ff   : > { %4372 = vst.msk [vmem:[%s7469_s24 + $0x158] sm:$0xff] %vm2748_vm11, %v2953_v51  ;;  %4371 = vst.msk [vmem:[%s7469_s24 + $0x150] sm:$0xff] %vm2748_vm11, %v2951_v43 }
 0x700   : > { %4436 = vst.msk [vmem:[%s7469_s24 + $0x158] sm:$0xff] %vm3198_vm12, %v9419_v31  ;;  %4435 = vst.msk [vmem:[%s7469_s24 + $0x150] sm:$0xff] %vm3198_vm12, %v9420_v48  ;;  %4060 = vrot.lane.b32.xlu1 %v8236_v2, %s4807_s14  ;;  %4058 = vrot.lane.b32.xlu0 %v8239_v18, %s4807_s14  ;;  %v9423_v2 = vld [vmem:[#allocation121_spill] sm:$0xff]  ;;  %v9424_v18 = vld [vmem:[#allocation100_spill] sm:$0xff] }
 0x701   : > { %4499 = vst.msk [vmem:[%s7469_s24 + $0x150] sm:$0xff] %vm3391_vm13, %v9421_v39  ;;  %4500 = vst.msk [vmem:[%s7469_s24 + $0x158] sm:$0xff] %vm3391_vm13, %v9422_v35 }
 0x702   : > { %v2957_v12 = vpop.permute.xlu1 %2956  ;;  %v2955_v56 = vpop.permute.xlu0 %2954 }
 0x703   : > { %4374 = vst.msk [vmem:[%s7469_s24 + $0x178] sm:$0xff] %vm2748_vm11, %v2957_v12  ;;  %4373 = vst.msk [vmem:[%s7469_s24 + $0x170] sm:$0xff] %vm2748_vm11, %v2955_v56 }
 0x704   : > { %4438 = vst.msk [vmem:[%s7469_s24 + $0x178] sm:$0xff] %vm3198_vm12, %v9423_v2  ;;  %4437 = vst.msk [vmem:[%s7469_s24 + $0x170] sm:$0xff] %vm3198_vm12, %v9424_v18  ;;  %4064 = vrot.lane.b32.xlu1 %v8250_v7, %s4807_s14  ;;  %4062 = vrot.lane.b32.xlu0 %v8253_v63, %s4807_s14  ;;  %v9427_v7 = vld [vmem:[#allocation71_spill] sm:$0xff]  ;;  %v9428_v63 = vld [vmem:[#allocation48_spill] sm:$0xff] }
 0x705   : > { %4501 = vst.msk [vmem:[%s7469_s24 + $0x170] sm:$0xff] %vm3391_vm13, %v9425_v5  ;;  %4502 = vst.msk [vmem:[%s7469_s24 + $0x178] sm:$0xff] %vm3391_vm13, %v9426_v28 }
 0x706   : > { %v2961_v32 = vpop.permute.xlu1 %2960  ;;  %v2959_v59 = vpop.permute.xlu0 %2958 }
 0x707   : > { %4376 = vst.msk [vmem:[%s7469_s24 + $0x198] sm:$0xff] %vm2748_vm11, %v2961_v32  ;;  %4375 = vst.msk [vmem:[%s7469_s24 + $0x190] sm:$0xff] %vm2748_vm11, %v2959_v59 }
 0x708   : > { %4440 = vst.msk [vmem:[%s7469_s24 + $0x198] sm:$0xff] %vm3198_vm12, %v9427_v7  ;;  %4439 = vst.msk [vmem:[%s7469_s24 + $0x190] sm:$0xff] %vm3198_vm12, %v9428_v63 }
 0x709   : > { %4503 = vst.msk [vmem:[%s7469_s24 + $0x190] sm:$0xff] %vm3391_vm13, %v9429_v3  ;;  %4504 = vst.msk [vmem:[%s7469_s24 + $0x198] sm:$0xff] %vm3391_vm13, %v9430_v1 }
 0x70a   : > { %v2965_v10 = vpop.permute.xlu1 %2964  ;;  %v2963_v40 = vpop.permute.xlu0 %2962 }
 0x70b   : > { %4378 = vst.msk [vmem:[%s7469_s24 + $0x1b8] sm:$0xff] %vm2748_vm11, %v2965_v10  ;;  %4377 = vst.msk [vmem:[%s7469_s24 + $0x1b0] sm:$0xff] %vm2748_vm11, %v2963_v40 }
 0x70c   : > { %4442 = vst.msk [vmem:[%s7469_s24 + $0x1b8] sm:$0xff] %vm3198_vm12, %v9431_v50  ;;  %4441 = vst.msk [vmem:[%s7469_s24 + $0x1b0] sm:$0xff] %vm3198_vm12, %v9432_v15 }
 0x70d   : > { %4505 = vst.msk [vmem:[%s7469_s24 + $0x1b0] sm:$0xff] %vm3391_vm13, %v9433_v23  ;;  %4506 = vst.msk [vmem:[%s7469_s24 + $0x1b8] sm:$0xff] %vm3391_vm13, %v9434_v20 }
 0x70e   : > { %v2969_v41 = vpop.permute.xlu1 %2968  ;;  %v2967_v19 = vpop.permute.xlu0 %2966 }
 0x70f   : > { %4380 = vst.msk [vmem:[%s7469_s24 + $0x1d8] sm:$0xff] %vm2748_vm11, %v2969_v41  ;;  %4379 = vst.msk [vmem:[%s7469_s24 + $0x1d0] sm:$0xff] %vm2748_vm11, %v2967_v19 }
 0x710   : > { %4444 = vst.msk [vmem:[%s7469_s24 + $0x1d8] sm:$0xff] %vm3198_vm12, %v9435_v14  ;;  %4443 = vst.msk [vmem:[%s7469_s24 + $0x1d0] sm:$0xff] %vm3198_vm12, %v9436_v30 }
 0x711   : > { %4507 = vst.msk [vmem:[%s7469_s24 + $0x1d0] sm:$0xff] %vm3391_vm13, %v9437_v13  ;;  %4508 = vst.msk [vmem:[%s7469_s24 + $0x1d8] sm:$0xff] %vm3391_vm13, %v9438_v57 }
 0x712   : > { %v2973_v38 = vpop.permute.xlu1 %2972  ;;  %v2971_v34 = vpop.permute.xlu0 %2970 }
 0x713   : > { %4382 = vst.msk [vmem:[%s7469_s24 + $0x1f8] sm:$0xff] %vm2748_vm11, %v2973_v38  ;;  %4381 = vst.msk [vmem:[%s7469_s24 + $0x1f0] sm:$0xff] %vm2748_vm11, %v2971_v34 }
 0x714   : > { %4446 = vst.msk [vmem:[%s7469_s24 + $0x1f8] sm:$0xff] %vm3198_vm12, %v9439_v29  ;;  %4445 = vst.msk [vmem:[%s7469_s24 + $0x1f0] sm:$0xff] %vm3198_vm12, %v9440_v47 }
 0x715   : > { %4509 = vst.msk [vmem:[%s7469_s24 + $0x1f0] sm:$0xff] %vm3391_vm13, %v9441_v33  ;;  %4510 = vst.msk [vmem:[%s7469_s24 + $0x1f8] sm:$0xff] %vm3391_vm13, %v9442_v17 }
 0x716   : > { %v3904_v27 = vpop.permute.xlu1 %3903  ;;  %v3902_v11 = vpop.permute.xlu0 %3901 }
 0x717   : > { %3985 = vst.msk [vmem:[%s7469_s24 + $0xe8] sm:$0xff] %vm3969_vm14, %v3904_v27  ;;  %4526 = vst.msk [vmem:[%s7469_s24 + $0xf8] sm:$0xff] %vm3969_vm14, %v3904_v27 }
 0x718   : > { %3984 = vst.msk [vmem:[%s7469_s24 + $0xe0] sm:$0xff] %vm3969_vm14, %v3902_v11  ;;  %4525 = vst.msk [vmem:[%s7469_s24 + $0xf0] sm:$0xff] %vm3969_vm14, %v3902_v11 }
 0x71a   : > { %v3908_v44 = vpop.permute.xlu1 %3907  ;;  %v3906_v22 = vpop.permute.xlu0 %3905 }
 0x71b   : > { %3987 = vst.msk [vmem:[%s7469_s24 + $0x108] sm:$0xff] %vm3969_vm14, %v3908_v44  ;;  %4528 = vst.msk [vmem:[%s7469_s24 + $0x118] sm:$0xff] %vm3969_vm14, %v3908_v44 }
 0x71c   : > { %3986 = vst.msk [vmem:[%s7469_s24 + $0x100] sm:$0xff] %vm3969_vm14, %v3906_v22  ;;  %4527 = vst.msk [vmem:[%s7469_s24 + $0x110] sm:$0xff] %vm3969_vm14, %v3906_v22 }
 0x71e   : > { %v3912_v25 = vpop.permute.xlu1 %3911  ;;  %v3910_v8 = vpop.permute.xlu0 %3909 }
 0x71f   : > { %3989 = vst.msk [vmem:[%s7469_s24 + $0x128] sm:$0xff] %vm3969_vm14, %v3912_v25  ;;  %4530 = vst.msk [vmem:[%s7469_s24 + $0x138] sm:$0xff] %vm3969_vm14, %v3912_v25 }
 0x720   : > { %3988 = vst.msk [vmem:[%s7469_s24 + $0x120] sm:$0xff] %vm3969_vm14, %v3910_v8  ;;  %4529 = vst.msk [vmem:[%s7469_s24 + $0x130] sm:$0xff] %vm3969_vm14, %v3910_v8 }
 0x722   : > { %v3916_v37 = vpop.permute.xlu1 %3915  ;;  %v3914_v62 = vpop.permute.xlu0 %3913 }
 0x723   : > { %3991 = vst.msk [vmem:[%s7469_s24 + $0x148] sm:$0xff] %vm3969_vm14, %v3916_v37  ;;  %4532 = vst.msk [vmem:[%s7469_s24 + $0x158] sm:$0xff] %vm3969_vm14, %v3916_v37 }
 0x724   : > { %3990 = vst.msk [vmem:[%s7469_s24 + $0x140] sm:$0xff] %vm3969_vm14, %v3914_v62  ;;  %4531 = vst.msk [vmem:[%s7469_s24 + $0x150] sm:$0xff] %vm3969_vm14, %v3914_v62 }
 0x726   : > { %v3920_v16 = vpop.permute.xlu1 %3919  ;;  %v3918_v6 = vpop.permute.xlu0 %3917 }
 0x727   : > { %3993 = vst.msk [vmem:[%s7469_s24 + $0x168] sm:$0xff] %vm3969_vm14, %v3920_v16  ;;  %4534 = vst.msk [vmem:[%s7469_s24 + $0x178] sm:$0xff] %vm3969_vm14, %v3920_v16 }
 0x728   : > { %3992 = vst.msk [vmem:[%s7469_s24 + $0x160] sm:$0xff] %vm3969_vm14, %v3918_v6  ;;  %4533 = vst.msk [vmem:[%s7469_s24 + $0x170] sm:$0xff] %vm3969_vm14, %v3918_v6 }
 0x72a   : > { %v3924_v46 = vpop.permute.xlu1 %3923  ;;  %v3922_v54 = vpop.permute.xlu0 %3921 }
 0x72b   : > { %3995 = vst.msk [vmem:[%s7469_s24 + $0x188] sm:$0xff] %vm3969_vm14, %v3924_v46  ;;  %4536 = vst.msk [vmem:[%s7469_s24 + $0x198] sm:$0xff] %vm3969_vm14, %v3924_v46 }
 0x72c   : > { %3994 = vst.msk [vmem:[%s7469_s24 + $0x180] sm:$0xff] %vm3969_vm14, %v3922_v54  ;;  %4535 = vst.msk [vmem:[%s7469_s24 + $0x190] sm:$0xff] %vm3969_vm14, %v3922_v54 }
 0x72e   : > { %v3928_v60 = vpop.permute.xlu1 %3927  ;;  %v3926_v55 = vpop.permute.xlu0 %3925 }
 0x72f   : > { %3997 = vst.msk [vmem:[%s7469_s24 + $0x1a8] sm:$0xff] %vm3969_vm14, %v3928_v60  ;;  %4538 = vst.msk [vmem:[%s7469_s24 + $0x1b8] sm:$0xff] %vm3969_vm14, %v3928_v60 }
 0x730   : > { %3996 = vst.msk [vmem:[%s7469_s24 + $0x1a0] sm:$0xff] %vm3969_vm14, %v3926_v55  ;;  %4537 = vst.msk [vmem:[%s7469_s24 + $0x1b0] sm:$0xff] %vm3969_vm14, %v3926_v55 }
 0x732   : > { %v3932_v21 = vpop.permute.xlu1 %3931  ;;  %v3930_v61 = vpop.permute.xlu0 %3929 }
 0x733   : > { %3999 = vst.msk [vmem:[%s7469_s24 + $0x1c8] sm:$0xff] %vm3969_vm14, %v3932_v21  ;;  %4540 = vst.msk [vmem:[%s7469_s24 + $0x1d8] sm:$0xff] %vm3969_vm14, %v3932_v21 }
 0x734   : > { %3998 = vst.msk [vmem:[%s7469_s24 + $0x1c0] sm:$0xff] %vm3969_vm14, %v3930_v61  ;;  %4539 = vst.msk [vmem:[%s7469_s24 + $0x1d0] sm:$0xff] %vm3969_vm14, %v3930_v61 }
 0x736   : > { %v3936_v9 = vpop.permute.xlu1 %3935  ;;  %v3934_v49 = vpop.permute.xlu0 %3933 }
 0x737   : > { %4001 = vst.msk [vmem:[%s7469_s24 + $0x1e8] sm:$0xff] %vm3969_vm14, %v3936_v9  ;;  %4542 = vst.msk [vmem:[%s7469_s24 + $0x1f8] sm:$0xff] %vm3969_vm14, %v3936_v9 }
 0x738   : > { %4000 = vst.msk [vmem:[%s7469_s24 + $0x1e0] sm:$0xff] %vm3969_vm14, %v3934_v49  ;;  %4541 = vst.msk [vmem:[%s7469_s24 + $0x1f0] sm:$0xff] %vm3969_vm14, %v3934_v49 }
 0x73a   : > { %v4005_v53 = vpop.permute.xlu1 %4004  ;;  %v4003_v0 = vpop.permute.xlu0 %4002 }
 0x73b   : > { %4100 = vst.msk [vmem:[%s7469_s24 + $0x8] sm:$0xff] %vm4098_vm15, %v4005_v53  ;;  %4544 = vst.msk [vmem:[%s7469_s24 + $0x18] sm:$0xff] %vm4098_vm15, %v4005_v53 }
 0x73c   : > { %4099 = vst.msk [vmem:[%s7469_s24] sm:$0xff] %vm4098_vm15, %v4003_v0  ;;  %4543 = vst.msk [vmem:[%s7469_s24 + $0x10] sm:$0xff] %vm4098_vm15, %v4003_v0 }
 0x73e   : > { %v4009_v58 = vpop.permute.xlu1 %4008  ;;  %v4007_v36 = vpop.permute.xlu0 %4006 }
 0x73f   : > { %4102 = vst.msk [vmem:[%s7469_s24 + $0x28] sm:$0xff] %vm4098_vm15, %v4009_v58  ;;  %4546 = vst.msk [vmem:[%s7469_s24 + $0x38] sm:$0xff] %vm4098_vm15, %v4009_v58 }
 0x740   : > { %4101 = vst.msk [vmem:[%s7469_s24 + $0x20] sm:$0xff] %vm4098_vm15, %v4007_v36  ;;  %4545 = vst.msk [vmem:[%s7469_s24 + $0x30] sm:$0xff] %vm4098_vm15, %v4007_v36 }
 0x742   : > { %v4013_v4 = vpop.permute.xlu1 %4012  ;;  %v4011_v24 = vpop.permute.xlu0 %4010 }
 0x743   : > { %4104 = vst.msk [vmem:[%s7469_s24 + $0x48] sm:$0xff] %vm4098_vm15, %v4013_v4  ;;  %4548 = vst.msk [vmem:[%s7469_s24 + $0x58] sm:$0xff] %vm4098_vm15, %v4013_v4 }
 0x744   : > { %4103 = vst.msk [vmem:[%s7469_s24 + $0x40] sm:$0xff] %vm4098_vm15, %v4011_v24  ;;  %4547 = vst.msk [vmem:[%s7469_s24 + $0x50] sm:$0xff] %vm4098_vm15, %v4011_v24 }
 0x746   : > { %v4017_v42 = vpop.permute.xlu1 %4016  ;;  %v4015_v26 = vpop.permute.xlu0 %4014 }
 0x747   : > { %4106 = vst.msk [vmem:[%s7469_s24 + $0x68] sm:$0xff] %vm4098_vm15, %v4017_v42  ;;  %4550 = vst.msk [vmem:[%s7469_s24 + $0x78] sm:$0xff] %vm4098_vm15, %v4017_v42 }
 0x748   : > { %4105 = vst.msk [vmem:[%s7469_s24 + $0x60] sm:$0xff] %vm4098_vm15, %v4015_v26  ;;  %4549 = vst.msk [vmem:[%s7469_s24 + $0x70] sm:$0xff] %vm4098_vm15, %v4015_v26 }
 0x74a   : > { %v4021_v52 = vpop.permute.xlu1 %4020  ;;  %v4019_v45 = vpop.permute.xlu0 %4018 }
 0x74b   : > { %4108 = vst.msk [vmem:[%s7469_s24 + $0x88] sm:$0xff] %vm4098_vm15, %v4021_v52  ;;  %4552 = vst.msk [vmem:[%s7469_s24 + $0x98] sm:$0xff] %vm4098_vm15, %v4021_v52 }
 0x74c   : > { %4107 = vst.msk [vmem:[%s7469_s24 + $0x80] sm:$0xff] %vm4098_vm15, %v4019_v45  ;;  %4551 = vst.msk [vmem:[%s7469_s24 + $0x90] sm:$0xff] %vm4098_vm15, %v4019_v45 }
 0x74e   : > { %v4025_v51 = vpop.permute.xlu1 %4024  ;;  %v4023_v43 = vpop.permute.xlu0 %4022 }
 0x74f   : > { %4110 = vst.msk [vmem:[%s7469_s24 + $0xa8] sm:$0xff] %vm4098_vm15, %v4025_v51  ;;  %4554 = vst.msk [vmem:[%s7469_s24 + $0xb8] sm:$0xff] %vm4098_vm15, %v4025_v51 }
 0x750   : > { %4109 = vst.msk [vmem:[%s7469_s24 + $0xa0] sm:$0xff] %vm4098_vm15, %v4023_v43  ;;  %4553 = vst.msk [vmem:[%s7469_s24 + $0xb0] sm:$0xff] %vm4098_vm15, %v4023_v43 }
 0x752   : > { %v4029_v31 = vpop.permute.xlu1 %4028  ;;  %v4027_v48 = vpop.permute.xlu0 %4026 }
 0x753   : > { %4112 = vst.msk [vmem:[%s7469_s24 + $0xc8] sm:$0xff] %vm4098_vm15, %v4029_v31  ;;  %4556 = vst.msk [vmem:[%s7469_s24 + $0xd8] sm:$0xff] %vm4098_vm15, %v4029_v31 }
 0x754   : > { %4111 = vst.msk [vmem:[%s7469_s24 + $0xc0] sm:$0xff] %vm4098_vm15, %v4027_v48  ;;  %4555 = vst.msk [vmem:[%s7469_s24 + $0xd0] sm:$0xff] %vm4098_vm15, %v4027_v48 }
 0x756   : > { %v4033_v39 = vpop.permute.xlu1 %4032  ;;  %v4031_v35 = vpop.permute.xlu0 %4030 }
 0x757   : > { %4114 = vst.msk [vmem:[%s7469_s24 + $0xe8] sm:$0xff] %vm4098_vm15, %v4033_v39  ;;  %4558 = vst.msk [vmem:[%s7469_s24 + $0xf8] sm:$0xff] %vm4098_vm15, %v4033_v39 }
 0x758   : > { %4113 = vst.msk [vmem:[%s7469_s24 + $0xe0] sm:$0xff] %vm4098_vm15, %v4031_v35  ;;  %4557 = vst.msk [vmem:[%s7469_s24 + $0xf0] sm:$0xff] %vm4098_vm15, %v4031_v35 }
 0x75a   : > { %v4037_v12 = vpop.permute.xlu1 %4036  ;;  %v4035_v56 = vpop.permute.xlu0 %4034 }
 0x75b   : > { %4116 = vst.msk [vmem:[%s7469_s24 + $0x108] sm:$0xff] %vm4098_vm15, %v4037_v12  ;;  %4560 = vst.msk [vmem:[%s7469_s24 + $0x118] sm:$0xff] %vm4098_vm15, %v4037_v12 }
 0x75c   : > { %4115 = vst.msk [vmem:[%s7469_s24 + $0x100] sm:$0xff] %vm4098_vm15, %v4035_v56  ;;  %4559 = vst.msk [vmem:[%s7469_s24 + $0x110] sm:$0xff] %vm4098_vm15, %v4035_v56 }
 0x75e   : > { %v4041_v2 = vpop.permute.xlu1 %4040  ;;  %v4039_v18 = vpop.permute.xlu0 %4038 }
 0x75f   : > { %4118 = vst.msk [vmem:[%s7469_s24 + $0x128] sm:$0xff] %vm4098_vm15, %v4041_v2  ;;  %4562 = vst.msk [vmem:[%s7469_s24 + $0x138] sm:$0xff] %vm4098_vm15, %v4041_v2 }
 0x760   : > { %4117 = vst.msk [vmem:[%s7469_s24 + $0x120] sm:$0xff] %vm4098_vm15, %v4039_v18  ;;  %4561 = vst.msk [vmem:[%s7469_s24 + $0x130] sm:$0xff] %vm4098_vm15, %v4039_v18 }
 0x762   : > { %v4045_v5 = vpop.permute.xlu1 %4044  ;;  %v4043_v28 = vpop.permute.xlu0 %4042 }
 0x763   : > { %4120 = vst.msk [vmem:[%s7469_s24 + $0x148] sm:$0xff] %vm4098_vm15, %v4045_v5  ;;  %4564 = vst.msk [vmem:[%s7469_s24 + $0x158] sm:$0xff] %vm4098_vm15, %v4045_v5 }
 0x764   : > { %4119 = vst.msk [vmem:[%s7469_s24 + $0x140] sm:$0xff] %vm4098_vm15, %v4043_v28  ;;  %4563 = vst.msk [vmem:[%s7469_s24 + $0x150] sm:$0xff] %vm4098_vm15, %v4043_v28 }
 0x766   : > { %v4049_v32 = vpop.permute.xlu1 %4048  ;;  %v4047_v59 = vpop.permute.xlu0 %4046 }
 0x767   : > { %4122 = vst.msk [vmem:[%s7469_s24 + $0x168] sm:$0xff] %vm4098_vm15, %v4049_v32  ;;  %4566 = vst.msk [vmem:[%s7469_s24 + $0x178] sm:$0xff] %vm4098_vm15, %v4049_v32 }
 0x768   : > { %4121 = vst.msk [vmem:[%s7469_s24 + $0x160] sm:$0xff] %vm4098_vm15, %v4047_v59  ;;  %4565 = vst.msk [vmem:[%s7469_s24 + $0x170] sm:$0xff] %vm4098_vm15, %v4047_v59 }
 0x76a   : > { %v4053_v7 = vpop.permute.xlu1 %4052  ;;  %v4051_v63 = vpop.permute.xlu0 %4050 }
 0x76b   : > { %4124 = vst.msk [vmem:[%s7469_s24 + $0x188] sm:$0xff] %vm4098_vm15, %v4053_v7  ;;  %4568 = vst.msk [vmem:[%s7469_s24 + $0x198] sm:$0xff] %vm4098_vm15, %v4053_v7 }
 0x76c   : > { %4123 = vst.msk [vmem:[%s7469_s24 + $0x180] sm:$0xff] %vm4098_vm15, %v4051_v63  ;;  %4567 = vst.msk [vmem:[%s7469_s24 + $0x190] sm:$0xff] %vm4098_vm15, %v4051_v63 }
 0x76e   : > { %v4057_v3 = vpop.permute.xlu1 %4056  ;;  %v4055_v1 = vpop.permute.xlu0 %4054 }
 0x76f   : > { %4126 = vst.msk [vmem:[%s7469_s24 + $0x1a8] sm:$0xff] %vm4098_vm15, %v4057_v3  ;;  %4570 = vst.msk [vmem:[%s7469_s24 + $0x1b8] sm:$0xff] %vm4098_vm15, %v4057_v3 }
 0x770   : > { %4125 = vst.msk [vmem:[%s7469_s24 + $0x1a0] sm:$0xff] %vm4098_vm15, %v4055_v1  ;;  %4569 = vst.msk [vmem:[%s7469_s24 + $0x1b0] sm:$0xff] %vm4098_vm15, %v4055_v1 }
 0x772   : > { %v4061_v10 = vpop.permute.xlu1 %4060  ;;  %v4059_v40 = vpop.permute.xlu0 %4058 }
 0x773   : > { %4128 = vst.msk [vmem:[%s7469_s24 + $0x1c8] sm:$0xff] %vm4098_vm15, %v4061_v10  ;;  %4572 = vst.msk [vmem:[%s7469_s24 + $0x1d8] sm:$0xff] %vm4098_vm15, %v4061_v10 }
 0x774   : > { %4127 = vst.msk [vmem:[%s7469_s24 + $0x1c0] sm:$0xff] %vm4098_vm15, %v4059_v40  ;;  %4571 = vst.msk [vmem:[%s7469_s24 + $0x1d0] sm:$0xff] %vm4098_vm15, %v4059_v40 }
 0x776   : > { %v4065_v50 = vpop.permute.xlu1 %4064  ;;  %v4063_v15 = vpop.permute.xlu0 %4062 }
 0x777   : > { %4130 = vst.msk [vmem:[%s7469_s24 + $0x1e8] sm:$0xff] %vm4098_vm15, %v4065_v50  ;;  %4574 = vst.msk [vmem:[%s7469_s24 + $0x1f8] sm:$0xff] %vm4098_vm15, %v4065_v50 }
 0x778   : > { %4129 = vst.msk [vmem:[%s7469_s24 + $0x1e0] sm:$0xff] %vm4098_vm15, %v4063_v15  ;;  %4573 = vst.msk [vmem:[%s7469_s24 + $0x1f0] sm:$0xff] %vm4098_vm15, %v4063_v15 }
 0x779 PF: > { %s14_s15 = sadd.s32 1, %s4789_s15  }
 0x77a   : > { %p11_p4 = scmp.ge.s32.totalorder %s14_s15, 4  }
 0x77c   :  { %13 = sbr.rel (!%p11_p4) target bundleno = 1 (0x1), region = 77 }

</bundles_post_ra>
